<compile_context>
chip_gen: v5e
topology: v5e:2x2
jax: 0.10.0
libtpu: 0.0.40
codegen_flags: <defaults>
</compile_context>

<pallas_src>
import functools

import jax
import jax.numpy as jnp
from jax import lax
from jax.experimental import pallas as pl
from jax.experimental.pallas import tpu as pltpu  # noqa: F401  (kept for TPU-specific tuning hooks)

# ----------------------------- model config (small) -------------------------
H = 32            # hidden size
NH = 2            # attention heads
DH = H // NH      # head dim
L = 2             # encoder layers
I = 64            # FFN intermediate
VOCAB = 128       # vocab size (lane-dense MLM decoder output)
TYPE_VOCAB = 2
MAX_POS = 32
IMG_FEAT = 16     # image region feature dim
IMG_LOC = 5       # image location dim (x1,y1,x2,y2,area)
IMG_TARGET = 16   # image target distribution size (for masked-image KL loss)
LN_EPS = 1e-12

_MXU_DTYPE = jnp.bfloat16   # MXU-native operand dtype on v5e/v6e/v7x (f32 accumulation)

# Row indices inside the packed global-vector table (shape [GV_ROWS, 128]).
(GV_EMB_G, GV_EMB_B, GV_IMGPROJ_B, GV_IMG_G, GV_IMG_B, GV_POOL_B, GV_NSP_B,
 GV_MLM_TB, GV_MLM_G, GV_MLM_B, GV_MLM_DB, GV_IMGP_B) = range(12)
GV_ROWS = 12

# Row indices inside the packed per-layer-vector table (shape [L, LV_ROWS, 128]).
(LV_QKV_B, LV_AO_B, LV_ALN_G, LV_ALN_B, LV_FI_B, LV_FO_B, LV_FLN_G, LV_FLN_B) = range(8)
LV_ROWS = 8
VEC_W = 128


# ----------------------------- in-kernel helpers -----------------------------
def _ln(x, g, b, eps=LN_EPS):
    mu = jnp.mean(x, axis=-1, keepdims=True)
    xc = x - mu
    var = jnp.mean(xc * xc, axis=-1, keepdims=True)
    return xc * lax.rsqrt(var + eps) * g + b


def _gelu(x):
    # TODO(synk): HF/ViLBERT BERT uses exact erf GELU; tanh approximation used here.
    return jax.nn.gelu(x, approximate=True)


def _log_softmax(x):
    m = jnp.max(x, axis=-1, keepdims=True)
    s = x - m
    return s - jnp.log(jnp.sum(jnp.exp(s), axis=-1, keepdims=True))


def _sum_all(v):
    # [M, N] -> [1, 1] (lane reduce, then sublane reduce; keeps everything 2-D)
    return jnp.sum(jnp.sum(v, axis=1, keepdims=True), axis=0, keepdims=True)


def _mm(a, b):
    # bf16 MXU operands, f32 accumulation.
    return jnp.dot(a.astype(_MXU_DTYPE), b.astype(_MXU_DTYPE),
                   preferred_element_type=jnp.float32)


def _mm_nt(a, b):
    # a @ b.T without materializing the transpose (contract last dim of both).
    return lax.dot_general(a.astype(_MXU_DTYPE), b.astype(_MXU_DTYPE),
                           (((1,), (1,)), ((), ())),
                           preferred_element_type=jnp.float32)


# ----------------------------- the single fused kernel ------------------------
def _vdgr_fused_kernel(B, T, R,
                       txt_ref, imgin_ref, mask_ref,
                       mlmlbl_ref, nsplbl_ref, imglbl_ref, imgtgt_ref,
                       gvec_ref, imgproj_ref, pooler_ref, nspw_ref,
                       mlmtw_ref, mlmdw_ref, imgpw_ref,
                       qkvw_ref, aow_ref, fiw_ref, fow_ref, lvec_ref,
                       seqrel_ref, mlmloss_ref, imgloss_ref, nsploss_ref):
    """Whole model (post-embedding-gather) fused into one kernel.

    Row layout of the hidden slab: rows [0, B*T) = text tokens (batch-major),
    rows [B*T, B*T + B*R) = image regions (batch-major). Batch membership is
    encoded purely in the precomputed block-diagonal additive mask, so every
    slab slice is sublane-tile aligned.
    """
    gv = gvec_ref[...]                                   # [GV_ROWS, 128]

    def grow(i, n):
        return gv[i:i + 1, :n]

    # --- embeddings: text LayerNorm, image (feat|loc) projection + LayerNorm ---
    txt = _ln(txt_ref[...], grow(GV_EMB_G, H), grow(GV_EMB_B, H))          # [B*T, H]
    img = _ln(_mm(imgin_ref[...], imgproj_ref[...]) + grow(GV_IMGPROJ_B, H),
              grow(GV_IMG_G, H), grow(GV_IMG_B, H))                        # [B*R, H]
    x = jnp.concatenate([txt, img], axis=0)                                # [ROWS, H]
    add_mask = mask_ref[...]                                               # [ROWS, ROWS]

    # --- encoder: L layers, static loop, activation stays in vregs/VMEM ---
    scale = 1.0 / float(DH) ** 0.5
    for l in range(L):
        qkv_w = qkvw_ref[l]                      # [H, 3H]
        ao_w = aow_ref[l]                        # [H, H]
        fi_w = fiw_ref[l]                        # [H, I]
        fo_w = fow_ref[l]                        # [I, H]
        lv = lvec_ref[l]                         # [LV_ROWS, 128]

        def lrow(i, n):
            return lv[i:i + 1, :n]

        qkv = _mm(x, qkv_w) + lrow(LV_QKV_B, 3 * H)                        # [ROWS, 3H]

        # attention: heads on the lane axis; output projection folded into the
        # per-head accumulation (no concats, no per-batch slicing — mask does it).
        attn = None
        for h in range(NH):
            q_h = qkv[:, h * DH:(h + 1) * DH]
            k_h = qkv[:, H + h * DH:H + (h + 1) * DH]
            v_h = qkv[:, 2 * H + h * DH:2 * H + (h + 1) * DH]
            s = _mm_nt(q_h, k_h) * scale + add_mask                        # [ROWS, ROWS]
            s = s - jnp.max(s, axis=-1, keepdims=True)
            p = jnp.exp(s)
            p = p * pl.reciprocal(jnp.sum(p, axis=-1, keepdims=True), approx=True)
            ctx = _mm(p, v_h)                                              # [ROWS, DH]
            contrib = _mm(ctx, ao_w[h * DH:(h + 1) * DH, :])               # [ROWS, H]
            attn = contrib if attn is None else attn + contrib

        h1 = _ln(x + attn + lrow(LV_AO_B, H), lrow(LV_ALN_G, H), lrow(LV_ALN_B, H))
        ffn = _gelu(_mm(h1, fi_w) + lrow(LV_FI_B, I))
        ffn = _mm(ffn, fo_w) + lrow(LV_FO_B, H)
        x = _ln(h1 + ffn, lrow(LV_FLN_G, H), lrow(LV_FLN_B, H))

    # --- pooler + NSP head ([CLS] is row b*T of each batch's text block) ---
    cls = jnp.concatenate([x[b * T:b * T + 1, :] for b in range(B)], axis=0)   # [B, H]
    pooled = jnp.tanh(_mm(cls, pooler_ref[...]) + grow(GV_POOL_B, H))
    nsp_logits = _mm(pooled, nspw_ref[...]) + grow(GV_NSP_B, 2)                # [B, 2]
    seqrel_ref[...] = nsp_logits

    # --- MLM head + loss (lane-dense VOCAB=128, fused CE with ignore_index=-1) ---
    text_h = x[0:B * T, :]                                                     # aligned slice
    mh = _gelu(_mm(text_h, mlmtw_ref[...]) + grow(GV_MLM_TB, H))
    mh = _ln(mh, grow(GV_MLM_G, H), grow(GV_MLM_B, H))
    mlm_logits = _mm(mh, mlmdw_ref[...]) + grow(GV_MLM_DB, VOCAB)              # [B*T, VOCAB]
    mlm_logp = _log_softmax(mlm_logits)
    lbl = mlmlbl_ref[...]                                                      # [B*T, 1] int32
    onehot = (lax.broadcasted_iota(jnp.int32, (B * T, VOCAB), 1) == lbl).astype(jnp.float32)
    valid = (lbl != -1).astype(jnp.float32)                                    # [B*T, 1]
    nll = -jnp.sum(mlm_logp * onehot, axis=-1, keepdims=True)                  # [B*T, 1]
    mlm_num = _sum_all(nll * valid)
    mlm_den = jnp.maximum(_sum_all(valid), 1.0)
    mlmloss_ref[...] = mlm_num / mlm_den

    # --- masked-image KL loss (over regions with image_label == 1) ---
    img_h = x[B * T:, :]                                                       # aligned slice
    img_logits = _mm(img_h, imgpw_ref[...]) + grow(GV_IMGP_B, IMG_TARGET)      # [B*R, TGT]
    img_logp = _log_softmax(img_logits)
    tgt = imgtgt_ref[...]                                                      # [B*R, TGT]
    kl = jnp.sum(tgt * (jnp.log(tgt + 1e-9) - img_logp), axis=-1, keepdims=True)
    wm = imglbl_ref[...]                                                       # [B*R, 1] f32
    img_num = _sum_all(kl * wm)
    img_den = jnp.maximum(_sum_all(wm), 1.0)
    imgloss_ref[...] = img_num / img_den

    # --- NSP loss ---
    nsp_logp = _log_softmax(nsp_logits)
    nlbl = nsplbl_ref[...]                                                     # [B, 1] int32
    nsp_oh = (lax.broadcasted_iota(jnp.int32, (B, 2), 1) == nlbl).astype(jnp.float32)
    nsp_nll = -jnp.sum(nsp_logp * nsp_oh, axis=-1, keepdims=True)              # [B, 1]
    nsploss_ref[...] = _sum_all(nsp_nll) / float(B)


# ----------------------------- parameters ------------------------------------
def _pack_rows(vecs, rows, width=VEC_W):
    out = jnp.zeros((rows, width), jnp.float32)
    for i, v in enumerate(vecs):
        out = out.at[i, :v.shape[0]].set(v.astype(jnp.float32))
    return out


def init_params(key):
    keys = iter(jax.random.split(key, 64))

    def w(shape):
        return 0.02 * jax.random.normal(next(keys), shape, jnp.float32)

    ones_h = jnp.ones((H,), jnp.float32)
    zeros_h = jnp.zeros((H,), jnp.float32)

    gvec = _pack_rows([
        ones_h,                        # GV_EMB_G
        zeros_h,                       # GV_EMB_B
        jnp.zeros((H,)),               # GV_IMGPROJ_B
        ones_h,                        # GV_IMG_G
        zeros_h,                       # GV_IMG_B
        jnp.zeros((H,)),               # GV_POOL_B
        jnp.zeros((2,)),               # GV_NSP_B
        jnp.zeros((H,)),               # GV_MLM_TB
        ones_h,                        # GV_MLM_G
        zeros_h,                       # GV_MLM_B
        jnp.zeros((VOCAB,)),           # GV_MLM_DB
        jnp.zeros((IMG_TARGET,)),      # GV_IMGP_B
    ], rows=GV_ROWS)

    qkv_ws, ao_ws, fi_ws, fo_ws, lvecs = [], [], [], [], []
    for _ in range(L):
        qkv_ws.append(w((H, 3 * H)))
        ao_ws.append(w((H, H)))
        fi_ws.append(w((H, I)))
        fo_ws.append(w((I, H)))
        lvecs.append(_pack_rows([
            jnp.zeros((3 * H,)),       # LV_QKV_B
            jnp.zeros((H,)),           # LV_AO_B
            ones_h,                    # LV_ALN_G
            zeros_h,                   # LV_ALN_B
            jnp.zeros((I,)),           # LV_FI_B
            jnp.zeros((H,)),           # LV_FO_B
            ones_h,                    # LV_FLN_G
            zeros_h,                   # LV_FLN_B
        ], rows=LV_ROWS))

    return {
        "word_emb": w((VOCAB, H)),
        "pos_emb": w((MAX_POS, H)),
        "type_emb": w((TYPE_VOCAB, H)),
        "gvec": gvec,
        "img_proj_w": w((IMG_FEAT + IMG_LOC, H)),
        "pooler_w": w((H, H)),
        "nsp_w": w((H, 2)),
        "mlm_tw": w((H, H)),
        "mlm_dw": w((H, VOCAB)),
        "img_pred_w": w((H, IMG_TARGET)),
        "qkv_w": jnp.stack(qkv_ws),    # [L, H, 3H]
        "ao_w": jnp.stack(ao_ws),      # [L, H, H]
        "fi_w": jnp.stack(fi_ws),      # [L, H, I]
        "fo_w": jnp.stack(fo_ws),      # [L, I, H]
        "lvec": jnp.stack(lvecs),      # [L, LV_ROWS, 128]
    }


# ----------------------------- forward ----------------------------------------
def vdgr_forward(params, input_ids, image_feat, image_loc,
                 image_edge_indices, image_edge_attributes,
                 question_edge_indices, question_edge_attributes,
                 question_limits, history_edge_indices, history_sep_indices,
                 sep_indices=None, sep_len=None, token_type_ids=None,
                 attention_mask=None, masked_lm_labels=None,
                 next_sentence_label=None, image_attention_mask=None,
                 image_label=None, image_target=None):
    # TODO(synk): VDGR's graph-augmented attention (edge_indices / edge_attributes /
    # question_limits / sep indices drive a GNN inside BERT); accepted but unused here.
    B, T = input_ids.shape
    R = image_feat.shape[1]

    if token_type_ids is None:
        token_type_ids = jnp.zeros_like(input_ids)
    if attention_mask is None:
        attention_mask = jnp.ones((B, T), jnp.float32)
    if image_attention_mask is None:
        image_attention_mask = jnp.ones((B, R), jnp.float32)

    # --- embedding gathers stay in the wrapper (XLA glue) ---
    txt_emb = (params["word_emb"][input_ids]
               + params["pos_emb"][:T][None, :, :]
               + params["type_emb"][token_type_ids]).reshape(B * T, H)
    img_in = jnp.concatenate(
        [image_feat.reshape(B * R, IMG_FEAT), image_loc.reshape(B * R, IMG_LOC)],
        axis=-1).astype(jnp.float32)                                      # [B*R, 21]

    # --- block-diagonal additive attention mask over the packed row layout ---
    row_batch = jnp.concatenate(
        [jnp.repeat(jnp.arange(B, dtype=jnp.int32), T),
         jnp.repeat(jnp.arange(B, dtype=jnp.int32), R)])                  # [ROWS]
    key_valid = jnp.concatenate(
        [attention_mask.astype(jnp.float32).reshape(-1),
         image_attention_mask.astype(jnp.float32).reshape(-1)])           # [ROWS]
    allowed = ((row_batch[:, None] == row_batch[None, :])
               & (key_valid[None, :] > 0.5)).astype(jnp.float32)
    mask2d = (1.0 - allowed) * -10000.0                                   # [ROWS, ROWS]

    have_labels = (next_sentence_label is not None and masked_lm_labels is not None
                   and image_target is not None)
    mlm_lbl = (masked_lm_labels if have_labels
               else jnp.full((B, T), -1, jnp.int32)).astype(jnp.int32).reshape(B * T, 1)
    nsp_lbl = (next_sentence_label if have_labels
               else jnp.zeros((B,), jnp.int32)).astype(jnp.int32).reshape(B, 1)
    img_lbl = ((image_label == 1).astype(jnp.float32)
               if (have_labels and image_label is not None)
               else jnp.zeros((B, R), jnp.float32)).reshape(B * R, 1)
    img_tgt = (image_target if have_labels
               else jnp.full((B, R, IMG_TARGET), 1.0 / IMG_TARGET, jnp.float32)
               ).astype(jnp.float32).reshape(B * R, IMG_TARGET)

    kernel = functools.partial(_vdgr_fused_kernel, B, T, R)
    out_shapes = (jax.ShapeDtypeStruct((B, 2), jnp.float32),    # seq_relationship_score
                  jax.ShapeDtypeStruct((1, 1), jnp.float32),    # masked_lm_loss
                  jax.ShapeDtypeStruct((1, 1), jnp.float32),    # masked_img_loss
                  jax.ShapeDtypeStruct((1, 1), jnp.float32))    # nsp_loss

    seq_rel, mlm_loss, img_loss, nsp_loss = pl.pallas_call(
        kernel, out_shape=out_shapes,
    )(txt_emb, img_in, mask2d, mlm_lbl, nsp_lbl, img_lbl, img_tgt,
      params["gvec"], params["img_proj_w"], params["pooler_w"], params["nsp_w"],
      params["mlm_tw"], params["mlm_dw"], params["img_pred_w"],
      params["qkv_w"], params["ao_w"], params["fi_w"], params["fo_w"], params["lvec"])

    if not have_labels:
        return (None, None, None, seq_rel)
    return (mlm_loss[0, 0], img_loss[0, 0], nsp_loss[0, 0], seq_rel)


# ----------------------------- demo -------------------------------------------
if __name__ == "__main__":
    key = jax.random.PRNGKey(0)
    pkey, dkey = jax.random.split(key)
    params = init_params(pkey)

    B, T, R = 2, 8, 4
    ks = jax.random.split(dkey, 12)

    input_ids = jax.random.randint(ks[0], (B, T), 0, VOCAB, dtype=jnp.int32)
    image_feat = jax.random.normal(ks[1], (B, R, IMG_FEAT), jnp.float32)
    image_loc = jax.random.uniform(ks[2], (B, R, IMG_LOC), jnp.float32)
    token_type_ids = jnp.zeros((B, T), jnp.int32)
    attention_mask = jnp.ones((B, T), jnp.float32)
    image_attention_mask = jnp.ones((B, R), jnp.float32)
    masked_lm_labels = jnp.where(
        jax.random.uniform(ks[3], (B, T)) < 0.25,
        jax.random.randint(ks[4], (B, T), 0, VOCAB, dtype=jnp.int32),
        jnp.full((B, T), -1, jnp.int32))
    next_sentence_label = jax.random.randint(ks[5], (B,), 0, 2, dtype=jnp.int32)
    image_label = (jax.random.uniform(ks[6], (B, R)) < 0.5).astype(jnp.int32)
    raw_target = jax.random.uniform(ks[7], (B, R, IMG_TARGET), jnp.float32) + 0.1
    image_target = raw_target / jnp.sum(raw_target, axis=-1, keepdims=True)

    # graph-structure placeholders (unused in this synthetic port)
    image_edge_indices = jnp.zeros((B, 2, 4), jnp.int32)
    image_edge_attributes = jnp.zeros((B, 4, 3), jnp.float32)
    question_edge_indices = jnp.zeros((B, 2, 4), jnp.int32)
    question_edge_attributes = jnp.zeros((B, 4, 3), jnp.float32)
    question_limits = jnp.zeros((B, 2), jnp.int32)
    history_edge_indices = jnp.zeros((B, 2, 4), jnp.int32)
    history_sep_indices = jnp.zeros((B, 2), jnp.int32)

    fwd = jax.jit(vdgr_forward)
    out = fwd(
        params, input_ids, image_feat, image_loc,
        image_edge_indices, image_edge_attributes,
        question_edge_indices, question_edge_attributes,
        question_limits, history_edge_indices, history_sep_indices,
        token_type_ids=token_type_ids,
        attention_mask=attention_mask,
        masked_lm_labels=masked_lm_labels,
        next_sentence_label=next_sentence_label,
        image_attention_mask=image_attention_mask,
        image_label=image_label,
        image_target=image_target,
    )
    masked_lm_loss, masked_img_loss, nsp_loss, seq_rel = out
    jax.block_until_ready((masked_lm_loss, masked_img_loss, nsp_loss, seq_rel))
    assert seq_rel.shape == (B, 2)
    print("KERNEL_OK")
</pallas_src>

<mosaic_0001>
module attributes {stable_mosaic.version = 11 : i64} {
  func.func @_vdgr_fused_kernel(%arg0: memref<16x32xf32, #tpu.memory_space<vmem>>, %arg1: memref<8x21xf32, #tpu.memory_space<vmem>>, %arg2: memref<24x24xf32, #tpu.memory_space<vmem>>, %arg3: memref<16x1xi32, #tpu.memory_space<vmem>>, %arg4: memref<2x1xi32, #tpu.memory_space<vmem>>, %arg5: memref<8x1xf32, #tpu.memory_space<vmem>>, %arg6: memref<8x16xf32, #tpu.memory_space<vmem>>, %arg7: memref<12x128xf32, #tpu.memory_space<vmem>>, %arg8: memref<21x32xf32, #tpu.memory_space<vmem>>, %arg9: memref<32x32xf32, #tpu.memory_space<vmem>>, %arg10: memref<32x2xf32, #tpu.memory_space<vmem>>, %arg11: memref<32x32xf32, #tpu.memory_space<vmem>>, %arg12: memref<32x128xf32, #tpu.memory_space<vmem>>, %arg13: memref<32x16xf32, #tpu.memory_space<vmem>>, %arg14: memref<2x32x96xf32, #tpu.memory_space<vmem>>, %arg15: memref<2x32x32xf32, #tpu.memory_space<vmem>>, %arg16: memref<2x32x64xf32, #tpu.memory_space<vmem>>, %arg17: memref<2x64x32xf32, #tpu.memory_space<vmem>>, %arg18: memref<2x8x128xf32, #tpu.memory_space<vmem>>, %arg19: memref<2x2xf32, #tpu.memory_space<vmem>>, %arg20: memref<1x1xf32, #tpu.memory_space<vmem>>, %arg21: memref<1x1xf32, #tpu.memory_space<vmem>>, %arg22: memref<1x1xf32, #tpu.memory_space<vmem>>) attributes {dimension_semantics = [], scalar_prefetch = 0 : i64, scratch_operands = 0 : i64, tpu.core_type = #tpu.core_type<tc>} {
    %c0 = arith.constant 0 : index
    %c0_0 = arith.constant 0 : index
    %0 = vector.load %arg7[%c0, %c0_0] : memref<12x128xf32, #tpu.memory_space<vmem>>, vector<12x128xf32>
    %c0_1 = arith.constant 0 : index
    %c0_2 = arith.constant 0 : index
    %1 = vector.load %arg0[%c0_1, %c0_2] : memref<16x32xf32, #tpu.memory_space<vmem>>, vector<16x32xf32>
    %2 = vector.extract_strided_slice %0 {offsets = [0, 0], sizes = [1, 32], strides = [1, 1]} : vector<12x128xf32> to vector<1x32xf32>
    %3 = vector.extract_strided_slice %0 {offsets = [1, 0], sizes = [1, 32], strides = [1, 1]} : vector<12x128xf32> to vector<1x32xf32>
    %cst = arith.constant dense<0.000000e+00> : vector<16xf32>
    %4 = vector.multi_reduction <add>, %1, %cst [1] : vector<16x32xf32> to vector<16xf32>
    %5 = vector.shape_cast %4 : vector<16xf32> to vector<16x1xf32>
    %cst_3 = arith.constant 3.200000e+01 : f32
    %6 = vector.broadcast %cst_3 : f32 to vector<16x1xf32>
    %7 = arith.divf %5, %6 : vector<16x1xf32>
    %8 = vector.broadcast %7 : vector<16x1xf32> to vector<16x32xf32>
    %9 = arith.subf %1, %8 : vector<16x32xf32>
    %10 = arith.mulf %9, %9 : vector<16x32xf32>
    %cst_4 = arith.constant dense<0.000000e+00> : vector<16xf32>
    %11 = vector.multi_reduction <add>, %10, %cst_4 [1] : vector<16x32xf32> to vector<16xf32>
    %12 = vector.shape_cast %11 : vector<16xf32> to vector<16x1xf32>
    %cst_5 = arith.constant 3.200000e+01 : f32
    %13 = vector.broadcast %cst_5 : f32 to vector<16x1xf32>
    %14 = arith.divf %12, %13 : vector<16x1xf32>
    %cst_6 = arith.constant 9.99999996E-13 : f32
    %15 = vector.broadcast %cst_6 : f32 to vector<16x1xf32>
    %16 = arith.addf %14, %15 : vector<16x1xf32>
    %17 = math.rsqrt %16 : vector<16x1xf32>
    %18 = vector.broadcast %17 : vector<16x1xf32> to vector<16x32xf32>
    %19 = arith.mulf %9, %18 : vector<16x32xf32>
    %20 = vector.broadcast %2 : vector<1x32xf32> to vector<16x32xf32>
    %21 = arith.mulf %19, %20 : vector<16x32xf32>
    %22 = vector.broadcast %3 : vector<1x32xf32> to vector<16x32xf32>
    %23 = arith.addf %21, %22 : vector<16x32xf32>
    %c0_7 = arith.constant 0 : index
    %c0_8 = arith.constant 0 : index
    %24 = vector.load %arg1[%c0_7, %c0_8] : memref<8x21xf32, #tpu.memory_space<vmem>>, vector<8x21xf32>
    %c0_9 = arith.constant 0 : index
    %c0_10 = arith.constant 0 : index
    %25 = vector.load %arg8[%c0_9, %c0_10] : memref<21x32xf32, #tpu.memory_space<vmem>>, vector<21x32xf32>
    %26 = arith.truncf %24 : vector<8x21xf32> to vector<8x21xbf16>
    %27 = arith.truncf %25 : vector<21x32xf32> to vector<21x32xbf16>
    %cst_11 = arith.constant dense<0.000000e+00> : vector<8x32xf32>
    %28 = tpu.matmul %26, %27, %cst_11 {dimension_numbers = #tpu.dot_dimension_numbers<[1], [0], [0], [1], [0, 0, 1, 1], [], []>} : vector<8x21xbf16>, vector<21x32xbf16>, vector<8x32xf32> -> vector<8x32xf32>
    %29 = vector.extract_strided_slice %0 {offsets = [2, 0], sizes = [1, 32], strides = [1, 1]} : vector<12x128xf32> to vector<1x32xf32>
    %30 = vector.broadcast %29 : vector<1x32xf32> to vector<8x32xf32>
    %31 = arith.addf %28, %30 : vector<8x32xf32>
    %32 = vector.extract_strided_slice %0 {offsets = [3, 0], sizes = [1, 32], strides = [1, 1]} : vector<12x128xf32> to vector<1x32xf32>
    %33 = vector.extract_strided_slice %0 {offsets = [4, 0], sizes = [1, 32], strides = [1, 1]} : vector<12x128xf32> to vector<1x32xf32>
    %cst_12 = arith.constant dense<0.000000e+00> : vector<8xf32>
    %34 = vector.multi_reduction <add>, %31, %cst_12 [1] : vector<8x32xf32> to vector<8xf32>
    %35 = vector.shape_cast %34 : vector<8xf32> to vector<8x1xf32>
    %cst_13 = arith.constant 3.200000e+01 : f32
    %36 = vector.broadcast %cst_13 : f32 to vector<8x1xf32>
    %37 = arith.divf %35, %36 : vector<8x1xf32>
    %38 = vector.broadcast %37 : vector<8x1xf32> to vector<8x32xf32>
    %39 = arith.subf %31, %38 : vector<8x32xf32>
    %40 = arith.mulf %39, %39 : vector<8x32xf32>
    %cst_14 = arith.constant dense<0.000000e+00> : vector<8xf32>
    %41 = vector.multi_reduction <add>, %40, %cst_14 [1] : vector<8x32xf32> to vector<8xf32>
    %42 = vector.shape_cast %41 : vector<8xf32> to vector<8x1xf32>
    %cst_15 = arith.constant 3.200000e+01 : f32
    %43 = vector.broadcast %cst_15 : f32 to vector<8x1xf32>
    %44 = arith.divf %42, %43 : vector<8x1xf32>
    %cst_16 = arith.constant 9.99999996E-13 : f32
    %45 = vector.broadcast %cst_16 : f32 to vector<8x1xf32>
    %46 = arith.addf %44, %45 : vector<8x1xf32>
    %47 = math.rsqrt %46 : vector<8x1xf32>
    %48 = vector.broadcast %47 : vector<8x1xf32> to vector<8x32xf32>
    %49 = arith.mulf %39, %48 : vector<8x32xf32>
    %50 = vector.broadcast %32 : vector<1x32xf32> to vector<8x32xf32>
    %51 = arith.mulf %49, %50 : vector<8x32xf32>
    %52 = vector.broadcast %33 : vector<1x32xf32> to vector<8x32xf32>
    %53 = arith.addf %51, %52 : vector<8x32xf32>
    %54 = tpu.concatenate %23, %53 in 0 : vector<16x32xf32>, vector<8x32xf32> -> vector<24x32xf32>
    %c0_17 = arith.constant 0 : index
    %c0_18 = arith.constant 0 : index
    %55 = vector.load %arg2[%c0_17, %c0_18] : memref<24x24xf32, #tpu.memory_space<vmem>>, vector<24x24xf32>
    %c0_19 = arith.constant 0 : index
    %c0_20 = arith.constant 0 : index
    %c0_21 = arith.constant 0 : index
    %56 = vector.load %arg14[%c0_19, %c0_20, %c0_21] : memref<2x32x96xf32, #tpu.memory_space<vmem>>, vector<1x32x96xf32>
    %57 = vector.shape_cast %56 : vector<1x32x96xf32> to vector<32x96xf32>
    %c0_22 = arith.constant 0 : index
    %c0_23 = arith.constant 0 : index
    %c0_24 = arith.constant 0 : index
    %58 = vector.load %arg15[%c0_22, %c0_23, %c0_24] : memref<2x32x32xf32, #tpu.memory_space<vmem>>, vector<1x32x32xf32>
    %59 = vector.shape_cast %58 : vector<1x32x32xf32> to vector<32x32xf32>
    %c0_25 = arith.constant 0 : index
    %c0_26 = arith.constant 0 : index
    %c0_27 = arith.constant 0 : index
    %60 = vector.load %arg16[%c0_25, %c0_26, %c0_27] : memref<2x32x64xf32, #tpu.memory_space<vmem>>, vector<1x32x64xf32>
    %61 = vector.shape_cast %60 : vector<1x32x64xf32> to vector<32x64xf32>
    %c0_28 = arith.constant 0 : index
    %c0_29 = arith.constant 0 : index
    %c0_30 = arith.constant 0 : index
    %62 = vector.load %arg17[%c0_28, %c0_29, %c0_30] : memref<2x64x32xf32, #tpu.memory_space<vmem>>, vector<1x64x32xf32>
    %63 = vector.shape_cast %62 : vector<1x64x32xf32> to vector<64x32xf32>
    %c0_31 = arith.constant 0 : index
    %c0_32 = arith.constant 0 : index
    %c0_33 = arith.constant 0 : index
    %64 = vector.load %arg18[%c0_31, %c0_32, %c0_33] : memref<2x8x128xf32, #tpu.memory_space<vmem>>, vector<1x8x128xf32>
    %65 = vector.shape_cast %64 : vector<1x8x128xf32> to vector<8x128xf32>
    %66 = arith.truncf %54 : vector<24x32xf32> to vector<24x32xbf16>
    %67 = arith.truncf %57 : vector<32x96xf32> to vector<32x96xbf16>
    %cst_34 = arith.constant dense<0.000000e+00> : vector<24x96xf32>
    %68 = tpu.matmul %66, %67, %cst_34 {dimension_numbers = #tpu.dot_dimension_numbers<[1], [0], [0], [1], [0, 0, 1, 1], [], []>} : vector<24x32xbf16>, vector<32x96xbf16>, vector<24x96xf32> -> vector<24x96xf32>
    %69 = vector.extract_strided_slice %65 {offsets = [0, 0], sizes = [1, 96], strides = [1, 1]} : vector<8x128xf32> to vector<1x96xf32>
    %70 = vector.broadcast %69 : vector<1x96xf32> to vector<24x96xf32>
    %71 = arith.addf %68, %70 : vector<24x96xf32>
    %72 = vector.extract_strided_slice %71 {offsets = [0, 0], sizes = [24, 16], strides = [1, 1]} : vector<24x96xf32> to vector<24x16xf32>
    %73 = vector.extract_strided_slice %71 {offsets = [0, 32], sizes = [24, 16], strides = [1, 1]} : vector<24x96xf32> to vector<24x16xf32>
    %74 = vector.extract_strided_slice %71 {offsets = [0, 64], sizes = [24, 16], strides = [1, 1]} : vector<24x96xf32> to vector<24x16xf32>
    %75 = arith.truncf %72 : vector<24x16xf32> to vector<24x16xbf16>
    %76 = arith.truncf %73 : vector<24x16xf32> to vector<24x16xbf16>
    %cst_35 = arith.constant dense<0.000000e+00> : vector<24x24xf32>
    %77 = tpu.matmul %75, %76, %cst_35 {dimension_numbers = #tpu.dot_dimension_numbers<[1], [1], [0], [0], [0, 0, 1, 0], [], []>} : vector<24x16xbf16>, vector<24x16xbf16>, vector<24x24xf32> -> vector<24x24xf32>
    %cst_36 = arith.constant 2.500000e-01 : f32
    %78 = vector.broadcast %cst_36 : f32 to vector<24x24xf32>
    %79 = arith.mulf %77, %78 : vector<24x24xf32>
    %80 = arith.addf %79, %55 : vector<24x24xf32>
    %cst_37 = arith.constant dense<0xFF800000> : vector<24xf32>
    %81 = vector.multi_reduction <maximumf>, %80, %cst_37 [1] : vector<24x24xf32> to vector<24xf32>
    %82 = vector.shape_cast %81 : vector<24xf32> to vector<24x1xf32>
    %83 = vector.broadcast %82 : vector<24x1xf32> to vector<24x24xf32>
    %84 = arith.subf %80, %83 : vector<24x24xf32>
    %85 = math.exp %84 : vector<24x24xf32>
    %cst_38 = arith.constant dense<0.000000e+00> : vector<24xf32>
    %86 = vector.multi_reduction <add>, %85, %cst_38 [1] : vector<24x24xf32> to vector<24xf32>
    %87 = vector.shape_cast %86 : vector<24xf32> to vector<24x1xf32>
    %88 = tpu.reciprocal %87 {approx = true} : vector<24x1xf32> -> vector<24x1xf32>
    %89 = vector.broadcast %88 : vector<24x1xf32> to vector<24x24xf32>
    %90 = arith.mulf %85, %89 : vector<24x24xf32>
    %91 = arith.truncf %90 : vector<24x24xf32> to vector<24x24xbf16>
    %92 = arith.truncf %74 : vector<24x16xf32> to vector<24x16xbf16>
    %cst_39 = arith.constant dense<0.000000e+00> : vector<24x16xf32>
    %93 = tpu.matmul %91, %92, %cst_39 {dimension_numbers = #tpu.dot_dimension_numbers<[1], [0], [0], [1], [0, 0, 1, 1], [], []>} : vector<24x24xbf16>, vector<24x16xbf16>, vector<24x16xf32> -> vector<24x16xf32>
    %94 = vector.extract_strided_slice %59 {offsets = [0, 0], sizes = [16, 32], strides = [1, 1]} : vector<32x32xf32> to vector<16x32xf32>
    %95 = arith.truncf %93 : vector<24x16xf32> to vector<24x16xbf16>
    %96 = arith.truncf %94 : vector<16x32xf32> to vector<16x32xbf16>
    %cst_40 = arith.constant dense<0.000000e+00> : vector<24x32xf32>
    %97 = tpu.matmul %95, %96, %cst_40 {dimension_numbers = #tpu.dot_dimension_numbers<[1], [0], [0], [1], [0, 0, 1, 1], [], []>} : vector<24x16xbf16>, vector<16x32xbf16>, vector<24x32xf32> -> vector<24x32xf32>
    %98 = vector.extract_strided_slice %71 {offsets = [0, 16], sizes = [24, 16], strides = [1, 1]} : vector<24x96xf32> to vector<24x16xf32>
    %99 = vector.extract_strided_slice %71 {offsets = [0, 48], sizes = [24, 16], strides = [1, 1]} : vector<24x96xf32> to vector<24x16xf32>
    %100 = vector.extract_strided_slice %71 {offsets = [0, 80], sizes = [24, 16], strides = [1, 1]} : vector<24x96xf32> to vector<24x16xf32>
    %101 = arith.truncf %98 : vector<24x16xf32> to vector<24x16xbf16>
    %102 = arith.truncf %99 : vector<24x16xf32> to vector<24x16xbf16>
    %cst_41 = arith.constant dense<0.000000e+00> : vector<24x24xf32>
    %103 = tpu.matmul %101, %102, %cst_41 {dimension_numbers = #tpu.dot_dimension_numbers<[1], [1], [0], [0], [0, 0, 1, 0], [], []>} : vector<24x16xbf16>, vector<24x16xbf16>, vector<24x24xf32> -> vector<24x24xf32>
    %cst_42 = arith.constant 2.500000e-01 : f32
    %104 = vector.broadcast %cst_42 : f32 to vector<24x24xf32>
    %105 = arith.mulf %103, %104 : vector<24x24xf32>
    %106 = arith.addf %105, %55 : vector<24x24xf32>
    %cst_43 = arith.constant dense<0xFF800000> : vector<24xf32>
    %107 = vector.multi_reduction <maximumf>, %106, %cst_43 [1] : vector<24x24xf32> to vector<24xf32>
    %108 = vector.shape_cast %107 : vector<24xf32> to vector<24x1xf32>
    %109 = vector.broadcast %108 : vector<24x1xf32> to vector<24x24xf32>
    %110 = arith.subf %106, %109 : vector<24x24xf32>
    %111 = math.exp %110 : vector<24x24xf32>
    %cst_44 = arith.constant dense<0.000000e+00> : vector<24xf32>
    %112 = vector.multi_reduction <add>, %111, %cst_44 [1] : vector<24x24xf32> to vector<24xf32>
    %113 = vector.shape_cast %112 : vector<24xf32> to vector<24x1xf32>
    %114 = tpu.reciprocal %113 {approx = true} : vector<24x1xf32> -> vector<24x1xf32>
    %115 = vector.broadcast %114 : vector<24x1xf32> to vector<24x24xf32>
    %116 = arith.mulf %111, %115 : vector<24x24xf32>
    %117 = arith.truncf %116 : vector<24x24xf32> to vector<24x24xbf16>
    %118 = arith.truncf %100 : vector<24x16xf32> to vector<24x16xbf16>
    %cst_45 = arith.constant dense<0.000000e+00> : vector<24x16xf32>
    %119 = tpu.matmul %117, %118, %cst_45 {dimension_numbers = #tpu.dot_dimension_numbers<[1], [0], [0], [1], [0, 0, 1, 1], [], []>} : vector<24x24xbf16>, vector<24x16xbf16>, vector<24x16xf32> -> vector<24x16xf32>
    %120 = vector.extract_strided_slice %59 {offsets = [16, 0], sizes = [16, 32], strides = [1, 1]} : vector<32x32xf32> to vector<16x32xf32>
    %121 = arith.truncf %119 : vector<24x16xf32> to vector<24x16xbf16>
    %122 = arith.truncf %120 : vector<16x32xf32> to vector<16x32xbf16>
    %cst_46 = arith.constant dense<0.000000e+00> : vector<24x32xf32>
    %123 = tpu.matmul %121, %122, %cst_46 {dimension_numbers = #tpu.dot_dimension_numbers<[1], [0], [0], [1], [0, 0, 1, 1], [], []>} : vector<24x16xbf16>, vector<16x32xbf16>, vector<24x32xf32> -> vector<24x32xf32>
    %124 = arith.addf %97, %123 : vector<24x32xf32>
    %125 = arith.addf %54, %124 : vector<24x32xf32>
    %126 = vector.extract_strided_slice %65 {offsets = [1, 0], sizes = [1, 32], strides = [1, 1]} : vector<8x128xf32> to vector<1x32xf32>
    %127 = vector.broadcast %126 : vector<1x32xf32> to vector<24x32xf32>
    %128 = arith.addf %125, %127 : vector<24x32xf32>
    %129 = vector.extract_strided_slice %65 {offsets = [2, 0], sizes = [1, 32], strides = [1, 1]} : vector<8x128xf32> to vector<1x32xf32>
    %130 = vector.extract_strided_slice %65 {offsets = [3, 0], sizes = [1, 32], strides = [1, 1]} : vector<8x128xf32> to vector<1x32xf32>
    %cst_47 = arith.constant dense<0.000000e+00> : vector<24xf32>
    %131 = vector.multi_reduction <add>, %128, %cst_47 [1] : vector<24x32xf32> to vector<24xf32>
    %132 = vector.shape_cast %131 : vector<24xf32> to vector<24x1xf32>
    %cst_48 = arith.constant 3.200000e+01 : f32
    %133 = vector.broadcast %cst_48 : f32 to vector<24x1xf32>
    %134 = arith.divf %132, %133 : vector<24x1xf32>
    %135 = vector.broadcast %134 : vector<24x1xf32> to vector<24x32xf32>
    %136 = arith.subf %128, %135 : vector<24x32xf32>
    %137 = arith.mulf %136, %136 : vector<24x32xf32>
    %cst_49 = arith.constant dense<0.000000e+00> : vector<24xf32>
    %138 = vector.multi_reduction <add>, %137, %cst_49 [1] : vector<24x32xf32> to vector<24xf32>
    %139 = vector.shape_cast %138 : vector<24xf32> to vector<24x1xf32>
    %cst_50 = arith.constant 3.200000e+01 : f32
    %140 = vector.broadcast %cst_50 : f32 to vector<24x1xf32>
    %141 = arith.divf %139, %140 : vector<24x1xf32>
    %cst_51 = arith.constant 9.99999996E-13 : f32
    %142 = vector.broadcast %cst_51 : f32 to vector<24x1xf32>
    %143 = arith.addf %141, %142 : vector<24x1xf32>
    %144 = math.rsqrt %143 : vector<24x1xf32>
    %145 = vector.broadcast %144 : vector<24x1xf32> to vector<24x32xf32>
    %146 = arith.mulf %136, %145 : vector<24x32xf32>
    %147 = vector.broadcast %129 : vector<1x32xf32> to vector<24x32xf32>
    %148 = arith.mulf %146, %147 : vector<24x32xf32>
    %149 = vector.broadcast %130 : vector<1x32xf32> to vector<24x32xf32>
    %150 = arith.addf %148, %149 : vector<24x32xf32>
    %151 = arith.truncf %150 : vector<24x32xf32> to vector<24x32xbf16>
    %152 = arith.truncf %61 : vector<32x64xf32> to vector<32x64xbf16>
    %cst_52 = arith.constant dense<0.000000e+00> : vector<24x64xf32>
    %153 = tpu.matmul %151, %152, %cst_52 {dimension_numbers = #tpu.dot_dimension_numbers<[1], [0], [0], [1], [0, 0, 1, 1], [], []>} : vector<24x32xbf16>, vector<32x64xbf16>, vector<24x64xf32> -> vector<24x64xf32>
    %154 = vector.extract_strided_slice %65 {offsets = [4, 0], sizes = [1, 64], strides = [1, 1]} : vector<8x128xf32> to vector<1x64xf32>
    %155 = vector.broadcast %154 : vector<1x64xf32> to vector<24x64xf32>
    %156 = arith.addf %153, %155 : vector<24x64xf32>
    %157 = arith.mulf %156, %156 : vector<24x64xf32>
    %158 = arith.mulf %156, %157 : vector<24x64xf32>
    %cst_53 = arith.constant 4.471500e-02 : f32
    %159 = vector.broadcast %cst_53 : f32 to vector<24x64xf32>
    %160 = arith.mulf %159, %158 : vector<24x64xf32>
    %161 = arith.addf %156, %160 : vector<24x64xf32>
    %cst_54 = arith.constant 0.797884583 : f32
    %162 = vector.broadcast %cst_54 : f32 to vector<24x64xf32>
    %163 = arith.mulf %162, %161 : vector<24x64xf32>
    %164 = math.tanh %163 : vector<24x64xf32>
    %cst_55 = arith.constant 1.000000e+00 : f32
    %165 = vector.broadcast %cst_55 : f32 to vector<24x64xf32>
    %166 = arith.addf %165, %164 : vector<24x64xf32>
    %cst_56 = arith.constant 5.000000e-01 : f32
    %167 = vector.broadcast %cst_56 : f32 to vector<24x64xf32>
    %168 = arith.mulf %167, %166 : vector<24x64xf32>
    %169 = arith.mulf %156, %168 : vector<24x64xf32>
    %170 = arith.truncf %169 : vector<24x64xf32> to vector<24x64xbf16>
    %171 = arith.truncf %63 : vector<64x32xf32> to vector<64x32xbf16>
    %cst_57 = arith.constant dense<0.000000e+00> : vector<24x32xf32>
    %172 = tpu.matmul %170, %171, %cst_57 {dimension_numbers = #tpu.dot_dimension_numbers<[1], [0], [0], [1], [0, 0, 1, 1], [], []>} : vector<24x64xbf16>, vector<64x32xbf16>, vector<24x32xf32> -> vector<24x32xf32>
    %173 = vector.extract_strided_slice %65 {offsets = [5, 0], sizes = [1, 32], strides = [1, 1]} : vector<8x128xf32> to vector<1x32xf32>
    %174 = vector.broadcast %173 : vector<1x32xf32> to vector<24x32xf32>
    %175 = arith.addf %172, %174 : vector<24x32xf32>
    %176 = arith.addf %150, %175 : vector<24x32xf32>
    %177 = vector.extract_strided_slice %65 {offsets = [6, 0], sizes = [1, 32], strides = [1, 1]} : vector<8x128xf32> to vector<1x32xf32>
    %178 = vector.extract_strided_slice %65 {offsets = [7, 0], sizes = [1, 32], strides = [1, 1]} : vector<8x128xf32> to vector<1x32xf32>
    %cst_58 = arith.constant dense<0.000000e+00> : vector<24xf32>
    %179 = vector.multi_reduction <add>, %176, %cst_58 [1] : vector<24x32xf32> to vector<24xf32>
    %180 = vector.shape_cast %179 : vector<24xf32> to vector<24x1xf32>
    %cst_59 = arith.constant 3.200000e+01 : f32
    %181 = vector.broadcast %cst_59 : f32 to vector<24x1xf32>
    %182 = arith.divf %180, %181 : vector<24x1xf32>
    %183 = vector.broadcast %182 : vector<24x1xf32> to vector<24x32xf32>
    %184 = arith.subf %176, %183 : vector<24x32xf32>
    %185 = arith.mulf %184, %184 : vector<24x32xf32>
    %cst_60 = arith.constant dense<0.000000e+00> : vector<24xf32>
    %186 = vector.multi_reduction <add>, %185, %cst_60 [1] : vector<24x32xf32> to vector<24xf32>
    %187 = vector.shape_cast %186 : vector<24xf32> to vector<24x1xf32>
    %cst_61 = arith.constant 3.200000e+01 : f32
    %188 = vector.broadcast %cst_61 : f32 to vector<24x1xf32>
    %189 = arith.divf %187, %188 : vector<24x1xf32>
    %cst_62 = arith.constant 9.99999996E-13 : f32
    %190 = vector.broadcast %cst_62 : f32 to vector<24x1xf32>
    %191 = arith.addf %189, %190 : vector<24x1xf32>
    %192 = math.rsqrt %191 : vector<24x1xf32>
    %193 = vector.broadcast %192 : vector<24x1xf32> to vector<24x32xf32>
    %194 = arith.mulf %184, %193 : vector<24x32xf32>
    %195 = vector.broadcast %177 : vector<1x32xf32> to vector<24x32xf32>
    %196 = arith.mulf %194, %195 : vector<24x32xf32>
    %197 = vector.broadcast %178 : vector<1x32xf32> to vector<24x32xf32>
    %198 = arith.addf %196, %197 : vector<24x32xf32>
    %c1 = arith.constant 1 : index
    %c0_63 = arith.constant 0 : index
    %c0_64 = arith.constant 0 : index
    %199 = vector.load %arg14[%c1, %c0_63, %c0_64] : memref<2x32x96xf32, #tpu.memory_space<vmem>>, vector<1x32x96xf32>
    %200 = vector.shape_cast %199 : vector<1x32x96xf32> to vector<32x96xf32>
    %c1_65 = arith.constant 1 : index
    %c0_66 = arith.constant 0 : index
    %c0_67 = arith.constant 0 : index
    %201 = vector.load %arg15[%c1_65, %c0_66, %c0_67] : memref<2x32x32xf32, #tpu.memory_space<vmem>>, vector<1x32x32xf32>
    %202 = vector.shape_cast %201 : vector<1x32x32xf32> to vector<32x32xf32>
    %c1_68 = arith.constant 1 : index
    %c0_69 = arith.constant 0 : index
    %c0_70 = arith.constant 0 : index
    %203 = vector.load %arg16[%c1_68, %c0_69, %c0_70] : memref<2x32x64xf32, #tpu.memory_space<vmem>>, vector<1x32x64xf32>
    %204 = vector.shape_cast %203 : vector<1x32x64xf32> to vector<32x64xf32>
    %c1_71 = arith.constant 1 : index
    %c0_72 = arith.constant 0 : index
    %c0_73 = arith.constant 0 : index
    %205 = vector.load %arg17[%c1_71, %c0_72, %c0_73] : memref<2x64x32xf32, #tpu.memory_space<vmem>>, vector<1x64x32xf32>
    %206 = vector.shape_cast %205 : vector<1x64x32xf32> to vector<64x32xf32>
    %c1_74 = arith.constant 1 : index
    %c0_75 = arith.constant 0 : index
    %c0_76 = arith.constant 0 : index
    %207 = vector.load %arg18[%c1_74, %c0_75, %c0_76] : memref<2x8x128xf32, #tpu.memory_space<vmem>>, vector<1x8x128xf32>
    %208 = vector.shape_cast %207 : vector<1x8x128xf32> to vector<8x128xf32>
    %209 = arith.truncf %198 : vector<24x32xf32> to vector<24x32xbf16>
    %210 = arith.truncf %200 : vector<32x96xf32> to vector<32x96xbf16>
    %cst_77 = arith.constant dense<0.000000e+00> : vector<24x96xf32>
    %211 = tpu.matmul %209, %210, %cst_77 {dimension_numbers = #tpu.dot_dimension_numbers<[1], [0], [0], [1], [0, 0, 1, 1], [], []>} : vector<24x32xbf16>, vector<32x96xbf16>, vector<24x96xf32> -> vector<24x96xf32>
    %212 = vector.extract_strided_slice %208 {offsets = [0, 0], sizes = [1, 96], strides = [1, 1]} : vector<8x128xf32> to vector<1x96xf32>
    %213 = vector.broadcast %212 : vector<1x96xf32> to vector<24x96xf32>
    %214 = arith.addf %211, %213 : vector<24x96xf32>
    %215 = vector.extract_strided_slice %214 {offsets = [0, 0], sizes = [24, 16], strides = [1, 1]} : vector<24x96xf32> to vector<24x16xf32>
    %216 = vector.extract_strided_slice %214 {offsets = [0, 32], sizes = [24, 16], strides = [1, 1]} : vector<24x96xf32> to vector<24x16xf32>
    %217 = vector.extract_strided_slice %214 {offsets = [0, 64], sizes = [24, 16], strides = [1, 1]} : vector<24x96xf32> to vector<24x16xf32>
    %218 = arith.truncf %215 : vector<24x16xf32> to vector<24x16xbf16>
    %219 = arith.truncf %216 : vector<24x16xf32> to vector<24x16xbf16>
    %cst_78 = arith.constant dense<0.000000e+00> : vector<24x24xf32>
    %220 = tpu.matmul %218, %219, %cst_78 {dimension_numbers = #tpu.dot_dimension_numbers<[1], [1], [0], [0], [0, 0, 1, 0], [], []>} : vector<24x16xbf16>, vector<24x16xbf16>, vector<24x24xf32> -> vector<24x24xf32>
    %cst_79 = arith.constant 2.500000e-01 : f32
    %221 = vector.broadcast %cst_79 : f32 to vector<24x24xf32>
    %222 = arith.mulf %220, %221 : vector<24x24xf32>
    %223 = arith.addf %222, %55 : vector<24x24xf32>
    %cst_80 = arith.constant dense<0xFF800000> : vector<24xf32>
    %224 = vector.multi_reduction <maximumf>, %223, %cst_80 [1] : vector<24x24xf32> to vector<24xf32>
    %225 = vector.shape_cast %224 : vector<24xf32> to vector<24x1xf32>
    %226 = vector.broadcast %225 : vector<24x1xf32> to vector<24x24xf32>
    %227 = arith.subf %223, %226 : vector<24x24xf32>
    %228 = math.exp %227 : vector<24x24xf32>
    %cst_81 = arith.constant dense<0.000000e+00> : vector<24xf32>
    %229 = vector.multi_reduction <add>, %228, %cst_81 [1] : vector<24x24xf32> to vector<24xf32>
    %230 = vector.shape_cast %229 : vector<24xf32> to vector<24x1xf32>
    %231 = tpu.reciprocal %230 {approx = true} : vector<24x1xf32> -> vector<24x1xf32>
    %232 = vector.broadcast %231 : vector<24x1xf32> to vector<24x24xf32>
    %233 = arith.mulf %228, %232 : vector<24x24xf32>
    %234 = arith.truncf %233 : vector<24x24xf32> to vector<24x24xbf16>
    %235 = arith.truncf %217 : vector<24x16xf32> to vector<24x16xbf16>
    %cst_82 = arith.constant dense<0.000000e+00> : vector<24x16xf32>
    %236 = tpu.matmul %234, %235, %cst_82 {dimension_numbers = #tpu.dot_dimension_numbers<[1], [0], [0], [1], [0, 0, 1, 1], [], []>} : vector<24x24xbf16>, vector<24x16xbf16>, vector<24x16xf32> -> vector<24x16xf32>
    %237 = vector.extract_strided_slice %202 {offsets = [0, 0], sizes = [16, 32], strides = [1, 1]} : vector<32x32xf32> to vector<16x32xf32>
    %238 = arith.truncf %236 : vector<24x16xf32> to vector<24x16xbf16>
    %239 = arith.truncf %237 : vector<16x32xf32> to vector<16x32xbf16>
    %cst_83 = arith.constant dense<0.000000e+00> : vector<24x32xf32>
    %240 = tpu.matmul %238, %239, %cst_83 {dimension_numbers = #tpu.dot_dimension_numbers<[1], [0], [0], [1], [0, 0, 1, 1], [], []>} : vector<24x16xbf16>, vector<16x32xbf16>, vector<24x32xf32> -> vector<24x32xf32>
    %241 = vector.extract_strided_slice %214 {offsets = [0, 16], sizes = [24, 16], strides = [1, 1]} : vector<24x96xf32> to vector<24x16xf32>
    %242 = vector.extract_strided_slice %214 {offsets = [0, 48], sizes = [24, 16], strides = [1, 1]} : vector<24x96xf32> to vector<24x16xf32>
    %243 = vector.extract_strided_slice %214 {offsets = [0, 80], sizes = [24, 16], strides = [1, 1]} : vector<24x96xf32> to vector<24x16xf32>
    %244 = arith.truncf %241 : vector<24x16xf32> to vector<24x16xbf16>
    %245 = arith.truncf %242 : vector<24x16xf32> to vector<24x16xbf16>
    %cst_84 = arith.constant dense<0.000000e+00> : vector<24x24xf32>
    %246 = tpu.matmul %244, %245, %cst_84 {dimension_numbers = #tpu.dot_dimension_numbers<[1], [1], [0], [0], [0, 0, 1, 0], [], []>} : vector<24x16xbf16>, vector<24x16xbf16>, vector<24x24xf32> -> vector<24x24xf32>
    %cst_85 = arith.constant 2.500000e-01 : f32
    %247 = vector.broadcast %cst_85 : f32 to vector<24x24xf32>
    %248 = arith.mulf %246, %247 : vector<24x24xf32>
    %249 = arith.addf %248, %55 : vector<24x24xf32>
    %cst_86 = arith.constant dense<0xFF800000> : vector<24xf32>
    %250 = vector.multi_reduction <maximumf>, %249, %cst_86 [1] : vector<24x24xf32> to vector<24xf32>
    %251 = vector.shape_cast %250 : vector<24xf32> to vector<24x1xf32>
    %252 = vector.broadcast %251 : vector<24x1xf32> to vector<24x24xf32>
    %253 = arith.subf %249, %252 : vector<24x24xf32>
    %254 = math.exp %253 : vector<24x24xf32>
    %cst_87 = arith.constant dense<0.000000e+00> : vector<24xf32>
    %255 = vector.multi_reduction <add>, %254, %cst_87 [1] : vector<24x24xf32> to vector<24xf32>
    %256 = vector.shape_cast %255 : vector<24xf32> to vector<24x1xf32>
    %257 = tpu.reciprocal %256 {approx = true} : vector<24x1xf32> -> vector<24x1xf32>
    %258 = vector.broadcast %257 : vector<24x1xf32> to vector<24x24xf32>
    %259 = arith.mulf %254, %258 : vector<24x24xf32>
    %260 = arith.truncf %259 : vector<24x24xf32> to vector<24x24xbf16>
    %261 = arith.truncf %243 : vector<24x16xf32> to vector<24x16xbf16>
    %cst_88 = arith.constant dense<0.000000e+00> : vector<24x16xf32>
    %262 = tpu.matmul %260, %261, %cst_88 {dimension_numbers = #tpu.dot_dimension_numbers<[1], [0], [0], [1], [0, 0, 1, 1], [], []>} : vector<24x24xbf16>, vector<24x16xbf16>, vector<24x16xf32> -> vector<24x16xf32>
    %263 = vector.extract_strided_slice %202 {offsets = [16, 0], sizes = [16, 32], strides = [1, 1]} : vector<32x32xf32> to vector<16x32xf32>
    %264 = arith.truncf %262 : vector<24x16xf32> to vector<24x16xbf16>
    %265 = arith.truncf %263 : vector<16x32xf32> to vector<16x32xbf16>
    %cst_89 = arith.constant dense<0.000000e+00> : vector<24x32xf32>
    %266 = tpu.matmul %264, %265, %cst_89 {dimension_numbers = #tpu.dot_dimension_numbers<[1], [0], [0], [1], [0, 0, 1, 1], [], []>} : vector<24x16xbf16>, vector<16x32xbf16>, vector<24x32xf32> -> vector<24x32xf32>
    %267 = arith.addf %240, %266 : vector<24x32xf32>
    %268 = arith.addf %198, %267 : vector<24x32xf32>
    %269 = vector.extract_strided_slice %208 {offsets = [1, 0], sizes = [1, 32], strides = [1, 1]} : vector<8x128xf32> to vector<1x32xf32>
    %270 = vector.broadcast %269 : vector<1x32xf32> to vector<24x32xf32>
    %271 = arith.addf %268, %270 : vector<24x32xf32>
    %272 = vector.extract_strided_slice %208 {offsets = [2, 0], sizes = [1, 32], strides = [1, 1]} : vector<8x128xf32> to vector<1x32xf32>
    %273 = vector.extract_strided_slice %208 {offsets = [3, 0], sizes = [1, 32], strides = [1, 1]} : vector<8x128xf32> to vector<1x32xf32>
    %cst_90 = arith.constant dense<0.000000e+00> : vector<24xf32>
    %274 = vector.multi_reduction <add>, %271, %cst_90 [1] : vector<24x32xf32> to vector<24xf32>
    %275 = vector.shape_cast %274 : vector<24xf32> to vector<24x1xf32>
    %cst_91 = arith.constant 3.200000e+01 : f32
    %276 = vector.broadcast %cst_91 : f32 to vector<24x1xf32>
    %277 = arith.divf %275, %276 : vector<24x1xf32>
    %278 = vector.broadcast %277 : vector<24x1xf32> to vector<24x32xf32>
    %279 = arith.subf %271, %278 : vector<24x32xf32>
    %280 = arith.mulf %279, %279 : vector<24x32xf32>
    %cst_92 = arith.constant dense<0.000000e+00> : vector<24xf32>
    %281 = vector.multi_reduction <add>, %280, %cst_92 [1] : vector<24x32xf32> to vector<24xf32>
    %282 = vector.shape_cast %281 : vector<24xf32> to vector<24x1xf32>
    %cst_93 = arith.constant 3.200000e+01 : f32
    %283 = vector.broadcast %cst_93 : f32 to vector<24x1xf32>
    %284 = arith.divf %282, %283 : vector<24x1xf32>
    %cst_94 = arith.constant 9.99999996E-13 : f32
    %285 = vector.broadcast %cst_94 : f32 to vector<24x1xf32>
    %286 = arith.addf %284, %285 : vector<24x1xf32>
    %287 = math.rsqrt %286 : vector<24x1xf32>
    %288 = vector.broadcast %287 : vector<24x1xf32> to vector<24x32xf32>
    %289 = arith.mulf %279, %288 : vector<24x32xf32>
    %290 = vector.broadcast %272 : vector<1x32xf32> to vector<24x32xf32>
    %291 = arith.mulf %289, %290 : vector<24x32xf32>
    %292 = vector.broadcast %273 : vector<1x32xf32> to vector<24x32xf32>
    %293 = arith.addf %291, %292 : vector<24x32xf32>
    %294 = arith.truncf %293 : vector<24x32xf32> to vector<24x32xbf16>
    %295 = arith.truncf %204 : vector<32x64xf32> to vector<32x64xbf16>
    %cst_95 = arith.constant dense<0.000000e+00> : vector<24x64xf32>
    %296 = tpu.matmul %294, %295, %cst_95 {dimension_numbers = #tpu.dot_dimension_numbers<[1], [0], [0], [1], [0, 0, 1, 1], [], []>} : vector<24x32xbf16>, vector<32x64xbf16>, vector<24x64xf32> -> vector<24x64xf32>
    %297 = vector.extract_strided_slice %208 {offsets = [4, 0], sizes = [1, 64], strides = [1, 1]} : vector<8x128xf32> to vector<1x64xf32>
    %298 = vector.broadcast %297 : vector<1x64xf32> to vector<24x64xf32>
    %299 = arith.addf %296, %298 : vector<24x64xf32>
    %300 = arith.mulf %299, %299 : vector<24x64xf32>
    %301 = arith.mulf %299, %300 : vector<24x64xf32>
    %cst_96 = arith.constant 4.471500e-02 : f32
    %302 = vector.broadcast %cst_96 : f32 to vector<24x64xf32>
    %303 = arith.mulf %302, %301 : vector<24x64xf32>
    %304 = arith.addf %299, %303 : vector<24x64xf32>
    %cst_97 = arith.constant 0.797884583 : f32
    %305 = vector.broadcast %cst_97 : f32 to vector<24x64xf32>
    %306 = arith.mulf %305, %304 : vector<24x64xf32>
    %307 = math.tanh %306 : vector<24x64xf32>
    %cst_98 = arith.constant 1.000000e+00 : f32
    %308 = vector.broadcast %cst_98 : f32 to vector<24x64xf32>
    %309 = arith.addf %308, %307 : vector<24x64xf32>
    %cst_99 = arith.constant 5.000000e-01 : f32
    %310 = vector.broadcast %cst_99 : f32 to vector<24x64xf32>
    %311 = arith.mulf %310, %309 : vector<24x64xf32>
    %312 = arith.mulf %299, %311 : vector<24x64xf32>
    %313 = arith.truncf %312 : vector<24x64xf32> to vector<24x64xbf16>
    %314 = arith.truncf %206 : vector<64x32xf32> to vector<64x32xbf16>
    %cst_100 = arith.constant dense<0.000000e+00> : vector<24x32xf32>
    %315 = tpu.matmul %313, %314, %cst_100 {dimension_numbers = #tpu.dot_dimension_numbers<[1], [0], [0], [1], [0, 0, 1, 1], [], []>} : vector<24x64xbf16>, vector<64x32xbf16>, vector<24x32xf32> -> vector<24x32xf32>
    %316 = vector.extract_strided_slice %208 {offsets = [5, 0], sizes = [1, 32], strides = [1, 1]} : vector<8x128xf32> to vector<1x32xf32>
    %317 = vector.broadcast %316 : vector<1x32xf32> to vector<24x32xf32>
    %318 = arith.addf %315, %317 : vector<24x32xf32>
    %319 = arith.addf %293, %318 : vector<24x32xf32>
    %320 = vector.extract_strided_slice %208 {offsets = [6, 0], sizes = [1, 32], strides = [1, 1]} : vector<8x128xf32> to vector<1x32xf32>
    %321 = vector.extract_strided_slice %208 {offsets = [7, 0], sizes = [1, 32], strides = [1, 1]} : vector<8x128xf32> to vector<1x32xf32>
    %cst_101 = arith.constant dense<0.000000e+00> : vector<24xf32>
    %322 = vector.multi_reduction <add>, %319, %cst_101 [1] : vector<24x32xf32> to vector<24xf32>
    %323 = vector.shape_cast %322 : vector<24xf32> to vector<24x1xf32>
    %cst_102 = arith.constant 3.200000e+01 : f32
    %324 = vector.broadcast %cst_102 : f32 to vector<24x1xf32>
    %325 = arith.divf %323, %324 : vector<24x1xf32>
    %326 = vector.broadcast %325 : vector<24x1xf32> to vector<24x32xf32>
    %327 = arith.subf %319, %326 : vector<24x32xf32>
    %328 = arith.mulf %327, %327 : vector<24x32xf32>
    %cst_103 = arith.constant dense<0.000000e+00> : vector<24xf32>
    %329 = vector.multi_reduction <add>, %328, %cst_103 [1] : vector<24x32xf32> to vector<24xf32>
    %330 = vector.shape_cast %329 : vector<24xf32> to vector<24x1xf32>
    %cst_104 = arith.constant 3.200000e+01 : f32
    %331 = vector.broadcast %cst_104 : f32 to vector<24x1xf32>
    %332 = arith.divf %330, %331 : vector<24x1xf32>
    %cst_105 = arith.constant 9.99999996E-13 : f32
    %333 = vector.broadcast %cst_105 : f32 to vector<24x1xf32>
    %334 = arith.addf %332, %333 : vector<24x1xf32>
    %335 = math.rsqrt %334 : vector<24x1xf32>
    %336 = vector.broadcast %335 : vector<24x1xf32> to vector<24x32xf32>
    %337 = arith.mulf %327, %336 : vector<24x32xf32>
    %338 = vector.broadcast %320 : vector<1x32xf32> to vector<24x32xf32>
    %339 = arith.mulf %337, %338 : vector<24x32xf32>
    %340 = vector.broadcast %321 : vector<1x32xf32> to vector<24x32xf32>
    %341 = arith.addf %339, %340 : vector<24x32xf32>
    %342 = vector.extract_strided_slice %341 {offsets = [0, 0], sizes = [1, 32], strides = [1, 1]} : vector<24x32xf32> to vector<1x32xf32>
    %343 = vector.extract_strided_slice %341 {offsets = [8, 0], sizes = [1, 32], strides = [1, 1]} : vector<24x32xf32> to vector<1x32xf32>
    %344 = tpu.concatenate %342, %343 in 0 : vector<1x32xf32>, vector<1x32xf32> -> vector<2x32xf32>
    %c0_106 = arith.constant 0 : index
    %c0_107 = arith.constant 0 : index
    %345 = vector.load %arg9[%c0_106, %c0_107] : memref<32x32xf32, #tpu.memory_space<vmem>>, vector<32x32xf32>
    %346 = arith.truncf %344 : vector<2x32xf32> to vector<2x32xbf16>
    %347 = arith.truncf %345 : vector<32x32xf32> to vector<32x32xbf16>
    %cst_108 = arith.constant dense<0.000000e+00> : vector<2x32xf32>
    %348 = tpu.matmul %346, %347, %cst_108 {dimension_numbers = #tpu.dot_dimension_numbers<[1], [0], [0], [1], [0, 0, 1, 1], [], []>} : vector<2x32xbf16>, vector<32x32xbf16>, vector<2x32xf32> -> vector<2x32xf32>
    %349 = vector.extract_strided_slice %0 {offsets = [5, 0], sizes = [1, 32], strides = [1, 1]} : vector<12x128xf32> to vector<1x32xf32>
    %350 = vector.broadcast %349 : vector<1x32xf32> to vector<2x32xf32>
    %351 = arith.addf %348, %350 : vector<2x32xf32>
    %352 = math.tanh %351 : vector<2x32xf32>
    %c0_109 = arith.constant 0 : index
    %c0_110 = arith.constant 0 : index
    %353 = vector.load %arg10[%c0_109, %c0_110] : memref<32x2xf32, #tpu.memory_space<vmem>>, vector<32x2xf32>
    %354 = arith.truncf %352 : vector<2x32xf32> to vector<2x32xbf16>
    %355 = arith.truncf %353 : vector<32x2xf32> to vector<32x2xbf16>
    %cst_111 = arith.constant dense<0.000000e+00> : vector<2x2xf32>
    %356 = tpu.matmul %354, %355, %cst_111 {dimension_numbers = #tpu.dot_dimension_numbers<[1], [0], [0], [1], [0, 0, 1, 1], [], []>} : vector<2x32xbf16>, vector<32x2xbf16>, vector<2x2xf32> -> vector<2x2xf32>
    %357 = vector.extract_strided_slice %0 {offsets = [6, 0], sizes = [1, 2], strides = [1, 1]} : vector<12x128xf32> to vector<1x2xf32>
    %358 = vector.broadcast %357 : vector<1x2xf32> to vector<2x2xf32>
    %359 = arith.addf %356, %358 : vector<2x2xf32>
    %c0_112 = arith.constant 0 : index
    %c0_113 = arith.constant 0 : index
    %360 = vector.load %arg19[%c0_112, %c0_113] : memref<2x2xf32, #tpu.memory_space<vmem>>, vector<2x2xf32>
    tpu.vector_store %arg19[%c0_112, %c0_113], %359 {strides = array<i32>} : memref<2x2xf32, #tpu.memory_space<vmem>>, vector<2x2xf32>,
    %361 = vector.extract_strided_slice %341 {offsets = [0, 0], sizes = [16, 32], strides = [1, 1]} : vector<24x32xf32> to vector<16x32xf32>
    %c0_114 = arith.constant 0 : index
    %c0_115 = arith.constant 0 : index
    %362 = vector.load %arg11[%c0_114, %c0_115] : memref<32x32xf32, #tpu.memory_space<vmem>>, vector<32x32xf32>
    %363 = arith.truncf %361 : vector<16x32xf32> to vector<16x32xbf16>
    %364 = arith.truncf %362 : vector<32x32xf32> to vector<32x32xbf16>
    %cst_116 = arith.constant dense<0.000000e+00> : vector<16x32xf32>
    %365 = tpu.matmul %363, %364, %cst_116 {dimension_numbers = #tpu.dot_dimension_numbers<[1], [0], [0], [1], [0, 0, 1, 1], [], []>} : vector<16x32xbf16>, vector<32x32xbf16>, vector<16x32xf32> -> vector<16x32xf32>
    %366 = vector.extract_strided_slice %0 {offsets = [7, 0], sizes = [1, 32], strides = [1, 1]} : vector<12x128xf32> to vector<1x32xf32>
    %367 = vector.broadcast %366 : vector<1x32xf32> to vector<16x32xf32>
    %368 = arith.addf %365, %367 : vector<16x32xf32>
    %369 = arith.mulf %368, %368 : vector<16x32xf32>
    %370 = arith.mulf %368, %369 : vector<16x32xf32>
    %cst_117 = arith.constant 4.471500e-02 : f32
    %371 = vector.broadcast %cst_117 : f32 to vector<16x32xf32>
    %372 = arith.mulf %371, %370 : vector<16x32xf32>
    %373 = arith.addf %368, %372 : vector<16x32xf32>
    %cst_118 = arith.constant 0.797884583 : f32
    %374 = vector.broadcast %cst_118 : f32 to vector<16x32xf32>
    %375 = arith.mulf %374, %373 : vector<16x32xf32>
    %376 = math.tanh %375 : vector<16x32xf32>
    %cst_119 = arith.constant 1.000000e+00 : f32
    %377 = vector.broadcast %cst_119 : f32 to vector<16x32xf32>
    %378 = arith.addf %377, %376 : vector<16x32xf32>
    %cst_120 = arith.constant 5.000000e-01 : f32
    %379 = vector.broadcast %cst_120 : f32 to vector<16x32xf32>
    %380 = arith.mulf %379, %378 : vector<16x32xf32>
    %381 = arith.mulf %368, %380 : vector<16x32xf32>
    %382 = vector.extract_strided_slice %0 {offsets = [8, 0], sizes = [1, 32], strides = [1, 1]} : vector<12x128xf32> to vector<1x32xf32>
    %383 = vector.extract_strided_slice %0 {offsets = [9, 0], sizes = [1, 32], strides = [1, 1]} : vector<12x128xf32> to vector<1x32xf32>
    %cst_121 = arith.constant dense<0.000000e+00> : vector<16xf32>
    %384 = vector.multi_reduction <add>, %381, %cst_121 [1] : vector<16x32xf32> to vector<16xf32>
    %385 = vector.shape_cast %384 : vector<16xf32> to vector<16x1xf32>
    %cst_122 = arith.constant 3.200000e+01 : f32
    %386 = vector.broadcast %cst_122 : f32 to vector<16x1xf32>
    %387 = arith.divf %385, %386 : vector<16x1xf32>
    %388 = vector.broadcast %387 : vector<16x1xf32> to vector<16x32xf32>
    %389 = arith.subf %381, %388 : vector<16x32xf32>
    %390 = arith.mulf %389, %389 : vector<16x32xf32>
    %cst_123 = arith.constant dense<0.000000e+00> : vector<16xf32>
    %391 = vector.multi_reduction <add>, %390, %cst_123 [1] : vector<16x32xf32> to vector<16xf32>
    %392 = vector.shape_cast %391 : vector<16xf32> to vector<16x1xf32>
    %cst_124 = arith.constant 3.200000e+01 : f32
    %393 = vector.broadcast %cst_124 : f32 to vector<16x1xf32>
    %394 = arith.divf %392, %393 : vector<16x1xf32>
    %cst_125 = arith.constant 9.99999996E-13 : f32
    %395 = vector.broadcast %cst_125 : f32 to vector<16x1xf32>
    %396 = arith.addf %394, %395 : vector<16x1xf32>
    %397 = math.rsqrt %396 : vector<16x1xf32>
    %398 = vector.broadcast %397 : vector<16x1xf32> to vector<16x32xf32>
    %399 = arith.mulf %389, %398 : vector<16x32xf32>
    %400 = vector.broadcast %382 : vector<1x32xf32> to vector<16x32xf32>
    %401 = arith.mulf %399, %400 : vector<16x32xf32>
    %402 = vector.broadcast %383 : vector<1x32xf32> to vector<16x32xf32>
    %403 = arith.addf %401, %402 : vector<16x32xf32>
    %c0_126 = arith.constant 0 : index
    %c0_127 = arith.constant 0 : index
    %404 = vector.load %arg12[%c0_126, %c0_127] : memref<32x128xf32, #tpu.memory_space<vmem>>, vector<32x128xf32>
    %405 = arith.truncf %403 : vector<16x32xf32> to vector<16x32xbf16>
    %406 = arith.truncf %404 : vector<32x128xf32> to vector<32x128xbf16>
    %cst_128 = arith.constant dense<0.000000e+00> : vector<16x128xf32>
    %407 = tpu.matmul %405, %406, %cst_128 {dimension_numbers = #tpu.dot_dimension_numbers<[1], [0], [0], [1], [0, 0, 1, 1], [], []>} : vector<16x32xbf16>, vector<32x128xbf16>, vector<16x128xf32> -> vector<16x128xf32>
    %408 = vector.extract_strided_slice %0 {offsets = [10, 0], sizes = [1, 128], strides = [1, 1]} : vector<12x128xf32> to vector<1x128xf32>
    %409 = vector.broadcast %408 : vector<1x128xf32> to vector<16x128xf32>
    %410 = arith.addf %407, %409 : vector<16x128xf32>
    %cst_129 = arith.constant dense<0xFF800000> : vector<16xf32>
    %411 = vector.multi_reduction <maximumf>, %410, %cst_129 [1] : vector<16x128xf32> to vector<16xf32>
    %412 = vector.shape_cast %411 : vector<16xf32> to vector<16x1xf32>
    %413 = vector.broadcast %412 : vector<16x1xf32> to vector<16x128xf32>
    %414 = arith.subf %410, %413 : vector<16x128xf32>
    %415 = math.exp %414 : vector<16x128xf32>
    %cst_130 = arith.constant dense<0.000000e+00> : vector<16xf32>
    %416 = vector.multi_reduction <add>, %415, %cst_130 [1] : vector<16x128xf32> to vector<16xf32>
    %417 = vector.shape_cast %416 : vector<16xf32> to vector<16x1xf32>
    %418 = math.log %417 : vector<16x1xf32>
    %419 = vector.broadcast %418 : vector<16x1xf32> to vector<16x128xf32>
    %420 = arith.subf %414, %419 : vector<16x128xf32>
    %c0_131 = arith.constant 0 : index
    %c0_132 = arith.constant 0 : index
    %421 = vector.load %arg3[%c0_131, %c0_132] : memref<16x1xi32, #tpu.memory_space<vmem>>, vector<16x1xi32>
    %422 = tpu.iota {dimensions = array<i32: 1>} : vector<16x128xi32>
    %423 = vector.broadcast %421 : vector<16x1xi32> to vector<16x128xi32>
    %424 = arith.cmpi eq, %422, %423 : vector<16x128xi32>
    %425 = arith.extui %424 : vector<16x128xi1> to vector<16x128xi32>
    %426 = arith.sitofp %425 : vector<16x128xi32> to vector<16x128xf32>
    %c-1_i32 = arith.constant -1 : i32
    %427 = vector.broadcast %c-1_i32 : i32 to vector<16x1xi32>
    %428 = arith.cmpi ne, %421, %427 : vector<16x1xi32>
    %429 = arith.extui %428 : vector<16x1xi1> to vector<16x1xi32>
    %430 = arith.sitofp %429 : vector<16x1xi32> to vector<16x1xf32>
    %431 = arith.mulf %420, %426 : vector<16x128xf32>
    %cst_133 = arith.constant dense<0.000000e+00> : vector<16xf32>
    %432 = vector.multi_reduction <add>, %431, %cst_133 [1] : vector<16x128xf32> to vector<16xf32>
    %433 = vector.shape_cast %432 : vector<16xf32> to vector<16x1xf32>
    %cst_134 = arith.constant 0.000000e+00 : f32
    %434 = vector.broadcast %cst_134 : f32 to vector<16x1xf32>
    %435 = arith.subf %434, %433 : vector<16x1xf32>
    %436 = arith.mulf %435, %430 : vector<16x1xf32>
    %cst_135 = arith.constant dense<0.000000e+00> : vector<16xf32>
    %437 = vector.multi_reduction <add>, %436, %cst_135 [1] : vector<16x1xf32> to vector<16xf32>
    %438 = vector.shape_cast %437 : vector<16xf32> to vector<16x1xf32>
    %cst_136 = arith.constant dense<0.000000e+00> : vector<1xf32>
    %439 = vector.multi_reduction <add>, %438, %cst_136 [0] : vector<16x1xf32> to vector<1xf32>
    %440 = vector.shape_cast %439 : vector<1xf32> to vector<1x1xf32>
    %cst_137 = arith.constant dense<0.000000e+00> : vector<16xf32>
    %441 = vector.multi_reduction <add>, %430, %cst_137 [1] : vector<16x1xf32> to vector<16xf32>
    %442 = vector.shape_cast %441 : vector<16xf32> to vector<16x1xf32>
    %cst_138 = arith.constant dense<0.000000e+00> : vector<1xf32>
    %443 = vector.multi_reduction <add>, %442, %cst_138 [0] : vector<16x1xf32> to vector<1xf32>
    %444 = vector.shape_cast %443 : vector<1xf32> to vector<1x1xf32>
    %cst_139 = arith.constant 1.000000e+00 : f32
    %445 = vector.broadcast %cst_139 : f32 to vector<1x1xf32>
    %446 = arith.maximumf %444, %445 : vector<1x1xf32>
    %447 = arith.divf %440, %446 : vector<1x1xf32>
    %c0_140 = arith.constant 0 : index
    %c0_141 = arith.constant 0 : index
    %448 = vector.load %arg20[%c0_140, %c0_141] : memref<1x1xf32, #tpu.memory_space<vmem>>, vector<1x1xf32>
    tpu.vector_store %arg20[%c0_140, %c0_141], %447 {strides = array<i32>} : memref<1x1xf32, #tpu.memory_space<vmem>>, vector<1x1xf32>,
    %449 = vector.extract_strided_slice %341 {offsets = [16, 0], sizes = [8, 32], strides = [1, 1]} : vector<24x32xf32> to vector<8x32xf32>
    %c0_142 = arith.constant 0 : index
    %c0_143 = arith.constant 0 : index
    %450 = vector.load %arg13[%c0_142, %c0_143] : memref<32x16xf32, #tpu.memory_space<vmem>>, vector<32x16xf32>
    %451 = arith.truncf %449 : vector<8x32xf32> to vector<8x32xbf16>
    %452 = arith.truncf %450 : vector<32x16xf32> to vector<32x16xbf16>
    %cst_144 = arith.constant dense<0.000000e+00> : vector<8x16xf32>
    %453 = tpu.matmul %451, %452, %cst_144 {dimension_numbers = #tpu.dot_dimension_numbers<[1], [0], [0], [1], [0, 0, 1, 1], [], []>} : vector<8x32xbf16>, vector<32x16xbf16>, vector<8x16xf32> -> vector<8x16xf32>
    %454 = vector.extract_strided_slice %0 {offsets = [11, 0], sizes = [1, 16], strides = [1, 1]} : vector<12x128xf32> to vector<1x16xf32>
    %455 = vector.broadcast %454 : vector<1x16xf32> to vector<8x16xf32>
    %456 = arith.addf %453, %455 : vector<8x16xf32>
    %cst_145 = arith.constant dense<0xFF800000> : vector<8xf32>
    %457 = vector.multi_reduction <maximumf>, %456, %cst_145 [1] : vector<8x16xf32> to vector<8xf32>
    %458 = vector.shape_cast %457 : vector<8xf32> to vector<8x1xf32>
    %459 = vector.broadcast %458 : vector<8x1xf32> to vector<8x16xf32>
    %460 = arith.subf %456, %459 : vector<8x16xf32>
    %461 = math.exp %460 : vector<8x16xf32>
    %cst_146 = arith.constant dense<0.000000e+00> : vector<8xf32>
    %462 = vector.multi_reduction <add>, %461, %cst_146 [1] : vector<8x16xf32> to vector<8xf32>
    %463 = vector.shape_cast %462 : vector<8xf32> to vector<8x1xf32>
    %464 = math.log %463 : vector<8x1xf32>
    %465 = vector.broadcast %464 : vector<8x1xf32> to vector<8x16xf32>
    %466 = arith.subf %460, %465 : vector<8x16xf32>
    %c0_147 = arith.constant 0 : index
    %c0_148 = arith.constant 0 : index
    %467 = vector.load %arg6[%c0_147, %c0_148] : memref<8x16xf32, #tpu.memory_space<vmem>>, vector<8x16xf32>
    %cst_149 = arith.constant 9.99999971E-10 : f32
    %468 = vector.broadcast %cst_149 : f32 to vector<8x16xf32>
    %469 = arith.addf %467, %468 : vector<8x16xf32>
    %470 = math.log %469 : vector<8x16xf32>
    %471 = arith.subf %470, %466 : vector<8x16xf32>
    %472 = arith.mulf %467, %471 : vector<8x16xf32>
    %cst_150 = arith.constant dense<0.000000e+00> : vector<8xf32>
    %473 = vector.multi_reduction <add>, %472, %cst_150 [1] : vector<8x16xf32> to vector<8xf32>
    %474 = vector.shape_cast %473 : vector<8xf32> to vector<8x1xf32>
    %c0_151 = arith.constant 0 : index
    %c0_152 = arith.constant 0 : index
    %475 = vector.load %arg5[%c0_151, %c0_152] : memref<8x1xf32, #tpu.memory_space<vmem>>, vector<8x1xf32>
    %476 = arith.mulf %474, %475 : vector<8x1xf32>
    %cst_153 = arith.constant dense<0.000000e+00> : vector<8xf32>
    %477 = vector.multi_reduction <add>, %476, %cst_153 [1] : vector<8x1xf32> to vector<8xf32>
    %478 = vector.shape_cast %477 : vector<8xf32> to vector<8x1xf32>
    %cst_154 = arith.constant dense<0.000000e+00> : vector<1xf32>
    %479 = vector.multi_reduction <add>, %478, %cst_154 [0] : vector<8x1xf32> to vector<1xf32>
    %480 = vector.shape_cast %479 : vector<1xf32> to vector<1x1xf32>
    %cst_155 = arith.constant dense<0.000000e+00> : vector<8xf32>
    %481 = vector.multi_reduction <add>, %475, %cst_155 [1] : vector<8x1xf32> to vector<8xf32>
    %482 = vector.shape_cast %481 : vector<8xf32> to vector<8x1xf32>
    %cst_156 = arith.constant dense<0.000000e+00> : vector<1xf32>
    %483 = vector.multi_reduction <add>, %482, %cst_156 [0] : vector<8x1xf32> to vector<1xf32>
    %484 = vector.shape_cast %483 : vector<1xf32> to vector<1x1xf32>
    %cst_157 = arith.constant 1.000000e+00 : f32
    %485 = vector.broadcast %cst_157 : f32 to vector<1x1xf32>
    %486 = arith.maximumf %484, %485 : vector<1x1xf32>
    %487 = arith.divf %480, %486 : vector<1x1xf32>
    %c0_158 = arith.constant 0 : index
    %c0_159 = arith.constant 0 : index
    %488 = vector.load %arg21[%c0_158, %c0_159] : memref<1x1xf32, #tpu.memory_space<vmem>>, vector<1x1xf32>
    tpu.vector_store %arg21[%c0_158, %c0_159], %487 {strides = array<i32>} : memref<1x1xf32, #tpu.memory_space<vmem>>, vector<1x1xf32>,
    %cst_160 = arith.constant dense<0xFF800000> : vector<2xf32>
    %489 = vector.multi_reduction <maximumf>, %359, %cst_160 [1] : vector<2x2xf32> to vector<2xf32>
    %490 = vector.shape_cast %489 : vector<2xf32> to vector<2x1xf32>
    %491 = vector.broadcast %490 : vector<2x1xf32> to vector<2x2xf32>
    %492 = arith.subf %359, %491 : vector<2x2xf32>
    %493 = math.exp %492 : vector<2x2xf32>
    %cst_161 = arith.constant dense<0.000000e+00> : vector<2xf32>
    %494 = vector.multi_reduction <add>, %493, %cst_161 [1] : vector<2x2xf32> to vector<2xf32>
    %495 = vector.shape_cast %494 : vector<2xf32> to vector<2x1xf32>
    %496 = math.log %495 : vector<2x1xf32>
    %497 = vector.broadcast %496 : vector<2x1xf32> to vector<2x2xf32>
    %498 = arith.subf %492, %497 : vector<2x2xf32>
    %c0_162 = arith.constant 0 : index
    %c0_163 = arith.constant 0 : index
    %499 = vector.load %arg4[%c0_162, %c0_163] : memref<2x1xi32, #tpu.memory_space<vmem>>, vector<2x1xi32>
    %500 = tpu.iota {dimensions = array<i32: 1>} : vector<2x2xi32>
    %501 = vector.broadcast %499 : vector<2x1xi32> to vector<2x2xi32>
    %502 = arith.cmpi eq, %500, %501 : vector<2x2xi32>
    %503 = arith.extui %502 : vector<2x2xi1> to vector<2x2xi32>
    %504 = arith.sitofp %503 : vector<2x2xi32> to vector<2x2xf32>
    %505 = arith.mulf %498, %504 : vector<2x2xf32>
    %cst_164 = arith.constant dense<0.000000e+00> : vector<2xf32>
    %506 = vector.multi_reduction <add>, %505, %cst_164 [1] : vector<2x2xf32> to vector<2xf32>
    %507 = vector.shape_cast %506 : vector<2xf32> to vector<2x1xf32>
    %cst_165 = arith.constant 0.000000e+00 : f32
    %508 = vector.broadcast %cst_165 : f32 to vector<2x1xf32>
    %509 = arith.subf %508, %507 : vector<2x1xf32>
    %cst_166 = arith.constant dense<0.000000e+00> : vector<2xf32>
    %510 = vector.multi_reduction <add>, %509, %cst_166 [1] : vector<2x1xf32> to vector<2xf32>
    %511 = vector.shape_cast %510 : vector<2xf32> to vector<2x1xf32>
    %cst_167 = arith.constant dense<0.000000e+00> : vector<1xf32>
    %512 = vector.multi_reduction <add>, %511, %cst_167 [0] : vector<2x1xf32> to vector<1xf32>
    %513 = vector.shape_cast %512 : vector<1xf32> to vector<1x1xf32>
    %cst_168 = arith.constant 2.000000e+00 : f32
    %514 = vector.broadcast %cst_168 : f32 to vector<1x1xf32>
    %515 = arith.divf %513, %514 : vector<1x1xf32>
    %c0_169 = arith.constant 0 : index
    %c0_170 = arith.constant 0 : index
    %516 = vector.load %arg22[%c0_169, %c0_170] : memref<1x1xf32, #tpu.memory_space<vmem>>, vector<1x1xf32>
    tpu.vector_store %arg22[%c0_169, %c0_170], %515 {strides = array<i32>} : memref<1x1xf32, #tpu.memory_space<vmem>>, vector<1x1xf32>,
    return
  }
}

</mosaic_0001>

<bundles_post_ra>
// kernel: vdgr_forward.1
= control target key start
LH: loop header
LB: loop body
LE: loop exit
PB: predicated region body
PF: predicated region fallthrough
CT: control target
= control target key end

     0   :  { %s2893_s0 = inlined_call_operand.vmem [shape: f32[16,32], index: 0, kind: input, shape index: {}]   ;;  %s2894_s1 = inlined_call_operand.vmem [shape: f32[8,21], index: 1, kind: input, shape index: {}]   ;;  %s2895_s2 = inlined_call_operand.vmem [shape: f32[24,24], index: 2, kind: input, shape index: {}]   ;;  %s2896_s3 = inlined_call_operand.vmem [shape: s32[16,1], index: 3, kind: input, shape index: {}]   ;;  %s2897_s4 = inlined_call_operand.vmem [shape: s32[2,1], index: 4, kind: input, shape index: {}]   ;;  %s2898_s5 = inlined_call_operand.vmem [shape: f32[8,1], index: 5, kind: input, shape index: {}]   ;;  %s2899_s6 = inlined_call_operand.vmem [shape: f32[8,16], index: 6, kind: input, shape index: {}]   ;;  %s2900_s7 = inlined_call_operand.vmem [shape: f32[12,128], index: 7, kind: input, shape index: {}]   ;;  %s2901_s8 = inlined_call_operand.vmem [shape: f32[21,32], index: 8, kind: input, shape index: {}]   ;;  %s2902_s9 = inlined_call_operand.vmem [shape: f32[32,32], index: 9, kind: input, shape index: {}]   ;;  %s2903_s10 = inlined_call_operand.vmem [shape: f32[32,2], index: 10, kind: input, shape index: {}]   ;;  %s2904_s11 = inlined_call_operand.vmem [shape: f32[32,32], index: 11, kind: input, shape index: {}]   ;;  %s2905_s12 = inlined_call_operand.vmem [shape: f32[32,128], index: 12, kind: input, shape index: {}]   ;;  %s2906_s13 = inlined_call_operand.vmem [shape: f32[32,16], index: 13, kind: input, shape index: {}]   ;;  %s2907_s14 = inlined_call_operand.vmem [shape: f32[2,32,96], index: 14, kind: input, shape index: {}]   ;;  %s2908_s15 = inlined_call_operand.vmem [shape: f32[2,32,32], index: 15, kind: input, shape index: {}]   ;;  %s2909_s16 = inlined_call_operand.vmem [shape: f32[2,32,64], index: 16, kind: input, shape index: {}]   ;;  %s2910_s17 = inlined_call_operand.vmem [shape: f32[2,64,32], index: 17, kind: input, shape index: {}]   ;;  %s2911_s18 = inlined_call_operand.vmem [shape: f32[2,8,128], index: 18, kind: input, shape index: {}]   ;;  %s2912_s19 = inlined_call_operand.hbm [shape: f32[2,2], index: 19, kind: output, shape index: {0}]   ;;  %s2913_s20 = inlined_call_operand.hbm [shape: f32[1,1], index: 20, kind: output, shape index: {1}]   ;;  %s2914_s21 = inlined_call_operand.hbm [shape: f32[1,1], index: 21, kind: output, shape index: {2}]   ;;  %s2915_s22 = inlined_call_operand.hbm [shape: f32[1,1], index: 22, kind: output, shape index: {3}]  }
   0x1   :  { %2919 = sst [smem:[#allocation12_spill]] %s2893_s0 }
   0x2   :  { %2920 = sst [smem:[#allocation13_spill]] %s2894_s1 }
   0x3   :  { %2921 = sst [smem:[#allocation14_spill]] %s2895_s2 }
   0x4   :  { %2922 = sst [smem:[#allocation15_spill]] %s2896_s3 }
   0x5   :  { %2923 = sst [smem:[#allocation16_spill]] %s2897_s4 }
   0x6   :  { %2924 = sst [smem:[#allocation17_spill]] %s2898_s5 }
   0x7   :  { %2925 = sst [smem:[#allocation18_spill]] %s2899_s6 }
   0x8   :  { %28 = vsyncpa [#allocation3], 0 }
   0x9   :  { %29 = vsyncpa [#allocation5], 0  ;;  %s2926_s29 = sld [smem:[#allocation12_spill]]  ;;  %vm74_vm0 = vcmask 261120   ;;  %v135_v1 = vld [vmem:[%s2901_s8 + $0x10] sm:$0x1f] }
   0xa   :  { %vm144_vm1 = vcmask 1041408   ;;  %vm145_vm2 = vcmask 1042432   ;;  %v138_v3 = vpack.c.bf16 %v135_v1, %v135_v1  ;;  %v2110_v4 = vmov 65535  }
   0xb   :  { %v146_v5 = vsel %vm144_vm1, 4294967295, %v2110_v4 }
   0xf   :  { %v72_v0 = vld [vmem:[%s2926_s29] sm:$0xff] }
  0x10   :  { %v75_v2 = vsel %vm74_vm0, %v72_v0, 0.0 }
  0x11   :  { %76 = vadd.xlane.f32.xlu0 %v75_v2 }
  0x12   :  { %30 = vsyncpa [#allocation8], 0  ;;  %v147_v6 = vsel %vm145_vm2, %v146_v5, 0  ;;  %v133_v7 = vld [vmem:[%s2901_s8] sm:$0xff]  ;;  %v134_v8 = vld [vmem:[%s2901_s8 + $0x8] sm:$0xff]  ;;  %s2927_s2 = sld [smem:[#allocation13_spill]] }
  0x13   :  { %v149_v9 = vand.u32 %v147_v6, %v138_v3  ;;  %v73_v10 = vld [vmem:[%s2926_s29 + $0x8] sm:$0xff]  ;;  %v137_v11 = vpack.c.bf16 %v134_v8, %v133_v7  ;;  %vm140_vm3 = vcmask 171008   ;;  %v2111_v15 = vmov 32.0   ;;  %v2267_v28 = vld [vmem:[%s2900_s7] sm:$0xff]  ;;  %v195_v41 = vld [vmem:[%s2907_s14 + $0x10] sm:$0xff]  ;;  %s2112_s6 = smov 96  }
  0x14   :  { %v78_v13 = vsel %vm74_vm0, %v73_v10, 0.0  ;;  %1880 = vrcp.f32 %v2111_v15  ;;  %v139_v30 = vperm.slane %v2267_v28, 2  ;;  %v196_v42 = vld [vmem:[%s2907_s14 + $0x18] sm:$0xff]  ;;  %v193_v44 = vld [vmem:[%s2907_s14] sm:$0xff]  ;;  %v194_v45 = vld [vmem:[%s2907_s14 + $0x8] sm:$0xff]  ;;  %v126_v4 = vperm.slane %v2267_v28, 0 }
  0x15   :  { %157 = vmatpush.bf16.msra.mxu0 %v149_v9  ;;  %v217_v43 = vpack.c.bf16 %v196_v42, %v195_v41  ;;  %v216_v47 = vpack.c.bf16 %v194_v45, %v193_v44  ;;  %v129_v9 = vperm.slane %v2267_v28, 1  ;;  %s2113_s25 = smov 80   ;;  %s2114_s26 = smov 112   ;;  %vm251_vm14 = vcmask 130048  }
  0x16   :  { %s2928_s27 = sld [smem:[#allocation14_spill]]  ;;  %vm288_vm15 = vcmask 195584   ;;  %s2115_s4 = smov 64   ;;  %vm335_vm2 = vcmask 1043456  }
  0x17   :  { %231 = vmatpush.bf16.msra.mxu1 %v217_v43  ;;  %s2116_s0 = smov 48   ;;  %s2930_s3 = sld [smem:[#allocation18_spill]] }
  0x18   :  { %v132_v12 = vld [vmem:[%s2927_s2] sm:$0xff]  ;;  %s2931_s30 = sld [smem:[#allocation16_spill]]  ;;  %s2122_s5 = smov [#allocation6]  }
  0x19   :  { %v136_v14 = vpack.c.bf16 %v132_v12, %v132_v12  ;;  %158 = vmatpush.bf16.msra.mxu0 %v137_v11  ;;  %79 = vadd.xlane.f32.xlu0 %v78_v13  ;;  %s2932_s23 = sld [smem:[#allocation17_spill]] }
  0x1a   :  { %v1881_v16 = vpop.eup %1880 }
  0x1b   :  { %v82_v17 = vmul.f32 32.0, %v1881_v16  ;;  %vm86_vm4 = vweird.f32 %v1881_v16  ;;  %232 = vmatpush.bf16.msra.mxu1 %v216_v47 }
  0x1c   :  { %1795 = vmatmul.msk.bf16.vlgmr.msra.gmra.mxu0 %vm140_vm3, %v136_v14 }
  0x1d   :  { %v83_v18 = vsub.f32 1.0, %v82_v17 }
  0x1f   :  { %v84_v19 = vmul.f32 %v1881_v16, %v83_v18 }
  0x21   :  { %v85_v21 = vadd.f32 %v1881_v16, %v84_v19 }
  0x23   :  { %v2260_v22 = vsel %vm86_vm4, %v1881_v16, %v85_v21 }
  0x84   :  { %v77_v20 = vpop.xlane.xlu0 %76 }
  0x85   :  { %v88_v29 = vmul.f32 %v2260_v22, %v77_v20 }
  0x87   :  { %v90_v32 = vsub.f32 %v72_v0, %v88_v29 }
  0x89   :  { %v92_v35 = vmul.f32 %v90_v32, %v90_v32 }
  0x8b   :  { %v94_v37 = vsel %vm74_vm0, %v92_v35, 0.0 }
  0x8c   :  { %v80_v23 = vpop.xlane.xlu0 %79 }
  0x8d   :  { %v89_v24 = vmul.f32 %v2260_v22, %v80_v23 }
  0x8f   :  { %v91_v25 = vsub.f32 %v73_v10, %v89_v24  ;;  %v186_v24 = vperm.slane %v2267_v28, 3 }
  0x91   :  { %v93_v26 = vmul.f32 %v91_v25, %v91_v25 }
  0x93   :  { %v97_v27 = vsel %vm74_vm0, %v93_v26, 0.0 }
  0x94   :  { %98 = vadd.xlane.f32.xlu2 %v97_v27  ;;  %v188_v27 = vperm.slane %v2267_v28, 4 }
  0x99   :  { %v160_v31 = vpop.f32.mrf.mxu0 }
  0x9a   :  { %v161_v33 = vadd.f32 %v160_v31, %v139_v30 }
  0x9c   :  { %v164_v34 = vsel %vm74_vm0, %v161_v33, 0.0 }
  0x9d   :  { %165 = vadd.xlane.f32.xlu1 %v164_v34 }
  0xa1   :  { %v162_v36 = vpop.f32.mrf.mxu0 }
  0xa5   :  { %95 = vadd.xlane.f32.xlu1 %v94_v37 }
 0x107   :  { %v99_v38 = vpop.xlane.xlu2 %98 }
 0x108   :  { %v101_v39 = vmul.f32 %v99_v38, %v2260_v22 }
 0x10a   :  { %v103_v40 = vadd.f32 1e-12, %v101_v39 }
 0x10c   :  { %1882 = vrsqrt.f32 %v103_v40  ;;  %vm120_vm5 = vweird.f32 %v103_v40 }
 0x110   :  { %v166_v46 = vpop.xlane.xlu1 %165 }
 0x111   :  { %v167_v48 = vmul.f32 %v166_v46, %v2260_v22 }
 0x112   :  { %v1883_v49 = vpop.eup %1882 }
 0x113   :  { %v168_v50 = vsub.f32 %v161_v33, %v167_v48  ;;  %v115_v51 = vmul.f32 %v1883_v49, %v103_v40  ;;  %vm121_vm6 = vweird.f32 %v1883_v49  ;;  %v2309_v33 = vld [vmem:[%s2911_s18] sm:$0xff] }
 0x114   :  { %vm122_vm7 = vmor %vm120_vm5, %vm121_vm6  ;;  %v218_v34 = vperm.slane %v2309_v33, 0 }
 0x115   :  { %v169_v52 = vmul.f32 %v168_v50, %v168_v50  ;;  %v116_v54 = vmul.f32 %v1883_v49, %v115_v51 }
 0x117   :  { %v170_v53 = vsel %vm74_vm0, %v169_v52, 0.0  ;;  %v117_v58 = vmul.f32 0.5, %v116_v54 }
 0x118   :  { %171 = vadd.xlane.f32.xlu2 %v170_v53  ;;  %v96_v55 = vpop.xlane.xlu1 %95  ;;  %v2341_v53 = vld [vmem:[%s2928_s27] sm:$0xff] }
 0x119   :  { %v100_v56 = vmul.f32 %v96_v55, %v2260_v22  ;;  %v118_v59 = vsub.f32 1.5, %v117_v58 }
 0x11b   :  { %v102_v57 = vadd.f32 1e-12, %v100_v56  ;;  %v119_v61 = vmul.f32 %v1883_v49, %v118_v59 }
 0x11d   :  { %1884 = vrsqrt.f32 %v102_v57  ;;  %v123_v0 = vsel %vm122_vm7, %v1883_v49, %v119_v61  ;;  %vm110_vm8 = vweird.f32 %v102_v57 }
 0x11e   :  { %v125_v3 = vmul.f32 %v123_v0, %v91_v25 }
 0x120   :  { %v128_v8 = vmul.f32 %v126_v4, %v125_v3 }
 0x122   :  { %v2293_v12 = vadd.f32 %v129_v9, %v128_v8  ;;  %v2359_v8 = vld [vmem:[%s2928_s27 + $0x10] sm:$0xff] }
 0x123   :  { %v1885_v60 = vpop.eup %1884 }
 0x124   :  { %v105_v62 = vmul.f32 %v1885_v60, %v102_v57  ;;  %vm111_vm9 = vweird.f32 %v1885_v60 }
 0x125   :  { %vm112_vm10 = vmor %vm110_vm8, %vm111_vm9 }
 0x126   :  { %v106_v63 = vmul.f32 %v1885_v60, %v105_v62 }
 0x128   :  { %v107_v1 = vmul.f32 0.5, %v106_v63  ;;  %v2350_v63 = vld [vmem:[%s2928_s27 + $0x8] sm:$0xff] }
 0x12a   :  { %v108_v2 = vsub.f32 1.5, %v107_v1 }
 0x12c   :  { %v109_v5 = vmul.f32 %v1885_v60, %v108_v2 }
 0x12e   :  { %v113_v6 = vsel %vm112_vm10, %v1885_v60, %v109_v5 }
 0x12f   :  { %v124_v7 = vmul.f32 %v113_v6, %v90_v32 }
 0x131   :  { %v127_v10 = vmul.f32 %v126_v4, %v124_v7 }
 0x133   :  { %v2291_v11 = vadd.f32 %v129_v9, %v127_v10 }
 0x135   :  { %v214_v13 = vpack.c.bf16 %v2293_v12, %v2291_v11 }
 0x137   :  { %1796 = vmatmul.msk.bf16.vlgmr.msra.gmra.mxu1 %vm74_vm0, %v214_v13 }
 0x18b   :  { %v172_v14 = vpop.xlane.xlu2 %171 }
 0x18c   :  { %v173_v15 = vmul.f32 %v172_v14, %v2260_v22 }
 0x18e   :  { %v174_v16 = vadd.f32 1e-12, %v173_v15 }
 0x190   :  { %1886 = vrsqrt.f32 %v174_v16  ;;  %vm181_vm12 = vweird.f32 %v174_v16 }
 0x196   :  { %v1887_v17 = vpop.eup %1886 }
 0x197   :  { %v176_v18 = vmul.f32 %v1887_v17, %v174_v16  ;;  %vm182_vm11 = vweird.f32 %v1887_v17 }
 0x198   :  { %vm183_vm13 = vmor %vm181_vm12, %vm182_vm11  ;;  %vm666_vm12 = vcmask 523264  }
 0x199   :  { %v177_v19 = vmul.f32 %v1887_v17, %v176_v18 }
 0x19b   :  { %v178_v20 = vmul.f32 0.5, %v177_v19 }
 0x19d   :  { %v179_v21 = vsub.f32 1.5, %v178_v20 }
 0x19f   :  { %v180_v23 = vmul.f32 %v1887_v17, %v179_v21 }
 0x1a1   :  { %v184_v25 = vsel %vm183_vm13, %v1887_v17, %v180_v23 }
 0x1a2   :  { %v185_v26 = vmul.f32 %v184_v25, %v168_v50 }
 0x1a4   :  { %v187_v29 = vmul.f32 %v186_v24, %v185_v26 }
 0x1a6   :  { %v2301_v30 = vadd.f32 %v188_v27, %v187_v29 }
 0x1a8   :  { %v215_v31 = vpack.c.bf16 %v2301_v30, %v2301_v30 }
 0x1aa   :  { %1797 = vmatmul.msk.bf16.gmra.mxu1 %vm74_vm0, %v215_v31 }
 0x1b4   :  { %v234_v32 = vpop.f32.mrf.mxu1 }
 0x1b5   :  { %v235_v36 = vadd.f32 %v234_v32, %v218_v34 }
 0x1bc   :  { %v236_v35 = vpop.f32.mrf.mxu1 }
 0x1bd   :  { %v237_v37 = vadd.f32 %v236_v35, %v218_v34 }
 0x1bf   :  { %v2312_v28 = vpack.c.bf16 %v237_v37, %v235_v36 }
 0x1c1   :  { %247 = vrot.lane.b32.xlu1 %v2312_v28, %s2112_s6 }
 0x227   :  { %v239_v38 = vpop.f32.mrf.mxu1 }
 0x228   :  { %v240_v39 = vadd.f32 %v239_v38, %v218_v34 }
 0x22a   :  { %v2316_v40 = vpack.c.bf16 %v240_v39, %v240_v39 }
 0x22c   :  { %366 = vrot.lane.b32.xlu2 %v2316_v40, %s2113_s25  ;;  %249 = vrot.lane.b32.xlu0 %v2316_v40, %s2112_s6 }
 0x22d   :  { %362 = vrot.lane.b32.xlu1 %v2316_v40, %s2114_s26 }
 0x22f   :  { %v241_v41 = vpop.f32.mrf.mxu1 }
 0x233   :  { %v248_v46 = vpop.permute.xlu1 %247 }
 0x234   :  { %360 = vrot.lane.b32.xlu2 %v2312_v28, %s2114_s26  ;;  %364 = vrot.lane.b32.xlu0 %v2312_v28, %s2113_s25  ;;  %v259_v48 = vsel %vm251_vm14, %v248_v46, 0 }
 0x286   :  { %v367_v42 = vpop.permute.xlu2 %366 }
 0x287   :  { %v378_v43 = vsel %vm251_vm14, %v367_v42, 0 }
 0x288   :  { %386 = vmatpush.bf16.xpose.msrb.mxu0 %v378_v43 }
 0x28e   :  { %v361_v50 = vpop.permute.xlu2 %360 }
 0x29e   :  { %v250_v44 = vpop.permute.xlu0 %249 }
 0x29f   :  { %v262_v45 = vsel %vm251_vm14, %v250_v44, 0  ;;  %v363_v51 = vpop.permute.xlu1 %362 }
 0x2a0   :  { %270 = vmatpush.bf16.xpose.msra.mxu2 %v262_v45 }
 0x2a6   :  { %v365_v47 = vpop.permute.xlu0 %364 }
 0x2a7   :  { %v375_v49 = vsel %vm251_vm14, %v365_v47, 0 }
 0x2a8   :  { %271 = vmatpush.bf16.xpose.msra.mxu2 %v259_v48  ;;  %387 = vmatpush.bf16.xpose.msrb.mxu0 %v375_v49 }
 0x2af   :  { %1798 = vmatmul.msk.bf16.vlgmr.msra.gmra.mxu2 %vm251_vm14, %v2312_v28  ;;  %1802 = vmatmul.msk.bf16.vlgmr.msrb.gmra.mxu0 %vm251_vm14, %v361_v50 }
 0x2bf   :  { %1799 = vmatmul.msk.bf16.gmra.mxu2 %vm251_vm14, %v2316_v40  ;;  %1803 = vmatmul.msk.bf16.gmra.mxu0 %vm251_vm14, %v363_v51 }
 0x32c   :  { %v389_v52 = vpop.f32.mrf.mxu0 }
 0x32d   :  { %v398_v54 = vmul.f32 0.25, %v389_v52 }
 0x32f   :  { %v401_v55 = vadd.f32 %v398_v54, %v2341_v53 }
 0x331   :  { %v404_v56 = vsel %vm288_vm15, %v401_v55, -inf }
 0x332   :  { %405 = vmax.xlane.f32.xlu1 %v404_v56  ;;  %v273_v57 = vpop.f32.mrf.mxu2 }
 0x333   :  { %v282_v58 = vmul.f32 0.25, %v273_v57 }
 0x334   :  { %v391_v59 = vpop.f32.mrf.mxu0 }
 0x335   :  { %v285_v60 = vadd.f32 %v282_v58, %v2341_v53  ;;  %v399_v61 = vmul.f32 0.25, %v391_v59 }
 0x337   :  { %v289_v62 = vsel %vm288_vm15, %v285_v60, -inf  ;;  %v402_v2 = vadd.f32 %v399_v61, %v2350_v63 }
 0x338   :  { %290 = vmax.xlane.f32.xlu0 %v289_v62 }
 0x339   :  { %v407_v6 = vsel %vm288_vm15, %v402_v2, -inf }
 0x33a   :  { %v275_v0 = vpop.f32.mrf.mxu2 }
 0x33b   :  { %v283_v1 = vmul.f32 0.25, %v275_v0 }
 0x33c   :  { %v394_v3 = vpop.f32.mrf.mxu0 }
 0x33d   :  { %v286_v4 = vadd.f32 %v283_v1, %v2350_v63  ;;  %v400_v5 = vmul.f32 0.25, %v394_v3 }
 0x33f   :  { %v292_v7 = vsel %vm288_vm15, %v286_v4, -inf  ;;  %v403_v10 = vadd.f32 %v400_v5, %v2359_v8 }
 0x340   :  { %408 = vmax.xlane.f32.xlu0 %v407_v6  ;;  %293 = vmax.xlane.f32.xlu2 %v292_v7 }
 0x341   :  { %v410_v15 = vsel %vm288_vm15, %v403_v10, -inf }
 0x342   :  { %v278_v9 = vpop.f32.mrf.mxu2 }
 0x343   :  { %v284_v14 = vmul.f32 0.25, %v278_v9 }
 0x344   :  { %v396_v13 = vpop.f32.mrf.mxu0 }
 0x345   :  { %v287_v17 = vadd.f32 %v284_v14, %v2359_v8 }
 0x347   :  { %v295_v18 = vsel %vm288_vm15, %v287_v17, -inf }
 0x348   :  { %411 = vmax.xlane.f32.xlu2 %v410_v15 }
 0x34a   :  { %v280_v16 = vpop.f32.mrf.mxu2 }
 0x34b   :  { %326 = vrot.lane.b32.xlu1 %v2316_v40, %s2115_s4 }
 0x350   :  { %296 = vmax.xlane.f32.xlu2 %v295_v18 }
 0x3a5   :  { %v406_v19 = vpop.xlane.xlu1 %405 }
 0x3a6   :  { %v413_v20 = vsub.f32 %v401_v55, %v406_v19 }
 0x3a8   :  { %v416_v21 = vmul.f32 1.442695, %v413_v20 }
 0x3aa   :  { %1888 = vpow2.f32 %v416_v21  ;;  %v199_v21 = vld [vmem:[%s2908_s15 + $0x10] sm:$0xff] }
 0x3ab   :  { %v291_v23 = vpop.xlane.xlu0 %290 }
 0x3ac   :  { %v298_v24 = vsub.f32 %v285_v60, %v291_v23  ;;  %v200_v23 = vld [vmem:[%s2908_s15 + $0x18] sm:$0xff] }
 0x3ae   :  { %v301_v25 = vmul.f32 1.442695, %v298_v24  ;;  %v473_v24 = vpack.c.bf16 %v200_v23, %v199_v21  ;;  %v201_v21 = vld [vmem:[%s2909_s16] sm:$0xff]  ;;  %v202_v23 = vld [vmem:[%s2909_s16 + $0x8] sm:$0xff] }
 0x3b0   :  { %v1889_v26 = vpop.eup %1888  ;;  %1890 = vpow2.f32 %v301_v25  ;;  %v197_v25 = vld [vmem:[%s2908_s15] sm:$0xff] }
 0x3b1   :  { %v422_v27 = vsel %vm288_vm15, %v1889_v26, 0.0 }
 0x3b2   :  { %423 = vadd.xlane.f32.xlu0 %v422_v27 }
 0x3b3   :  { %v409_v29 = vpop.xlane.xlu0 %408  ;;  %v294_v31 = vpop.xlane.xlu2 %293 }
 0x3b4   :  { %v414_v32 = vsub.f32 %v402_v2, %v409_v29  ;;  %v299_v34 = vsub.f32 %v286_v4, %v294_v31 }
 0x3b6   :  { %v1891_v35 = vpop.eup %1890  ;;  %v418_v36 = vmul.f32 1.442695, %v414_v32  ;;  %v303_v37 = vmul.f32 1.442695, %v299_v34 }
 0x3b7   :  { %v307_v38 = vsel %vm288_vm15, %v1891_v35, 0.0 }
 0x3b8   :  { %1892 = vpow2.f32 %v418_v36  ;;  %308 = vadd.xlane.f32.xlu1 %v307_v38 }
 0x3b9   :  { %1894 = vpow2.f32 %v303_v37 }
 0x3bb   :  { %v412_v46 = vpop.xlane.xlu2 %411 }
 0x3bc   :  { %v415_v47 = vsub.f32 %v403_v10, %v412_v46 }
 0x3bd   :  { %v327_v39 = vpop.permute.xlu1 %326 }
 0x3be   :  { %v1893_v41 = vpop.eup %1892  ;;  %v337_v42 = vsel %vm335_vm2, %v327_v39, 0  ;;  %v420_v49 = vmul.f32 1.442695, %v415_v47  ;;  %v525_v47 = vperm.slane %v2309_v33, 1 }
 0x3bf   :  { %v1895_v43 = vpop.eup %1894  ;;  %345 = vmatpush.bf16.msra.mxu3 %v337_v42  ;;  %v425_v44 = vsel %vm288_vm15, %v1893_v41, 0.0 }
 0x3c0   :  { %426 = vadd.xlane.f32.xlu2 %v425_v44  ;;  %v310_v45 = vsel %vm288_vm15, %v1895_v43, 0.0  ;;  %1896 = vpow2.f32 %v420_v49 }
 0x3c1   :  { %311 = vadd.xlane.f32.xlu0 %v310_v45 }
 0x3c3   :  { %v297_v48 = vpop.xlane.xlu2 %296 }
 0x3c4   :  { %v300_v50 = vsub.f32 %v287_v17, %v297_v48 }
 0x3c6   :  { %v305_v51 = vmul.f32 1.442695, %v300_v50  ;;  %v1897_v52 = vpop.eup %1896 }
 0x3c7   :  { %v428_v54 = vsel %vm288_vm15, %v1897_v52, 0.0 }
 0x3c8   :  { %1898 = vpow2.f32 %v305_v51 }
 0x3ce   :  { %v1899_v55 = vpop.eup %1898 }
 0x3cf   :  { %v313_v56 = vsel %vm288_vm15, %v1899_v55, 0.0 }
 0x3d1   :  { %439 = vrot.lane.b32.xlu1 %v2312_v28, %s2116_s0 }
 0x3d5   :  { %324 = vrot.lane.b32.xlu0 %v2312_v28, %s2115_s4 }
 0x3d8   :  { %441 = vrot.lane.b32.xlu2 %v2316_v40, %s2116_s0 }
 0x3fb   :  { %429 = vadd.xlane.f32.xlu1 %v428_v54 }
 0x3ff   :  { %314 = vadd.xlane.f32.xlu0 %v313_v56 }
 0x425   :  { %v424_v28 = vpop.xlane.xlu0 %423 }
 0x42b   :  { %v309_v58 = vpop.xlane.xlu1 %308 }
 0x433   :  { %v427_v57 = vpop.xlane.xlu2 %426 }
 0x434   :  { %1900 = vrcp.f32 %v427_v57  ;;  %v312_v40 = vpop.xlane.xlu0 %311 }
 0x435   :  { %1902 = vrcp.f32 %v424_v28 }
 0x436   :  { %1904 = vrcp.f32 %v312_v40 }
 0x437   :  { %1906 = vrcp.f32 %v309_v58 }
 0x43a   :  { %v1901_v61 = vpop.eup %1900 }
 0x43b   :  { %v442_v59 = vpop.permute.xlu2 %441  ;;  %v1903_v62 = vpop.eup %1902  ;;  %v435_v0 = vmul.f32 %v1901_v61, %v1893_v41 }
 0x43c   :  { %v451_v60 = vsel %vm335_vm2, %v442_v59, 0  ;;  %v1905_v1 = vpop.eup %1904  ;;  %v434_v2 = vmul.f32 %v1903_v62, %v1889_v26  ;;  %v198_v26 = vld [vmem:[%s2908_s15 + $0x8] sm:$0xff] }
 0x43d   :  { %459 = vmatpush.bf16.msrb.mxu1 %v451_v60  ;;  %v1907_v4 = vpop.eup %1906  ;;  %v320_v6 = vmul.f32 %v1905_v1, %v1895_v43  ;;  %v359_v27 = vpack.c.bf16 %v198_v26, %v197_v25 }
 0x43e   :  { %v437_v5 = vpack.c.bf16 %v435_v0, %v434_v2  ;;  %v319_v9 = vmul.f32 %v1907_v4, %v1891_v35 }
 0x43f   :  { %511 = vmatpush.bf16.msrb.mxu2 %v359_v27 }
 0x440   :  { %v322_v10 = vpack.c.bf16 %v320_v6, %v319_v9 }
 0x443   :  { %v440_v3 = vpop.permute.xlu1 %439 }
 0x444   :  { %460 = vmatpush.bf16.msrb.mxu1 %v440_v3 }
 0x447   :  { %v325_v7 = vpop.permute.xlu0 %324  ;;  %1804 = vmatmul.msk.bf16.vlgmr.msrb.gmra.mxu1 %vm288_vm15, %v437_v5 }
 0x448   :  { %346 = vmatpush.bf16.msra.mxu3 %v325_v7 }
 0x44b   :  { %1800 = vmatmul.msk.bf16.vlgmr.msra.gmra.mxu3 %vm288_vm15, %v322_v10 }
 0x44c   :  { %487 = vmatpush.bf16.msrb.mxu3 %v473_v24  ;;  %v605_v24 = vpack.c.bf16 %v202_v23, %v201_v21 }
 0x46e   :  { %v430_v13 = vpop.xlane.xlu1 %429 }
 0x46f   :  { %1908 = vrcp.f32 %v430_v13 }
 0x472   :  { %v315_v14 = vpop.xlane.xlu0 %314 }
 0x473   :  { %1910 = vrcp.f32 %v315_v14 }
 0x475   :  { %v1909_v15 = vpop.eup %1908 }
 0x476   :  { %v436_v16 = vmul.f32 %v1909_v15, %v1897_v52 }
 0x478   :  { %v438_v17 = vpack.c.bf16 %v436_v16, %v436_v16  ;;  %v203_v16 = vld [vmem:[%s2909_s16 + $0x10] sm:$0xff] }
 0x479   :  { %v1911_v18 = vpop.eup %1910 }
 0x47a   :  { %1805 = vmatmul.msk.bf16.gmra.mxu1 %vm288_vm15, %v438_v17  ;;  %v321_v19 = vmul.f32 %v1911_v18, %v1899_v55  ;;  %v204_v17 = vld [vmem:[%s2909_s16 + $0x18] sm:$0xff] }
 0x47b   :  { %v606_v18 = vpack.c.bf16 %v204_v17, %v203_v16  ;;  %v205_v16 = vld [vmem:[%s2910_s17] sm:$0xff]  ;;  %v206_v17 = vld [vmem:[%s2910_s17 + $0x8] sm:$0xff] }
 0x47c   :  { %v323_v20 = vpack.c.bf16 %v321_v19, %v321_v19 }
 0x47d   :  { %620 = vmatpush.bf16.msra.mxu0 %v606_v18  ;;  %v661_v18 = vpack.c.bf16 %v206_v17, %v205_v16 }
 0x47e   :  { %1801 = vmatmul.msk.bf16.gmra.mxu3 %vm288_vm15, %v323_v20 }
 0x481   :  { %621 = vmatpush.bf16.msra.mxu0 %v605_v24 }
 0x4c4   :  { %v462_v29 = vpop.f32.mrf.mxu1 }
 0x4cc   :  { %v464_v31 = vpop.f32.mrf.mxu1 }
 0x4cd   :  { %v471_v32 = vpack.c.bf16 %v464_v31, %v462_v29 }
 0x4ce   :  { %v348_v34 = vpop.f32.mrf.mxu3 }
 0x4cf   :  { %1806 = vmatmul.msk.bf16.vlgmr.msrb.gmra.mxu3 %vm251_vm14, %v471_v32 }
 0x4d6   :  { %v350_v35 = vpop.f32.mrf.mxu3 }
 0x4d7   :  { %v357_v36 = vpack.c.bf16 %v350_v35, %v348_v34 }
 0x4d9   :  { %1808 = vmatmul.msk.bf16.vlgmr.msrb.gmra.mxu2 %vm251_vm14, %v357_v36 }
 0x4f7   :  { %v467_v37 = vpop.f32.mrf.mxu1 }
 0x4f8   :  { %v472_v38 = vpack.c.bf16 %v467_v37, %v467_v37 }
 0x4fa   :  { %1807 = vmatmul.msk.bf16.gmra.mxu3 %vm251_vm14, %v472_v38 }
 0x4ff   :  { %v469_v39 = vpop.f32.mrf.mxu1 }
 0x501   :  { %v353_v41 = vpop.f32.mrf.mxu3 }
 0x502   :  { %v358_v42 = vpack.c.bf16 %v353_v41, %v353_v41 }
 0x504   :  { %1809 = vmatmul.msk.bf16.gmra.mxu2 %vm251_vm14, %v358_v42 }
 0x509   :  { %v355_v43 = vpop.f32.mrf.mxu3 }
 0x552   :  { %v489_v44 = vpop.f32.mrf.mxu3 }
 0x55a   :  { %v491_v51 = vpop.f32.mrf.mxu3 }
 0x55c   :  { %v513_v45 = vpop.f32.mrf.mxu2 }
 0x55d   :  { %v514_v46 = vadd.f32 %v513_v45, %v489_v44  ;;  %v595_v45 = vperm.slane %v2309_v33, 2 }
 0x55f   :  { %v522_v48 = vadd.f32 %v514_v46, %v2291_v11 }
 0x561   :  { %v526_v49 = vadd.f32 %v525_v47, %v522_v48 }
 0x563   :  { %v529_v50 = vsel %vm74_vm0, %v526_v49, 0.0 }
 0x564   :  { %v515_v52 = vpop.f32.mrf.mxu2  ;;  %530 = vadd.xlane.f32.xlu2 %v529_v50 }
 0x565   :  { %v516_v54 = vadd.f32 %v515_v52, %v491_v51 }
 0x567   :  { %v523_v55 = vadd.f32 %v516_v54, %v2293_v12 }
 0x569   :  { %v527_v56 = vadd.f32 %v525_v47, %v523_v55 }
 0x56b   :  { %v532_v28 = vsel %vm74_vm0, %v527_v56, 0.0 }
 0x56c   :  { %533 = vadd.xlane.f32.xlu0 %v532_v28 }
 0x57d   :  { %v494_v57 = vpop.f32.mrf.mxu3 }
 0x585   :  { %v496_v40 = vpop.f32.mrf.mxu3 }
 0x587   :  { %v518_v58 = vpop.f32.mrf.mxu2 }
 0x588   :  { %v519_v59 = vadd.f32 %v518_v58, %v494_v57 }
 0x58a   :  { %v524_v60 = vadd.f32 %v519_v59, %v2301_v30 }
 0x58c   :  { %v528_v11 = vadd.f32 %v525_v47, %v524_v60 }
 0x58e   :  { %v535_v61 = vsel %vm74_vm0, %v528_v11, 0.0 }
 0x58f   :  { %v520_v62 = vpop.f32.mrf.mxu2  ;;  %536 = vadd.xlane.f32.xlu1 %v535_v61 }
 0x5d7   :  { %v531_v0 = vpop.xlane.xlu2 %530 }
 0x5d8   :  { %v538_v1 = vmul.f32 %v531_v0, %v2260_v22 }
 0x5da   :  { %v541_v2 = vsub.f32 %v526_v49, %v538_v1  ;;  %v599_v49 = vperm.slane %v2309_v33, 3 }
 0x5dc   :  { %v544_v12 = vmul.f32 %v541_v2, %v541_v2 }
 0x5de   :  { %v547_v3 = vsel %vm74_vm0, %v544_v12, 0.0 }
 0x5df   :  { %548 = vadd.xlane.f32.xlu2 %v547_v3  ;;  %v534_v4 = vpop.xlane.xlu0 %533 }
 0x5e0   :  { %v539_v5 = vmul.f32 %v534_v4, %v2260_v22  ;;  %v211_v4 = vld [vmem:[%s2910_s17 + $0x30] sm:$0xff] }
 0x5e2   :  { %v542_v6 = vsub.f32 %v527_v56, %v539_v5  ;;  %v212_v5 = vld [vmem:[%s2910_s17 + $0x38] sm:$0xff] }
 0x5e4   :  { %v545_v7 = vmul.f32 %v542_v6, %v542_v6 }
 0x5e6   :  { %v550_v30 = vsel %vm74_vm0, %v545_v7, 0.0  ;;  %v209_v7 = vld [vmem:[%s2910_s17 + $0x20] sm:$0xff] }
 0x5e7   :  { %551 = vadd.xlane.f32.xlu0 %v550_v30  ;;  %v210_v30 = vld [vmem:[%s2910_s17 + $0x28] sm:$0xff] }
 0x602   :  { %v537_v9 = vpop.xlane.xlu1 %536 }
 0x603   :  { %v540_v10 = vmul.f32 %v537_v9, %v2260_v22  ;;  %v663_v9 = vpack.c.bf16 %v210_v30, %v209_v7 }
 0x605   :  { %v2413_v13 = vsub.f32 %v528_v11, %v540_v10  ;;  %v207_v10 = vld [vmem:[%s2910_s17 + $0x10] sm:$0xff] }
 0x607   :  { %v546_v14 = vmul.f32 %v2413_v13, %v2413_v13 }
 0x609   :  { %v553_v15 = vsel %vm74_vm0, %v546_v14, 0.0 }
 0x60a   :  { %554 = vadd.xlane.f32.xlu1 %v553_v15  ;;  %v607_v15 = vperm.slane %v2309_v33, 4 }
 0x652   :  { %v549_v19 = vpop.xlane.xlu2 %548 }
 0x653   :  { %v556_v20 = vmul.f32 %v549_v19, %v2260_v22 }
 0x655   :  { %v559_v25 = vadd.f32 1e-12, %v556_v20 }
 0x657   :  { %1912 = vrsqrt.f32 %v559_v25  ;;  %vm568_vm4 = vweird.f32 %v559_v25 }
 0x65a   :  { %v552_v26 = vpop.xlane.xlu0 %551 }
 0x65b   :  { %v557_v27 = vmul.f32 %v552_v26, %v2260_v22 }
 0x65d   :  { %v1913_v29 = vpop.eup %1912  ;;  %v560_v31 = vadd.f32 1e-12, %v557_v27 }
 0x65e   :  { %v563_v32 = vmul.f32 %v1913_v29, %v559_v25  ;;  %vm569_vm3 = vweird.f32 %v1913_v29 }
 0x65f   :  { %1914 = vrsqrt.f32 %v560_v31  ;;  %vm570_vm5 = vmor %vm568_vm4, %vm569_vm3  ;;  %vm578_vm7 = vweird.f32 %v560_v31 }
 0x660   :  { %v564_v34 = vmul.f32 %v1913_v29, %v563_v32 }
 0x662   :  { %v565_v35 = vmul.f32 0.5, %v564_v34 }
 0x664   :  { %v566_v36 = vsub.f32 1.5, %v565_v35 }
 0x665   :  { %v1915_v37 = vpop.eup %1914 }
 0x666   :  { %v567_v38 = vmul.f32 %v1913_v29, %v566_v36  ;;  %v573_v39 = vmul.f32 %v1915_v37, %v560_v31  ;;  %vm579_vm6 = vweird.f32 %v1915_v37 }
 0x667   :  { %vm580_vm8 = vmor %vm578_vm7, %vm579_vm6 }
 0x668   :  { %v574_v41 = vmul.f32 %v1915_v37, %v573_v39  ;;  %v571_v42 = vsel %vm570_vm5, %v1913_v29, %v567_v38 }
 0x669   :  { %v592_v46 = vmul.f32 %v571_v42, %v541_v2 }
 0x66a   :  { %v575_v43 = vmul.f32 0.5, %v574_v41 }
 0x66b   :  { %v596_v50 = vmul.f32 %v595_v45, %v592_v46 }
 0x66c   :  { %v576_v44 = vsub.f32 1.5, %v575_v43 }
 0x66d   :  { %v2434_v54 = vadd.f32 %v599_v49, %v596_v50 }
 0x66e   :  { %v577_v47 = vmul.f32 %v1915_v37, %v576_v44 }
 0x670   :  { %v581_v48 = vsel %vm580_vm8, %v1915_v37, %v577_v47 }
 0x671   :  { %v593_v51 = vmul.f32 %v581_v48, %v542_v6  ;;  %v664_v6 = vpack.c.bf16 %v212_v5, %v211_v4 }
 0x673   :  { %v597_v52 = vmul.f32 %v595_v45, %v593_v51  ;;  %677 = vmatpush.bf16.msra.mxu1 %v664_v6 }
 0x675   :  { %v2436_v55 = vadd.f32 %v599_v49, %v597_v52 }
 0x677   :  { %v603_v56 = vpack.c.bf16 %v2436_v55, %v2434_v54  ;;  %678 = vmatpush.bf16.msra.mxu1 %v663_v9 }
 0x679   :  { %1810 = vmatmul.msk.bf16.vlgmr.msra.gmra.mxu0 %vm74_vm0, %v603_v56 }
 0x67d   :  { %v555_v28 = vpop.xlane.xlu1 %554 }
 0x67e   :  { %v558_v57 = vmul.f32 %v555_v28, %v2260_v22 }
 0x680   :  { %v561_v40 = vadd.f32 1e-12, %v558_v57 }
 0x682   :  { %1916 = vrsqrt.f32 %v561_v40  ;;  %vm588_vm10 = vweird.f32 %v561_v40 }
 0x688   :  { %v1917_v58 = vpop.eup %1916 }
 0x689   :  { %v583_v59 = vmul.f32 %v1917_v58, %v561_v40  ;;  %vm589_vm9 = vweird.f32 %v1917_v58 }
 0x68a   :  { %vm590_vm11 = vmor %vm588_vm10, %vm589_vm9 }
 0x68b   :  { %v584_v60 = vmul.f32 %v1917_v58, %v583_v59 }
 0x68d   :  { %v585_v11 = vmul.f32 0.5, %v584_v60 }
 0x68f   :  { %v586_v61 = vsub.f32 1.5, %v585_v11  ;;  %v665_v11 = vperm.slane %v2309_v33, 5 }
 0x691   :  { %v587_v62 = vmul.f32 %v1917_v58, %v586_v61 }
 0x693   :  { %v591_v0 = vsel %vm590_vm11, %v1917_v58, %v587_v62 }
 0x694   :  { %v594_v1 = vmul.f32 %v591_v0, %v2413_v13  ;;  %v208_v13 = vld [vmem:[%s2910_s17 + $0x18] sm:$0xff] }
 0x695   :  { %v662_v14 = vpack.c.bf16 %v208_v13, %v207_v10 }
 0x696   :  { %v598_v2 = vmul.f32 %v595_v45, %v594_v1 }
 0x697   :  { %679 = vmatpush.bf16.msra.mxu1 %v662_v14 }
 0x698   :  { %v2443_v12 = vadd.f32 %v599_v49, %v598_v2 }
 0x69a   :  { %v604_v3 = vpack.c.bf16 %v2443_v12, %v2443_v12 }
 0x69b   :  { %680 = vmatpush.bf16.msra.mxu1 %v661_v18 }
 0x69c   :  { %1811 = vmatmul.msk.bf16.gmra.mxu0 %vm74_vm0, %v604_v3 }
 0x6f6   :  { %v623_v19 = vpop.f32.mrf.mxu0 }
 0x6f7   :  { %v624_v20 = vadd.f32 %v623_v19, %v607_v15 }
 0x6f9   :  { %v632_v21 = vmul.f32 %v624_v20, %v624_v20 }
 0x6fb   :  { %v635_v23 = vmul.f32 %v632_v21, %v624_v20 }
 0x6fd   :  { %v638_v24 = vmul.f32 0.044715, %v635_v23 }
 0x6fe   :  { %v625_v25 = vpop.f32.mrf.mxu0 }
 0x6ff   :  { %v641_v26 = vadd.f32 %v638_v24, %v624_v20  ;;  %v626_v27 = vadd.f32 %v625_v25, %v607_v15 }
 0x701   :  { %v644_v29 = vmul.f32 0.7978846, %v641_v26  ;;  %v633_v31 = vmul.f32 %v626_v27, %v626_v27  ;;  %v1816_v26 = vld [vmem:[%s2907_s14 + $0x30] sm:$0xff] }
 0x703   :  { %v636_v32 = vmul.f32 %v633_v31, %v626_v27  ;;  %1918 = vtanh.f32 %v644_v29 }
 0x705   :  { %v639_v34 = vmul.f32 0.044715, %v636_v32 }
 0x707   :  { %v642_v35 = vadd.f32 %v639_v34, %v626_v27  ;;  %v1814_v34 = vld [vmem:[%s2907_s14 + $0x20] sm:$0xff] }
 0x709   :  { %v645_v36 = vmul.f32 0.7978846, %v642_v35  ;;  %v1919_v37 = vpop.eup %1918  ;;  %v1815_v35 = vld [vmem:[%s2907_s14 + $0x28] sm:$0xff] }
 0x70a   :  { %v650_v38 = vadd.f32 1.0, %v1919_v37 }
 0x70b   :  { %1920 = vtanh.f32 %v645_v36  ;;  %v796_v36 = vpack.c.bf16 %v1815_v35, %v1814_v34 }
 0x70c   :  { %v653_v41 = vmul.f32 0.5, %v650_v38 }
 0x70e   :  { %v656_v44 = vmul.f32 %v653_v41, %v624_v20 }
 0x711   :  { %v1921_v39 = vpop.eup %1920 }
 0x712   :  { %v651_v42 = vadd.f32 1.0, %v1921_v39 }
 0x714   :  { %v654_v43 = vmul.f32 0.5, %v651_v42 }
 0x716   :  { %v657_v45 = vmul.f32 %v654_v43, %v626_v27  ;;  %v1817_v27 = vld [vmem:[%s2907_s14 + $0x38] sm:$0xff] }
 0x717   :  { %v797_v29 = vpack.c.bf16 %v1817_v27, %v1816_v26 }
 0x718   :  { %v659_v46 = vpack.c.bf16 %v657_v45, %v656_v44 }
 0x719   :  { %v628_v47 = vpop.f32.mrf.mxu0  ;;  %811 = vmatpush.bf16.msra.mxu3 %v797_v29 }
 0x71a   :  { %v629_v48 = vadd.f32 %v628_v47, %v607_v15  ;;  %1812 = vmatmul.msk.bf16.vlgmr.msra.gmra.mxu1 %vm666_vm12, %v659_v46 }
 0x71c   :  { %v634_v49 = vmul.f32 %v629_v48, %v629_v48 }
 0x71d   :  { %812 = vmatpush.bf16.msra.mxu3 %v796_v36 }
 0x71e   :  { %v637_v50 = vmul.f32 %v634_v49, %v629_v48 }
 0x720   :  { %v640_v51 = vmul.f32 0.044715, %v637_v50 }
 0x721   :  { %v630_v52 = vpop.f32.mrf.mxu0 }
 0x722   :  { %v643_v56 = vadd.f32 %v640_v51, %v629_v48 }
 0x724   :  { %v646_v28 = vmul.f32 0.7978846, %v643_v56 }
 0x726   :  { %1922 = vtanh.f32 %v646_v28  ;;  %v760_v28 = vperm.slane %v2309_v33, 6 }
 0x72c   :  { %v1923_v57 = vpop.eup %1922 }
 0x72d   :  { %v652_v40 = vadd.f32 1.0, %v1923_v57 }
 0x72f   :  { %v655_v58 = vmul.f32 0.5, %v652_v40 }
 0x731   :  { %v658_v59 = vmul.f32 %v655_v58, %v629_v48 }
 0x733   :  { %v660_v60 = vpack.c.bf16 %v658_v59, %v658_v59 }
 0x735   :  { %1813 = vmatmul.msk.bf16.gmra.mxu1 %vm666_vm12, %v660_v60 }
 0x797   :  { %v682_v61 = vpop.f32.mrf.mxu1 }
 0x798   :  { %v683_v62 = vadd.f32 %v682_v61, %v665_v11  ;;  %v764_v61 = vperm.slane %v2309_v33, 7 }
 0x79a   :  { %v691_v0 = vadd.f32 %v683_v62, %v2434_v54 }
 0x79c   :  { %v694_v1 = vsel %vm74_vm0, %v691_v0, 0.0 }
 0x79d   :  { %695 = vadd.xlane.f32.xlu2 %v694_v1 }
 0x79f   :  { %v684_v2 = vpop.f32.mrf.mxu1 }
 0x7a0   :  { %v685_v3 = vadd.f32 %v684_v2, %v665_v11 }
 0x7a2   :  { %v692_v4 = vadd.f32 %v685_v3, %v2436_v55 }
 0x7a4   :  { %v697_v5 = vsel %vm74_vm0, %v692_v4, 0.0 }
 0x7a5   :  { %698 = vadd.xlane.f32.xlu0 %v697_v5 }
 0x7b2   :  { %v687_v6 = vpop.f32.mrf.mxu1 }
 0x7b3   :  { %v688_v7 = vadd.f32 %v687_v6, %v665_v11 }
 0x7b5   :  { %v693_v30 = vadd.f32 %v688_v7, %v2443_v12 }
 0x7b7   :  { %v700_v9 = vsel %vm74_vm0, %v693_v30, 0.0 }
 0x7b8   :  { %701 = vadd.xlane.f32.xlu1 %v700_v9 }
 0x7ba   :  { %v689_v10 = vpop.f32.mrf.mxu1 }
 0x810   :  { %v696_v13 = vpop.xlane.xlu2 %695 }
 0x811   :  { %v703_v54 = vmul.f32 %v696_v13, %v2260_v22 }
 0x813   :  { %v706_v14 = vsub.f32 %v691_v0, %v703_v54 }
 0x815   :  { %v709_v15 = vmul.f32 %v706_v14, %v706_v14 }
 0x817   :  { %v712_v16 = vsel %vm74_vm0, %v709_v15, 0.0 }
 0x818   :  { %v699_v17 = vpop.xlane.xlu0 %698  ;;  %713 = vadd.xlane.f32.xlu2 %v712_v16 }
 0x819   :  { %v704_v55 = vmul.f32 %v699_v17, %v2260_v22  ;;  %v2525_v17 = vld [vmem:[%s2911_s18 + $0x8] sm:$0xff]  ;;  %s2119_s18 = smov [#allocation2]  }
 0x81b   :  { %v707_v18 = vsub.f32 %v692_v4, %v704_v55  ;;  %v798_v55 = vperm.slane %v2525_v17, 0 }
 0x81d   :  { %v710_v19 = vmul.f32 %v707_v18, %v707_v18 }
 0x81f   :  { %v715_v20 = vsel %vm74_vm0, %v710_v19, 0.0 }
 0x820   :  { %716 = vadd.xlane.f32.xlu0 %v715_v20 }
 0x82b   :  { %v702_v12 = vpop.xlane.xlu1 %701 }
 0x82c   :  { %v705_v21 = vmul.f32 %v702_v12, %v2260_v22 }
 0x82e   :  { %v2487_v23 = vsub.f32 %v693_v30, %v705_v21 }
 0x830   :  { %v711_v24 = vmul.f32 %v2487_v23, %v2487_v23 }
 0x832   :  { %v718_v25 = vsel %vm74_vm0, %v711_v24, 0.0 }
 0x833   :  { %719 = vadd.xlane.f32.xlu1 %v718_v25 }
 0x88b   :  { %v714_v31 = vpop.xlane.xlu2 %713 }
 0x88c   :  { %v721_v32 = vmul.f32 %v714_v31, %v2260_v22 }
 0x88e   :  { %v724_v37 = vadd.f32 1e-12, %v721_v32 }
 0x890   :  { %1924 = vrsqrt.f32 %v724_v37  ;;  %vm733_vm3 = vweird.f32 %v724_v37 }
 0x893   :  { %v717_v38 = vpop.xlane.xlu0 %716 }
 0x894   :  { %v722_v39 = vmul.f32 %v717_v38, %v2260_v22 }
 0x896   :  { %v1925_v41 = vpop.eup %1924  ;;  %v725_v42 = vadd.f32 1e-12, %v722_v39 }
 0x897   :  { %v728_v43 = vmul.f32 %v1925_v41, %v724_v37  ;;  %vm734_vm13 = vweird.f32 %v1925_v41 }
 0x898   :  { %1926 = vrsqrt.f32 %v725_v42  ;;  %vm735_vm4 = vmor %vm733_vm3, %vm734_vm13  ;;  %vm743_vm6 = vweird.f32 %v725_v42 }
 0x899   :  { %v729_v44 = vmul.f32 %v1925_v41, %v728_v43 }
 0x89b   :  { %v730_v45 = vmul.f32 0.5, %v729_v44 }
 0x89d   :  { %v731_v46 = vsub.f32 1.5, %v730_v45 }
 0x89e   :  { %v1927_v47 = vpop.eup %1926 }
 0x89f   :  { %v732_v48 = vmul.f32 %v1925_v41, %v731_v46  ;;  %v738_v49 = vmul.f32 %v1927_v47, %v725_v42  ;;  %vm744_vm5 = vweird.f32 %v1927_v47 }
 0x8a0   :  { %vm745_vm7 = vmor %vm743_vm6, %vm744_vm5 }
 0x8a1   :  { %v739_v50 = vmul.f32 %v1927_v47, %v738_v49  ;;  %v736_v51 = vsel %vm735_vm4, %v1925_v41, %v732_v48 }
 0x8a2   :  { %v757_v57 = vmul.f32 %v736_v51, %v706_v14 }
 0x8a3   :  { %v740_v52 = vmul.f32 0.5, %v739_v50 }
 0x8a4   :  { %v761_v62 = vmul.f32 %v760_v28, %v757_v57 }
 0x8a5   :  { %v741_v56 = vsub.f32 1.5, %v740_v52 }
 0x8a6   :  { %v720_v40 = vpop.xlane.xlu1 %719  ;;  %v2509_v2 = vadd.f32 %v764_v61, %v761_v62 }
 0x8a7   :  { %v742_v58 = vmul.f32 %v1927_v47, %v741_v56  ;;  %v723_v59 = vmul.f32 %v720_v40, %v2260_v22 }
 0x8a9   :  { %v746_v60 = vsel %vm745_vm7, %v1927_v47, %v742_v58  ;;  %v726_v11 = vadd.f32 1e-12, %v723_v59 }
 0x8aa   :  { %v758_v0 = vmul.f32 %v746_v60, %v707_v18 }
 0x8ab   :  { %1928 = vrsqrt.f32 %v726_v11  ;;  %vm753_vm9 = vweird.f32 %v726_v11 }
 0x8ac   :  { %v762_v1 = vmul.f32 %v760_v28, %v758_v0 }
 0x8ae   :  { %v2511_v3 = vadd.f32 %v764_v61, %v762_v1 }
 0x8b0   :  { %v794_v4 = vpack.c.bf16 %v2511_v3, %v2509_v2 }
 0x8b1   :  { %v1929_v5 = vpop.eup %1928 }
 0x8b2   :  { %v748_v6 = vmul.f32 %v1929_v5, %v726_v11  ;;  %1835 = vmatmul.msk.bf16.vlgmr.msra.gmra.mxu3 %vm74_vm0, %v794_v4  ;;  %vm754_vm8 = vweird.f32 %v1929_v5 }
 0x8b3   :  { %vm755_vm10 = vmor %vm753_vm9, %vm754_vm8 }
 0x8b4   :  { %v749_v7 = vmul.f32 %v1929_v5, %v748_v6 }
 0x8b6   :  { %v750_v30 = vmul.f32 0.5, %v749_v7 }
 0x8b8   :  { %v751_v9 = vsub.f32 1.5, %v750_v30 }
 0x8ba   :  { %v752_v33 = vmul.f32 %v1929_v5, %v751_v9 }
 0x8bc   :  { %v756_v10 = vsel %vm755_vm10, %v1929_v5, %v752_v33 }
 0x8bd   :  { %v759_v13 = vmul.f32 %v756_v10, %v2487_v23 }
 0x8bf   :  { %v763_v54 = vmul.f32 %v760_v28, %v759_v13 }
 0x8c1   :  { %v2517_v14 = vadd.f32 %v764_v61, %v763_v54 }
 0x8c3   :  { %v795_v15 = vpack.c.bf16 %v2517_v14, %v2517_v14 }
 0x8c5   :  { %1836 = vmatmul.msk.bf16.gmra.mxu3 %vm74_vm0, %v795_v15 }
 0x935   :  { %v814_v16 = vpop.f32.mrf.mxu3 }
 0x936   :  { %v815_v19 = vadd.f32 %v814_v16, %v798_v55 }
 0x93d   :  { %v816_v18 = vpop.f32.mrf.mxu3 }
 0x93e   :  { %v817_v20 = vadd.f32 %v816_v18, %v798_v55 }
 0x940   :  { %v2528_v12 = vpack.c.bf16 %v817_v20, %v815_v19 }
 0x942   :  { %941 = vrot.lane.b32.xlu1 %v2528_v12, %s2113_s25 }
 0x948   :  { %v819_v21 = vpop.f32.mrf.mxu3 }
 0x949   :  { %v820_v23 = vadd.f32 %v819_v21, %v798_v55 }
 0x94b   :  { %v2532_v24 = vpack.c.bf16 %v820_v23, %v820_v23 }
 0x94d   :  { %829 = vrot.lane.b32.xlu0 %v2532_v24, %s2112_s6  ;;  %943 = vrot.lane.b32.xlu2 %v2532_v24, %s2113_s25 }
 0x950   :  { %v821_v25 = vpop.f32.mrf.mxu3 }
 0x955   :  { %937 = vrot.lane.b32.xlu2 %v2528_v12, %s2114_s26  ;;  %827 = vrot.lane.b32.xlu0 %v2528_v12, %s2112_s6  ;;  %s1737_s6 = sshll.u32 %s2119_s18, 4  ;;  %s1738_s6 = int_to_ptr.vmem [resolvable:$true] %s1737_s6 }
 0x9a7   :  { %v944_v26 = vpop.permute.xlu2 %943 }
 0x9a8   :  { %v955_v27 = vsel %vm251_vm14, %v944_v26, 0 }
 0x9a9   :  { %963 = vmatpush.bf16.xpose.msrb.mxu1 %v955_v27 }
 0x9af   :  { %v938_v32 = vpop.permute.xlu2 %937 }
 0x9b4   :  { %v942_v29 = vpop.permute.xlu1 %941 }
 0x9b5   :  { %v952_v31 = vsel %vm251_vm14, %v942_v29, 0 }
 0x9b6   :  { %964 = vmatpush.bf16.xpose.msrb.mxu1 %v952_v31 }
 0x9bd   :  { %1841 = vmatmul.msk.bf16.vlgmr.msrb.gmra.mxu1 %vm251_vm14, %v938_v32 }
 0x9bf   :  { %v830_v34 = vpop.permute.xlu0 %829 }
 0x9c0   :  { %v841_v35 = vsel %vm251_vm14, %v830_v34, 0 }
 0x9c1   :  { %849 = vmatpush.bf16.xpose.msra.mxu2 %v841_v35 }
 0x9c7   :  { %v828_v36 = vpop.permute.xlu0 %827 }
 0x9c8   :  { %v838_v37 = vsel %vm251_vm14, %v828_v36, 0 }
 0x9c9   :  { %850 = vmatpush.bf16.xpose.msra.mxu2 %v838_v37 }
 0x9d0   :  { %1837 = vmatmul.msk.bf16.vlgmr.msra.gmra.mxu2 %vm251_vm14, %v2528_v12 }
 0x9e0   :  { %1838 = vmatmul.msk.bf16.gmra.mxu2 %vm251_vm14, %v2532_v24 }
 0xa3a   :  { %v966_v38 = vpop.f32.mrf.mxu1 }
 0xa3b   :  { %v975_v39 = vmul.f32 0.25, %v966_v38 }
 0xa3d   :  { %v978_v41 = vadd.f32 %v975_v39, %v2341_v53 }
 0xa3f   :  { %v981_v42 = vsel %vm288_vm15, %v978_v41, -inf }
 0xa40   :  { %982 = vmax.xlane.f32.xlu1 %v981_v42 }
 0xa42   :  { %v968_v43 = vpop.f32.mrf.mxu1 }
 0xa43   :  { %v976_v44 = vmul.f32 0.25, %v968_v43 }
 0xa45   :  { %v979_v45 = vadd.f32 %v976_v44, %v2350_v63 }
 0xa47   :  { %v984_v46 = vsel %vm288_vm15, %v979_v45, -inf }
 0xa48   :  { %985 = vmax.xlane.f32.xlu0 %v984_v46 }
 0xa53   :  { %v852_v47 = vpop.f32.mrf.mxu2 }
 0xa54   :  { %v861_v48 = vmul.f32 0.25, %v852_v47 }
 0xa56   :  { %v864_v49 = vadd.f32 %v861_v48, %v2341_v53 }
 0xa58   :  { %v867_v50 = vsel %vm288_vm15, %v864_v49, -inf }
 0xa59   :  { %868 = vmax.xlane.f32.xlu2 %v867_v50 }
 0xa5b   :  { %v854_v51 = vpop.f32.mrf.mxu2 }
 0xa5c   :  { %v862_v52 = vmul.f32 0.25, %v854_v51  ;;  %1016 = vrot.lane.b32.xlu0 %v2528_v12, %s2116_s0  ;;  %v1820_v51 = vld [vmem:[%s2908_s15 + $0x30] sm:$0xff] }
 0xa5e   :  { %v865_v56 = vadd.f32 %v862_v52, %v2350_v63  ;;  %v1821_v52 = vld [vmem:[%s2908_s15 + $0x38] sm:$0xff] }
 0xa60   :  { %v870_v28 = vsel %vm288_vm15, %v865_v56, -inf }
 0xa61   :  { %871 = vmax.xlane.f32.xlu1 %v870_v28 }
 0xa63   :  { %v857_v57 = vpop.f32.mrf.mxu2 }
 0xa64   :  { %v863_v58 = vmul.f32 0.25, %v857_v57 }
 0xa66   :  { %v866_v53 = vadd.f32 %v863_v58, %v2359_v8  ;;  %v1819_v58 = vld [vmem:[%s2908_s15 + $0x28] sm:$0xff] }
 0xa68   :  { %v873_v59 = vsel %vm288_vm15, %v866_v53, -inf }
 0xa6b   :  { %v859_v40 = vpop.f32.mrf.mxu2 }
 0xa6c   :  { %v1818_v40 = vld [vmem:[%s2908_s15 + $0x20] sm:$0xff]  ;;  %s2929_s15 = sld [smem:[#allocation15_spill]] }
 0xa7a   :  { %1018 = vrot.lane.b32.xlu1 %v2532_v24, %s2116_s0 }
 0xaa4   :  { %874 = vmax.xlane.f32.xlu1 %v873_v59 }
 0xab3   :  { %v983_v60 = vpop.xlane.xlu1 %982 }
 0xab4   :  { %v990_v11 = vsub.f32 %v978_v41, %v983_v60  ;;  %v936_v60 = vpack.c.bf16 %v1819_v58, %v1818_v40 }
 0xab6   :  { %v993_v61 = vmul.f32 1.442695, %v990_v11 }
 0xab8   :  { %1930 = vpow2.f32 %v993_v61 }
 0xabb   :  { %v986_v0 = vpop.xlane.xlu0 %985 }
 0xabc   :  { %v991_v5 = vsub.f32 %v979_v45, %v986_v0 }
 0xabe   :  { %v1931_v62 = vpop.eup %1930  ;;  %v995_v7 = vmul.f32 1.442695, %v991_v5 }
 0xabf   :  { %v999_v63 = vsel %vm288_vm15, %v1931_v62, 0.0 }
 0xac0   :  { %1000 = vadd.xlane.f32.xlu0 %v999_v63 }
 0xacc   :  { %v869_v1 = vpop.xlane.xlu2 %868 }
 0xacd   :  { %v876_v4 = vsub.f32 %v864_v49, %v869_v1 }
 0xace   :  { %v1017_v19 = vpop.permute.xlu0 %1016 }
 0xacf   :  { %v879_v6 = vmul.f32 1.442695, %v876_v4 }
 0xad1   :  { %1932 = vpow2.f32 %v879_v6 }
 0xad2   :  { %1934 = vpow2.f32 %v995_v7 }
 0xad4   :  { %v872_v30 = vpop.xlane.xlu1 %871  ;;  %902 = vrot.lane.b32.xlu0 %v2528_v12, %s2115_s4 }
 0xad5   :  { %v877_v9 = vsub.f32 %v865_v56, %v872_v30  ;;  %v1050_v56 = vpack.c.bf16 %v1821_v52, %v1820_v51 }
 0xad7   :  { %v1933_v8 = vpop.eup %1932  ;;  %v881_v10 = vmul.f32 1.442695, %v877_v9  ;;  %1064 = vmatpush.bf16.msrb.mxu2 %v1050_v56  ;;  %v1822_v56 = vld [vmem:[%s2909_s16 + $0x20] sm:$0xff] }
 0xad8   :  { %v885_v33 = vsel %vm288_vm15, %v1933_v8, 0.0  ;;  %v1935_v13 = vpop.eup %1934 }
 0xad9   :  { %886 = vadd.xlane.f32.xlu2 %v885_v33  ;;  %1936 = vpow2.f32 %v881_v10  ;;  %v1002_v54 = vsel %vm288_vm15, %v1935_v13, 0.0 }
 0xadc   :  { %939 = vrot.lane.b32.xlu0 %v2532_v24, %s2114_s26  ;;  %s1739_s26 = sshll.u32 %s2912_s19, 4  ;;  %s2121_s19 = smov [#allocation4]   ;;  %s1740_s26 = int_to_ptr.hbm [resolvable:$true] %s1739_s26 }
 0xadf   :  { %v1937_v15 = vpop.eup %1936 }
 0xae0   :  { %v888_v16 = vsel %vm288_vm15, %v1937_v15, 0.0 }
 0xae1   :  { %1003 = vadd.xlane.f32.xlu2 %v1002_v54 }
 0xae9   :  { %889 = vadd.xlane.f32.xlu2 %v888_v16 }
 0xaec   :  { %v1019_v55 = vpop.permute.xlu1 %1018 }
 0xaed   :  { %v1028_v18 = vsel %vm335_vm2, %v1019_v55, 0  ;;  %v2603_v55 = vperm.slane %v2525_v17, 1 }
 0xaee   :  { %1036 = vmatpush.bf16.msrb.mxu3 %v1028_v18 }
 0xaf2   :  { %1037 = vmatpush.bf16.msrb.mxu3 %v1017_v19 }
 0xb01   :  { %904 = vrot.lane.b32.xlu2 %v2532_v24, %s2115_s4  ;;  %s1748_s4 = sshll.u32 %s2121_s19, 4  ;;  %s1749_s4 = int_to_ptr.vmem [resolvable:$true] %s1748_s4 }
 0xb17   :  { %v875_v20 = vpop.xlane.xlu1 %874 }
 0xb18   :  { %v878_v12 = vsub.f32 %v866_v53, %v875_v20  ;;  %v2006_v53 = vld [vmem:[%s2928_s27 + $0x10] sm:$0xff]  ;;  %s1772_s27 = sshll.u32 %s2915_s22, 4  ;;  %s1773_s27 = int_to_ptr.hbm [resolvable:$true] %s1772_s27 }
 0xb1a   :  { %v883_v21 = vmul.f32 1.442695, %v878_v12 }
 0xb1c   :  { %1938 = vpow2.f32 %v883_v21 }
 0xb22   :  { %v1939_v23 = vpop.eup %1938 }
 0xb23   :  { %v891_v25 = vsel %vm288_vm15, %v1939_v23, 0.0 }
 0xb24   :  { %892 = vadd.xlane.f32.xlu0 %v891_v25 }
 0xb33   :  { %v1001_v26 = vpop.xlane.xlu0 %1000 }
 0xb34   :  { %1940 = vrcp.f32 %v1001_v26 }
 0xb3a   :  { %v1941_v34 = vpop.eup %1940 }
 0xb3b   :  { %v1011_v24 = vmul.f32 %v1941_v34, %v1931_v62 }
 0xb46   :  { %v903_v27 = vpop.permute.xlu0 %902 }
 0xb4c   :  { %v887_v29 = vpop.xlane.xlu2 %886 }
 0xb4e   :  { %v940_v31 = vpop.permute.xlu0 %939 }
 0xb4f   :  { %1842 = vmatmul.msk.bf16.gmra.mxu1 %vm251_vm14, %v940_v31 }
 0xb54   :  { %v1004_v32 = vpop.xlane.xlu2 %1003 }
 0xb55   :  { %1942 = vrcp.f32 %v1004_v32 }
 0xb5b   :  { %v1943_v35 = vpop.eup %1942 }
 0xb5c   :  { %v1012_v36 = vmul.f32 %v1943_v35, %v1935_v13  ;;  %v890_v37 = vpop.xlane.xlu2 %889 }
 0xb5d   :  { %1944 = vrcp.f32 %v890_v37 }
 0xb5e   :  { %v1014_v38 = vpack.c.bf16 %v1012_v36, %v1011_v24  ;;  %1946 = vrcp.f32 %v887_v29 }
 0xb60   :  { %1843 = vmatmul.msk.bf16.vlgmr.msrb.gmra.mxu3 %vm288_vm15, %v1014_v38 }
 0xb63   :  { %v1945_v39 = vpop.eup %1944 }
 0xb64   :  { %v905_v41 = vpop.permute.xlu2 %904  ;;  %v1947_v43 = vpop.eup %1946  ;;  %v898_v44 = vmul.f32 %v1945_v39, %v1937_v15 }
 0xb65   :  { %v914_v42 = vsel %vm335_vm2, %v905_v41, 0  ;;  %v897_v45 = vmul.f32 %v1947_v43, %v1933_v8 }
 0xb66   :  { %922 = vmatpush.bf16.msrb.mxu0 %v914_v42 }
 0xb67   :  { %v900_v46 = vpack.c.bf16 %v898_v44, %v897_v45 }
 0xb6a   :  { %923 = vmatpush.bf16.msrb.mxu0 %v903_v27 }
 0xb6d   :  { %1839 = vmatmul.msk.bf16.vlgmr.msrb.gmra.mxu0 %vm288_vm15, %v900_v46 }
 0xb6e   :  { %1088 = vmatpush.bf16.msra.mxu0 %v936_v60 }
 0xb97   :  { %v893_v47 = vpop.xlane.xlu0 %892 }
 0xb98   :  { %1948 = vrcp.f32 %v893_v47 }
 0xb9e   :  { %v1949_v48 = vpop.eup %1948 }
 0xb9f   :  { %v899_v49 = vmul.f32 %v1949_v48, %v1939_v23  ;;  %v1824_v48 = vld [vmem:[%s2909_s16 + $0x30] sm:$0xff] }
 0xba1   :  { %v901_v50 = vpack.c.bf16 %v899_v49, %v899_v49  ;;  %v1825_v49 = vld [vmem:[%s2909_s16 + $0x38] sm:$0xff] }
 0xba3   :  { %1840 = vmatmul.msk.bf16.gmra.mxu0 %vm288_vm15, %v901_v50  ;;  %v1183_v50 = vpack.c.bf16 %v1825_v49, %v1824_v48 }
 0xba5   :  { %1197 = vmatpush.bf16.msra.mxu1 %v1183_v50 }
 0xbcc   :  { %v971_v28 = vpop.f32.mrf.mxu1 }
 0xbcd   :  { %v977_v57 = vmul.f32 0.25, %v971_v28  ;;  %v1823_v28 = vld [vmem:[%s2909_s16 + $0x28] sm:$0xff] }
 0xbcf   :  { %v980_v59 = vadd.f32 %v2006_v53, %v977_v57  ;;  %v1182_v57 = vpack.c.bf16 %v1823_v28, %v1822_v56 }
 0xbd1   :  { %v987_v11 = vsel %vm288_vm15, %v980_v59, -inf  ;;  %1198 = vmatpush.bf16.msra.mxu1 %v1182_v57 }
 0xbd2   :  { %988 = vmax.xlane.f32.xlu2 %v987_v11 }
 0xbd4   :  { %v973_v61 = vpop.f32.mrf.mxu1 }
 0xbe3   :  { %v1039_v62 = vpop.f32.mrf.mxu3 }
 0xbea   :  { %v925_v63 = vpop.f32.mrf.mxu0 }
 0xbeb   :  { %v1041_v0 = vpop.f32.mrf.mxu3 }
 0xbec   :  { %v1048_v1 = vpack.c.bf16 %v1041_v0, %v1039_v62 }
 0xbee   :  { %1845 = vmatmul.msk.bf16.vlgmr.msrb.gmra.mxu2 %vm251_vm14, %v1048_v1 }
 0xbf2   :  { %v927_v4 = vpop.f32.mrf.mxu0 }
 0xbf3   :  { %v934_v5 = vpack.c.bf16 %v927_v4, %v925_v63 }
 0xbf5   :  { %1847 = vmatmul.msk.bf16.vlgmr.msra.gmra.mxu0 %vm251_vm14, %v934_v5 }
 0xc20   :  { %v930_v6 = vpop.f32.mrf.mxu0 }
 0xc21   :  { %v935_v7 = vpack.c.bf16 %v930_v6, %v930_v6 }
 0xc23   :  { %1848 = vmatmul.msk.bf16.gmra.mxu0 %vm251_vm14, %v935_v7 }
 0xc28   :  { %v932_v30 = vpop.f32.mrf.mxu0 }
 0xc45   :  { %v989_v8 = vpop.xlane.xlu2 %988 }
 0xc46   :  { %v992_v9 = vsub.f32 %v980_v59, %v989_v8  ;;  %v2634_v8 = vperm.slane %v2525_v17, 2 }
 0xc48   :  { %v997_v33 = vmul.f32 1.442695, %v992_v9 }
 0xc4a   :  { %1950 = vpow2.f32 %v997_v33 }
 0xc50   :  { %v1951_v10 = vpop.eup %1950 }
 0xc51   :  { %v1005_v13 = vsel %vm288_vm15, %v1951_v10, 0.0 }
 0xc52   :  { %1006 = vadd.xlane.f32.xlu0 %v1005_v13  ;;  %v2637_v13 = vperm.slane %v2525_v17, 3 }
 0xc71   :  { %v1066_v54 = vpop.f32.mrf.mxu2 }
 0xc72   :  { %v1090_v15 = vpop.f32.mrf.mxu0 }
 0xc73   :  { %v1091_v16 = vadd.f32 %v1090_v15, %v1066_v54 }
 0xc75   :  { %v1099_v18 = vadd.f32 %v1091_v16, %v2509_v2 }
 0xc77   :  { %v1103_v19 = vadd.f32 %v2603_v55, %v1099_v18 }
 0xc79   :  { %v1068_v20 = vpop.f32.mrf.mxu2  ;;  %v1106_v12 = vsel %vm74_vm0, %v1103_v19, 0.0 }
 0xc7a   :  { %v1092_v21 = vpop.f32.mrf.mxu0  ;;  %1107 = vadd.xlane.f32.xlu1 %v1106_v12 }
 0xc7b   :  { %v1093_v23 = vadd.f32 %v1092_v21, %v1068_v20 }
 0xc7d   :  { %v1100_v25 = vadd.f32 %v1093_v23, %v2511_v3 }
 0xc7f   :  { %v1104_v26 = vadd.f32 %v2603_v55, %v1100_v25 }
 0xc81   :  { %v1109_v27 = vsel %vm74_vm0, %v1104_v26, 0.0 }
 0xc82   :  { %1110 = vadd.xlane.f32.xlu1 %v1109_v27 }
 0xca0   :  { %v2611_v29 = vpop.f32.mrf.mxu0 }
 0xca8   :  { %v1097_v31 = vpop.f32.mrf.mxu0 }
 0xca9   :  { %v1832_v31 = vld [vmem:[%s2910_s17 + $0x70] sm:$0xff] }
 0xcc5   :  { %v1007_v32 = vpop.xlane.xlu0 %1006 }
 0xcc6   :  { %1952 = vrcp.f32 %v1007_v32  ;;  %v1833_v32 = vld [vmem:[%s2910_s17 + $0x78] sm:$0xff] }
 0xccc   :  { %v1953_v2 = vpop.eup %1952 }
 0xccd   :  { %v1013_v34 = vmul.f32 %v1953_v2, %v1951_v10  ;;  %v1241_v2 = vpack.c.bf16 %v1833_v32, %v1832_v31 }
 0xccf   :  { %v1015_v35 = vpack.c.bf16 %v1013_v34, %v1013_v34  ;;  %1253 = vmatpush.bf16.msra.mxu3 %v1241_v2  ;;  %v1828_v34 = vld [vmem:[%s2910_s17 + $0x50] sm:$0xff] }
 0xcd1   :  { %1844 = vmatmul.msk.bf16.gmra.mxu3 %vm288_vm15, %v1015_v35  ;;  %v1829_v35 = vld [vmem:[%s2910_s17 + $0x58] sm:$0xff] }
 0xced   :  { %v1108_v24 = vpop.xlane.xlu1 %1107 }
 0xcee   :  { %v1115_v36 = vmul.f32 %v1108_v24, %v2260_v22  ;;  %v1239_v24 = vpack.c.bf16 %v1829_v35, %v1828_v34 }
 0xcf0   :  { %v1118_v37 = vsub.f32 %v1103_v19, %v1115_v36  ;;  %v2673_v36 = vperm.slane %v2525_v17, 4 }
 0xcf2   :  { %v1121_v3 = vmul.f32 %v1118_v37, %v1118_v37 }
 0xcf4   :  { %v1124_v38 = vsel %vm74_vm0, %v1121_v3, 0.0  ;;  %v1827_v3 = vld [vmem:[%s2910_s17 + $0x48] sm:$0xff] }
 0xcf5   :  { %1125 = vadd.xlane.f32.xlu1 %v1124_v38  ;;  %v1111_v39 = vpop.xlane.xlu1 %1110 }
 0xcf6   :  { %v1116_v41 = vmul.f32 %v1111_v39, %v2260_v22 }
 0xcf8   :  { %v1119_v42 = vsub.f32 %v1104_v26, %v1116_v41 }
 0xcfa   :  { %v1122_v43 = vmul.f32 %v1119_v42, %v1119_v42 }
 0xcfc   :  { %v1127_v44 = vsel %vm74_vm0, %v1122_v43, 0.0 }
 0xcfd   :  { %1128 = vadd.xlane.f32.xlu2 %v1127_v44 }
 0xd54   :  { %v1044_v45 = vpop.f32.mrf.mxu3 }
 0xd55   :  { %v1049_v46 = vpack.c.bf16 %v1044_v45, %v1044_v45 }
 0xd57   :  { %1846 = vmatmul.msk.bf16.gmra.mxu2 %vm251_vm14, %v1049_v46 }
 0xd5c   :  { %v1046_v47 = vpop.f32.mrf.mxu3 }
 0xd68   :  { %v1126_v51 = vpop.xlane.xlu1 %1125 }
 0xd69   :  { %v1133_v52 = vmul.f32 %v1126_v51, %v2260_v22 }
 0xd6b   :  { %v1136_v40 = vadd.f32 1e-12, %v1133_v52 }
 0xd6d   :  { %1954 = vrsqrt.f32 %v1136_v40  ;;  %vm1145_vm2 = vweird.f32 %v1136_v40 }
 0xd70   :  { %v1129_v58 = vpop.xlane.xlu2 %1128 }
 0xd71   :  { %v1134_v53 = vmul.f32 %v1129_v58, %v2260_v22 }
 0xd73   :  { %v1955_v59 = vpop.eup %1954  ;;  %v1137_v60 = vadd.f32 1e-12, %v1134_v53 }
 0xd74   :  { %v1140_v11 = vmul.f32 %v1955_v59, %v1136_v40  ;;  %vm1146_vm15 = vweird.f32 %v1955_v59 }
 0xd75   :  { %1956 = vrsqrt.f32 %v1137_v60  ;;  %vm1147_vm11 = vmor %vm1145_vm2, %vm1146_vm15  ;;  %vm1155_vm3 = vweird.f32 %v1137_v60 }
 0xd76   :  { %v1141_v61 = vmul.f32 %v1955_v59, %v1140_v11 }
 0xd78   :  { %v1142_v62 = vmul.f32 0.5, %v1141_v61 }
 0xd7a   :  { %v1143_v63 = vsub.f32 1.5, %v1142_v62 }
 0xd7b   :  { %v1957_v0 = vpop.eup %1956 }
 0xd7c   :  { %v1144_v1 = vmul.f32 %v1955_v59, %v1143_v63  ;;  %v1150_v4 = vmul.f32 %v1957_v0, %v1137_v60  ;;  %vm1156_vm13 = vweird.f32 %v1957_v0 }
 0xd7d   :  { %vm1157_vm4 = vmor %vm1155_vm3, %vm1156_vm13  ;;  %vm1398_vm13 = vcmask 9216  }
 0xd7e   :  { %v1151_v5 = vmul.f32 %v1957_v0, %v1150_v4  ;;  %v1148_v6 = vsel %vm1147_vm11, %v1955_v59, %v1144_v1  ;;  %vm1347_vm11 = vcmask 1040384  }
 0xd7f   :  { %v1169_v9 = vmul.f32 %v1148_v6, %v1118_v37  ;;  %v1826_v37 = vld [vmem:[%s2910_s17 + $0x40] sm:$0xff] }
 0xd80   :  { %v1152_v7 = vmul.f32 0.5, %v1151_v5  ;;  %v1238_v38 = vpack.c.bf16 %v1827_v3, %v1826_v37  ;;  %v2687_v5 = vperm.slane %v2525_v17, 5 }
 0xd81   :  { %v1173_v54 = vmul.f32 %v2634_v8, %v1169_v9 }
 0xd82   :  { %v1153_v30 = vsub.f32 1.5, %v1152_v7 }
 0xd83   :  { %v2642_v18 = vadd.f32 %v2637_v13, %v1173_v54 }
 0xd84   :  { %v1154_v33 = vmul.f32 %v1957_v0, %v1153_v30 }
 0xd86   :  { %v1158_v10 = vsel %vm1157_vm4, %v1957_v0, %v1154_v33 }
 0xd87   :  { %v1170_v15 = vmul.f32 %v1158_v10, %v1119_v42 }
 0xd89   :  { %v1174_v16 = vmul.f32 %v2634_v8, %v1170_v15 }
 0xd8b   :  { %v2645_v19 = vadd.f32 %v2637_v13, %v1174_v16 }
 0xd8d   :  { %v1180_v20 = vpack.c.bf16 %v2645_v19, %v2642_v18 }
 0xd8f   :  { %1849 = vmatmul.msk.bf16.vlgmr.msra.gmra.mxu1 %vm74_vm0, %v1180_v20 }
 0xdda   :  { %v1071_v12 = vpop.f32.mrf.mxu2 }
 0xddb   :  { %v1096_v21 = vadd.f32 %v2611_v29, %v1071_v12 }
 0xddd   :  { %v1101_v23 = vadd.f32 %v1096_v21, %v2517_v14  ;;  %v1830_v14 = vld [vmem:[%s2910_s17 + $0x60] sm:$0xff] }
 0xddf   :  { %v1105_v25 = vadd.f32 %v2603_v55, %v1101_v23  ;;  %v1831_v55 = vld [vmem:[%s2910_s17 + $0x68] sm:$0xff] }
 0xde0   :  { %v1240_v29 = vpack.c.bf16 %v1831_v55, %v1830_v14 }
 0xde1   :  { %v1112_v26 = vsel %vm74_vm0, %v1105_v25, 0.0 }
 0xde2   :  { %1113 = vadd.xlane.f32.xlu0 %v1112_v26  ;;  %v1073_v27 = vpop.f32.mrf.mxu2  ;;  %1254 = vmatpush.bf16.msra.mxu3 %v1240_v29 }
 0xde6   :  { %1255 = vmatpush.bf16.msra.mxu3 %v1239_v24 }
 0xdea   :  { %1256 = vmatpush.bf16.msra.mxu3 %v1238_v38 }
 0xe0c   :  { %v1200_v39 = vpop.f32.mrf.mxu1 }
 0xe0d   :  { %v1201_v41 = vadd.f32 %v1200_v39, %v2673_v36 }
 0xe0f   :  { %v1209_v42 = vmul.f32 %v1201_v41, %v1201_v41 }
 0xe11   :  { %v1212_v43 = vmul.f32 %v1209_v42, %v1201_v41 }
 0xe13   :  { %v1215_v44 = vmul.f32 0.044715, %v1212_v43 }
 0xe14   :  { %v1202_v45 = vpop.f32.mrf.mxu1 }
 0xe15   :  { %v1218_v46 = vadd.f32 %v1215_v44, %v1201_v41  ;;  %v1203_v47 = vadd.f32 %v1202_v45, %v2673_v36 }
 0xe17   :  { %v1221_v48 = vmul.f32 0.7978846, %v1218_v46  ;;  %v1210_v49 = vmul.f32 %v1203_v47, %v1203_v47 }
 0xe19   :  { %v1213_v50 = vmul.f32 %v1210_v49, %v1203_v47  ;;  %1958 = vtanh.f32 %v1221_v48 }
 0xe1b   :  { %v1216_v51 = vmul.f32 0.044715, %v1213_v50 }
 0xe1d   :  { %v1219_v52 = vadd.f32 %v1216_v51, %v1203_v47 }
 0xe1f   :  { %v1222_v56 = vmul.f32 0.7978846, %v1219_v52  ;;  %v1959_v28 = vpop.eup %1958 }
 0xe20   :  { %v1227_v57 = vadd.f32 1.0, %v1959_v28  ;;  %v1351_v28 = vld [vmem:[%s2902_s9 + $0x10] sm:$0xff] }
 0xe21   :  { %1960 = vtanh.f32 %v1222_v56 }
 0xe22   :  { %v1230_v58 = vmul.f32 0.5, %v1227_v57 }
 0xe24   :  { %v1233_v60 = vmul.f32 %v1230_v58, %v1201_v41 }
 0xe27   :  { %v1961_v40 = vpop.eup %1960 }
 0xe28   :  { %v1228_v53 = vadd.f32 1.0, %v1961_v40 }
 0xe2a   :  { %v1231_v59 = vmul.f32 0.5, %v1228_v53  ;;  %v1349_v53 = vld [vmem:[%s2902_s9] sm:$0xff] }
 0xe2c   :  { %v1234_v11 = vmul.f32 %v1231_v59, %v1203_v47  ;;  %v1350_v59 = vld [vmem:[%s2902_s9 + $0x8] sm:$0xff] }
 0xe2e   :  { %v1236_v61 = vpack.c.bf16 %v1234_v11, %v1233_v60  ;;  %v1354_v60 = vpack.c.bf16 %v1350_v59, %v1349_v53 }
 0xe30   :  { %1851 = vmatmul.msk.bf16.vlgmr.msra.gmra.mxu3 %vm666_vm12, %v1236_v61 }
 0xe55   :  { %v1114_v62 = vpop.xlane.xlu0 %1113 }
 0xe56   :  { %v1117_v63 = vmul.f32 %v1114_v62, %v2260_v22  ;;  %v1402_v62 = vld [vmem:[%s2904_s11 + $0x10] sm:$0xff] }
 0xe58   :  { %v1120_v0 = vsub.f32 %v1105_v25, %v1117_v63  ;;  %v1403_v63 = vld [vmem:[%s2904_s11 + $0x18] sm:$0xff] }
 0xe5a   :  { %v1123_v1 = vmul.f32 %v1120_v0, %v1120_v0 }
 0xe5c   :  { %v1130_v4 = vsel %vm74_vm0, %v1123_v1, 0.0 }
 0xe5d   :  { %1131 = vadd.xlane.f32.xlu1 %v1130_v4 }
 0xeb3   :  { %v1258_v6 = vpop.f32.mrf.mxu3 }
 0xeb4   :  { %v1259_v7 = vadd.f32 %v1258_v6, %v2687_v5  ;;  %v1406_v6 = vpack.c.bf16 %v1403_v63, %v1402_v62 }
 0xeb6   :  { %v1267_v30 = vadd.f32 %v1259_v7, %v2642_v18  ;;  %v1401_v7 = vld [vmem:[%s2904_s11 + $0x8] sm:$0xff] }
 0xeb8   :  { %v1270_v9 = vsel %vm74_vm0, %v1267_v30, 0.0 }
 0xeb9   :  { %1271 = vadd.xlane.f32.xlu0 %v1270_v9 }
 0xebb   :  { %v1260_v33 = vpop.f32.mrf.mxu3 }
 0xebc   :  { %v1261_v10 = vadd.f32 %v1260_v33, %v2687_v5 }
 0xebe   :  { %v1268_v54 = vadd.f32 %v1261_v10, %v2645_v19 }
 0xec0   :  { %v1273_v15 = vsel %vm74_vm0, %v1268_v54, 0.0 }
 0xec1   :  { %1274 = vadd.xlane.f32.xlu2 %v1273_v15 }
 0xed0   :  { %v1132_v16 = vpop.xlane.xlu1 %1131 }
 0xed1   :  { %v1135_v20 = vmul.f32 %v1132_v16, %v2260_v22 }
 0xed3   :  { %v1138_v12 = vadd.f32 1e-12, %v1135_v20 }
 0xed5   :  { %1962 = vrsqrt.f32 %v1138_v12  ;;  %vm1165_vm6 = vweird.f32 %v1138_v12 }
 0xedb   :  { %v1963_v21 = vpop.eup %1962 }
 0xedc   :  { %v1160_v23 = vmul.f32 %v1963_v21, %v1138_v12  ;;  %vm1166_vm5 = vweird.f32 %v1963_v21 }
 0xedd   :  { %vm1167_vm7 = vmor %vm1165_vm6, %vm1166_vm5 }
 0xede   :  { %v1161_v25 = vmul.f32 %v1963_v21, %v1160_v23 }
 0xee0   :  { %v1162_v18 = vmul.f32 0.5, %v1161_v25 }
 0xee2   :  { %v1163_v26 = vsub.f32 1.5, %v1162_v18 }
 0xee4   :  { %v1164_v27 = vmul.f32 %v1963_v21, %v1163_v26  ;;  %v2744_v26 = vperm.slane %v2525_v17, 6 }
 0xee6   :  { %v1168_v31 = vsel %vm1167_vm7, %v1963_v21, %v1164_v27 }
 0xee7   :  { %v1171_v32 = vmul.f32 %v1168_v31, %v1120_v0  ;;  %v1400_v0 = vld [vmem:[%s2904_s11] sm:$0xff]  ;;  %s1759_s11 = sshll.u32 %s2122_s5, 4  ;;  %s1760_s11 = int_to_ptr.vmem [resolvable:$true] %s1759_s11 }
 0xee8   :  { %v1405_v9 = vpack.c.bf16 %v1401_v7, %v1400_v0 }
 0xee9   :  { %v1175_v19 = vmul.f32 %v2634_v8, %v1171_v32 }
 0xeeb   :  { %v2698_v2 = vadd.f32 %v2637_v13, %v1175_v19  ;;  %v2749_v19 = vperm.slane %v2525_v17, 7 }
 0xeed   :  { %v1181_v14 = vpack.c.bf16 %v2698_v2, %v2698_v2 }
 0xeef   :  { %1850 = vmatmul.msk.bf16.gmra.mxu1 %vm74_vm0, %v1181_v14 }
 0xf2c   :  { %v1272_v55 = vpop.xlane.xlu0 %1271 }
 0xf2d   :  { %v1279_v29 = vmul.f32 %v1272_v55, %v2260_v22 }
 0xf2f   :  { %v2704_v34 = vsub.f32 %v1267_v30, %v1279_v29 }
 0xf31   :  { %v1285_v35 = vmul.f32 %v2704_v34, %v2704_v34 }
 0xf33   :  { %v1288_v24 = vsel %vm74_vm0, %v1285_v35, 0.0 }
 0xf34   :  { %v1275_v37 = vpop.xlane.xlu2 %1274  ;;  %1289 = vadd.xlane.f32.xlu2 %v1288_v24 }
 0xf35   :  { %v1280_v8 = vmul.f32 %v1275_v37, %v2260_v22 }
 0xf37   :  { %v2710_v13 = vsub.f32 %v1268_v54, %v1280_v8 }
 0xf39   :  { %v1286_v3 = vmul.f32 %v2710_v13, %v2710_v13 }
 0xf3b   :  { %v1291_v38 = vsel %vm74_vm0, %v1286_v3, 0.0 }
 0xf3c   :  { %1292 = vadd.xlane.f32.xlu1 %v1291_v38 }
 0xf6c   :  { %v1205_v39 = vpop.f32.mrf.mxu1 }
 0xf6d   :  { %v1206_v41 = vadd.f32 %v1205_v39, %v2673_v36  ;;  %v1352_v36 = vld [vmem:[%s2902_s9 + $0x18] sm:$0xff]  ;;  %s1750_s9 = sshll.u32 %s2913_s20, 4  ;;  %s2123_s20 = smov [#allocation7]   ;;  %s1751_s9 = int_to_ptr.hbm [resolvable:$true] %s1750_s9 }
 0xf6e   :  { %v1355_v40 = vpack.c.bf16 %v1352_v36, %v1351_v28 }
 0xf6f   :  { %v1211_v42 = vmul.f32 %v1206_v41, %v1206_v41 }
 0xf70   :  { %1366 = vmatpush.bf16.msra.mxu2 %v1355_v40 }
 0xf71   :  { %v1214_v43 = vmul.f32 %v1211_v42, %v1206_v41  ;;  %v1377_v42 = vld [vmem:[%s2903_s10 + $0x18] sm:$0xff] }
 0xf73   :  { %v1217_v44 = vmul.f32 0.044715, %v1214_v43 }
 0xf74   :  { %v1207_v45 = vpop.f32.mrf.mxu1  ;;  %1367 = vmatpush.bf16.msra.mxu2 %v1354_v60 }
 0xf75   :  { %v1220_v46 = vadd.f32 %v1217_v44, %v1206_v41  ;;  %v2007_v45 = vld [vmem:[%s2900_s7] sm:$0xff] }
 0xf77   :  { %v1223_v47 = vmul.f32 0.7978846, %v1220_v46  ;;  %v1356_v46 = vperm.slane %v2007_v45, 5 }
 0xf78   :  { %1417 = vmatpush.bf16.msrb.mxu2 %v1406_v6 }
 0xf79   :  { %1964 = vtanh.f32 %v1223_v47 }
 0xf7c   :  { %1418 = vmatpush.bf16.msrb.mxu2 %v1405_v9 }
 0xf7f   :  { %v1965_v48 = vpop.eup %1964 }
 0xf80   :  { %v1229_v49 = vadd.f32 1.0, %v1965_v48 }
 0xf82   :  { %v1232_v50 = vmul.f32 0.5, %v1229_v49 }
 0xf84   :  { %v1235_v51 = vmul.f32 %v1232_v50, %v1206_v41  ;;  %v1376_v41 = vld [vmem:[%s2903_s10 + $0x10] sm:$0xff] }
 0xf85   :  { %v1380_v43 = vpack.c.bf16 %v1377_v42, %v1376_v41 }
 0xf86   :  { %v1237_v52 = vpack.c.bf16 %v1235_v51, %v1235_v51 }
 0xf87   :  { %1391 = vmatpush.bf16.msrb.mxu0 %v1380_v43 }
 0xf88   :  { %1852 = vmatmul.msk.bf16.gmra.mxu3 %vm666_vm12, %v1237_v52  ;;  %v1407_v52 = vperm.slane %v2007_v45, 7 }
 0xfa7   :  { %v1290_v56 = vpop.xlane.xlu2 %1289 }
 0xfa8   :  { %v1297_v57 = vmul.f32 %v1290_v56, %v2260_v22 }
 0xfaa   :  { %v1300_v58 = vadd.f32 1e-12, %v1297_v57 }
 0xfac   :  { %1966 = vrsqrt.f32 %v1300_v58  ;;  %vm1309_vm8 = vweird.f32 %v1300_v58 }
 0xfaf   :  { %v1293_v11 = vpop.xlane.xlu1 %1292 }
 0xfb0   :  { %v1298_v61 = vmul.f32 %v1293_v11, %v2260_v22 }
 0xfb2   :  { %v1967_v1 = vpop.eup %1966  ;;  %v1301_v4 = vadd.f32 1e-12, %v1298_v61 }
 0xfb3   :  { %v1304_v30 = vmul.f32 %v1967_v1, %v1300_v58  ;;  %vm1310_vm12 = vweird.f32 %v1967_v1 }
 0xfb4   :  { %1968 = vrsqrt.f32 %v1301_v4  ;;  %vm1311_vm9 = vmor %vm1309_vm8, %vm1310_vm12  ;;  %vm1319_vm15 = vweird.f32 %v1301_v4 }
 0xfb5   :  { %v1305_v33 = vmul.f32 %v1967_v1, %v1304_v30 }
 0xfb7   :  { %v1306_v10 = vmul.f32 0.5, %v1305_v33 }
 0xfb9   :  { %v1307_v54 = vsub.f32 1.5, %v1306_v10 }
 0xfba   :  { %v1969_v15 = vpop.eup %1968 }
 0xfbb   :  { %v1314_v16 = vmul.f32 %v1969_v15, %v1301_v4  ;;  %v1308_v20 = vmul.f32 %v1967_v1, %v1307_v54  ;;  %vm1320_vm10 = vweird.f32 %v1969_v15 }
 0xfbc   :  { %vm1321_vm2 = vmor %vm1319_vm15, %vm1320_vm10 }
 0xfbd   :  { %v1315_v12 = vmul.f32 %v1969_v15, %v1314_v16  ;;  %v1312_v23 = vsel %vm1311_vm9, %v1967_v1, %v1308_v20 }
 0xfbe   :  { %v1333_v27 = vmul.f32 %v1312_v23, %v2704_v34 }
 0xfbf   :  { %v1316_v21 = vmul.f32 0.5, %v1315_v12 }
 0xfc0   :  { %v1337_v14 = vmul.f32 %v2744_v26, %v1333_v27 }
 0xfc1   :  { %v1317_v25 = vsub.f32 1.5, %v1316_v21 }
 0xfc2   :  { %v1341_v35 = vadd.f32 %v2749_v19, %v1337_v14 }
 0xfc3   :  { %v1318_v18 = vmul.f32 %v1969_v15, %v1317_v25  ;;  %v1381_v25 = vperm.slane %v2007_v45, 6 }
 0xfc5   :  { %v1322_v31 = vsel %vm1321_vm2, %v1969_v15, %v1318_v18 }
 0xfc6   :  { %v1334_v32 = vmul.f32 %v1322_v31, %v2710_v13 }
 0xfc8   :  { %v1338_v55 = vmul.f32 %v2744_v26, %v1334_v32 }
 0xfca   :  { %v1342_v29 = vadd.f32 %v2749_v19, %v1338_v55  ;;  %v1613_v55 = vld [vmem:[%s2906_s13 + $0x10] sm:$0xff] }
 0xfcc   :  { %v1345_v24 = vrot.slane %v1342_v29, 7  ;;  %v1404_v34 = vpack.c.bf16 %v1342_v29, %v1341_v35  ;;  %v1614_v29 = vld [vmem:[%s2906_s13 + $0x18] sm:$0xff] }
 0xfce   :  { %v1348_v37 = vsel %vm1347_vm11, %v1341_v35, %v1345_v24  ;;  %v1617_v24 = vpack.c.bf16 %v1614_v29, %v1613_v55 }
 0xfcf   :  { %v1353_v8 = vpack.c.bf16 %v1348_v37, %v1348_v37 }
 0xfd0   :  { %1628 = vmatpush.bf16.msrb.mxu1 %v1617_v24 }
 0xfd1   :  { %1853 = vmatmul.msk.bf16.vlgmr.msra.gmra.mxu2 %vm74_vm0, %v1353_v8  ;;  %v1611_v8 = vld [vmem:[%s2906_s13] sm:$0xff] }
 0xfe1   :  { %1855 = vmatmul.msk.bf16.vlgmr.msrb.gmra.mxu2 %vm74_vm0, %v1404_v34  ;;  %v1612_v34 = vld [vmem:[%s2906_s13 + $0x8] sm:$0xff] }
0x100b   :  { %v1263_v13 = vpop.f32.mrf.mxu3 }
0x100c   :  { %v1264_v17 = vadd.f32 %v1263_v13, %v2687_v5  ;;  %v1374_v5 = vld [vmem:[%s2903_s10] sm:$0xff] }
0x100e   :  { %v1269_v3 = vadd.f32 %v1264_v17, %v2698_v2  ;;  %v1375_v2 = vld [vmem:[%s2903_s10 + $0x8] sm:$0xff]  ;;  %v1616_v17 = vpack.c.bf16 %v1612_v34, %v1611_v8  ;;  %v2117_v34 = vmov 0  }
0x100f   :  { %v1379_v44 = vpack.c.bf16 %v1375_v2, %v1374_v5  ;;  %1878 = vset.pattern.permute.xlu0 %v2117_v34  ;;  %1879 = vset.pattern.permute.xlu1 %v2117_v34 }
0x1010   :  { %v1276_v38 = vsel %vm74_vm0, %v1269_v3, 0.0  ;;  %1629 = vmatpush.bf16.msrb.mxu1 %v1616_v17  ;;  %1877 = vset.pattern.permute.xlu2 %v2117_v34 }
0x1011   :  { %1277 = vadd.xlane.f32.xlu2 %v1276_v38  ;;  %1392 = vmatpush.bf16.msrb.mxu0 %v1379_v44 }
0x1013   :  { %v1265_v39 = vpop.f32.mrf.mxu3 }
0x1054   :  { %v1369_v47 = vpop.f32.mrf.mxu2 }
0x1055   :  { %v1370_v48 = vadd.f32 %v1369_v47, %v1356_v46 }
0x1057   :  { %1970 = vtanh.f32 %v1370_v48 }
0x105c   :  { %v1371_v49 = vpop.f32.mrf.mxu2 }
0x105d   :  { %v1971_v50 = vpop.eup %1970 }
0x105e   :  { %v1378_v51 = vpack.c.bf16 %v1971_v50, %v1971_v50 }
0x1060   :  { %1854 = vmatmul.msk.bf16.vlgmr.msrb.gmra.mxu0 %vm74_vm0, %v1378_v51 }
0x1064   :  { %v1420_v56 = vpop.f32.mrf.mxu2 }
0x1065   :  { %v1421_v28 = vadd.f32 %v1420_v56, %v1407_v52 }
0x1067   :  { %v1425_v36 = vmul.f32 %v1421_v28, %v1421_v28 }
0x1069   :  { %v1427_v57 = vmul.f32 %v1425_v36, %v1421_v28  ;;  %v1495_v36 = vld [vmem:[%s2905_s12 + $0x10] sm:$0xff] }
0x106b   :  { %v1429_v40 = vmul.f32 0.044715, %v1427_v57  ;;  %v1496_v57 = vld [vmem:[%s2905_s12 + $0x18] sm:$0xff] }
0x106c   :  { %v1422_v58 = vpop.f32.mrf.mxu2 }
0x106d   :  { %v1423_v53 = vadd.f32 %v1422_v58, %v1407_v52  ;;  %v1431_v59 = vadd.f32 %v1429_v40, %v1421_v28  ;;  %v1499_v40 = vpack.c.bf16 %v1496_v57, %v1495_v36 }
0x106f   :  { %v1426_v60 = vmul.f32 %v1423_v53, %v1423_v53  ;;  %v1433_v11 = vmul.f32 0.7978846, %v1431_v59  ;;  %1510 = vmatpush.bf16.msra.mxu0 %v1499_v40 }
0x1071   :  { %v1428_v61 = vmul.f32 %v1426_v60, %v1423_v53  ;;  %1972 = vtanh.f32 %v1433_v11 }
0x1073   :  { %v1430_v62 = vmul.f32 0.044715, %v1428_v61 }
0x1075   :  { %v1432_v63 = vadd.f32 %v1430_v62, %v1423_v53 }
0x1077   :  { %v1973_v0 = vpop.eup %1972  ;;  %v1434_v1 = vmul.f32 0.7978846, %v1432_v63 }
0x1078   :  { %v1437_v4 = vadd.f32 1.0, %v1973_v0 }
0x1079   :  { %1974 = vtanh.f32 %v1434_v1 }
0x107a   :  { %v1439_v6 = vmul.f32 0.5, %v1437_v4 }
0x107c   :  { %v1441_v7 = vmul.f32 %v1439_v6, %v1421_v28 }
0x107e   :  { %v1443_v30 = vsel %vm74_vm0, %v1441_v7, 0.0 }
0x107f   :  { %v1975_v9 = vpop.eup %1974  ;;  %1444 = vadd.xlane.f32.xlu0 %v1443_v30 }
0x1080   :  { %v1438_v33 = vadd.f32 1.0, %v1975_v9 }
0x1082   :  { %v1440_v10 = vmul.f32 0.5, %v1438_v33 }
0x1084   :  { %v1278_v54 = vpop.xlane.xlu2 %1277  ;;  %v1442_v15 = vmul.f32 %v1440_v10, %v1423_v53  ;;  %v71_v10 = vld [vmem:[%s2900_s7 + $0x8] sm:$0xf]  ;;  %s1761_s7 = sshll.u32 %s2914_s21, 4  ;;  %s1770_s21 = sshll.u32 %s2123_s20, 4  ;;  %s1762_s7 = int_to_ptr.hbm [resolvable:$true] %s1761_s7  ;;  %s1771_s21 = int_to_ptr.vmem [resolvable:$true] %s1770_s21 }
0x1085   :  { %v1281_v16 = vmul.f32 %v1278_v54, %v2260_v22  ;;  %v1618_v29 = vperm.slane %v71_v10, 3 }
0x1086   :  { %v1446_v20 = vsel %vm74_vm0, %v1442_v15, 0.0 }
0x1087   :  { %v1284_v12 = vsub.f32 %v1269_v3, %v1281_v16  ;;  %1447 = vadd.xlane.f32.xlu1 %v1446_v20  ;;  %v1487_v16 = vperm.slane %v71_v10, 0 }
0x1089   :  { %v1287_v21 = vmul.f32 %v1284_v12, %v1284_v12 }
0x108b   :  { %v1294_v23 = vsel %vm74_vm0, %v1287_v21, 0.0 }
0x108c   :  { %1295 = vadd.xlane.f32.xlu2 %v1294_v23  ;;  %v1490_v23 = vperm.slane %v71_v10, 1 }
0x10dd   :  { %v1394_v18 = vpop.f32.mrf.mxu0 }
0x10de   :  { %v2780_v27 = vadd.f32 %v1394_v18, %v1381_v25 }
0x10e0   :  { %1399 = vst.msk [vmem:[#allocation2] sm:$0x3] %vm1398_vm13, %v2780_v27 }
0x10e1   :  { %1742 = dma.vmem_to_hbm [thread:$0]  %s1738_s6, 32, %s1740_s26, [#allocation3]  }
0x10e5   :  { %v1396_v31 = vpop.f32.mrf.mxu0 }
0x10f2   :  { %v1445_v32 = vpop.xlane.xlu0 %1444 }
0x10f3   :  { %v1449_v14 = vmul.f32 %v1445_v32, %v2260_v22 }
0x10f5   :  { %v2791_v35 = vsub.f32 %v1441_v7, %v1449_v14 }
0x10f7   :  { %v1453_v37 = vmul.f32 %v2791_v35, %v2791_v35 }
0x10f9   :  { %v1455_v13 = vsel %vm74_vm0, %v1453_v37, 0.0 }
0x10fa   :  { %v1448_v3 = vpop.xlane.xlu1 %1447  ;;  %1456 = vadd.xlane.f32.xlu0 %v1455_v13  ;;  %v1500_v13 = vperm.slane %v71_v10, 2 }
0x10fb   :  { %v1450_v38 = vmul.f32 %v1448_v3, %v2260_v22 }
0x10fd   :  { %v2803_v39 = vsub.f32 %v1442_v15, %v1450_v38 }
0x10ff   :  { %v1296_v41 = vpop.xlane.xlu2 %1295  ;;  %v1454_v42 = vmul.f32 %v2803_v39, %v2803_v39 }
0x1100   :  { %v1299_v43 = vmul.f32 %v1296_v41, %v2260_v22 }
0x1101   :  { %v1458_v5 = vsel %vm74_vm0, %v1454_v42, 0.0 }
0x1102   :  { %v1302_v2 = vadd.f32 1e-12, %v1299_v43  ;;  %1459 = vadd.xlane.f32.xlu1 %v1458_v5  ;;  %v1691_v5 = vsel %vm1398_vm13, %v2780_v27, -inf }
0x1104   :  { %1976 = vrsqrt.f32 %v1302_v2  ;;  %vm1329_vm4 = vweird.f32 %v1302_v2 }
0x110a   :  { %v1977_v44 = vpop.eup %1976 }
0x110b   :  { %v1324_v45 = vmul.f32 %v1977_v44, %v1302_v2  ;;  %vm1330_vm3 = vweird.f32 %v1977_v44 }
0x110c   :  { %vm1331_vm5 = vmor %vm1329_vm4, %vm1330_vm3 }
0x110d   :  { %v1325_v46 = vmul.f32 %v1977_v44, %v1324_v45  ;;  %v2839_v45 = vld [vmem:[%s2929_s15 + $0x8] sm:$0xff] }
0x110f   :  { %v1326_v47 = vmul.f32 0.5, %v1325_v46 }
0x1111   :  { %v1327_v48 = vsub.f32 1.5, %v1326_v47 }
0x1113   :  { %v1328_v49 = vmul.f32 %v1977_v44, %v1327_v48 }
0x1115   :  { %v1332_v50 = vsel %vm1331_vm5, %v1977_v44, %v1328_v49  ;;  %v1647_v49 = vld [vmem:[%s2930_s3] sm:$0xff]  ;;  %vm1609_vm5 = vcmask 0  }
0x1116   :  { %v1335_v51 = vmul.f32 %v1332_v50, %v1284_v12 }
0x1118   :  { %v1339_v52 = vmul.f32 %v2744_v26, %v1335_v51  ;;  %v1493_v26 = vld [vmem:[%s2905_s12] sm:$0xff] }
0x111a   :  { %v1343_v56 = vadd.f32 %v2749_v19, %v1339_v52  ;;  %v1494_v19 = vld [vmem:[%s2905_s12 + $0x8] sm:$0xff] }
0x111b   :  { %v1498_v59 = vpack.c.bf16 %v1494_v19, %v1493_v26 }
0x111c   :  { %v1615_v28 = vpack.c.bf16 %v1343_v56, %v1343_v56 }
0x111d   :  { %1511 = vmatpush.bf16.msra.mxu0 %v1498_v59 }
0x111e   :  { %1861 = vmatmul.msk.bf16.vlgmr.msrb.gmra.mxu1 %vm74_vm0, %v1615_v28  ;;  %v1648_v28 = vadd.f32 1e-09, %v1647_v49 }
0x116d   :  { %v1457_v58 = vpop.xlane.xlu0 %1456 }
0x116e   :  { %v1461_v53 = vmul.f32 %v1457_v58, %v2260_v22 }
0x1170   :  { %v1463_v60 = vadd.f32 1e-12, %v1461_v53 }
0x1172   :  { %1978 = vrsqrt.f32 %v1463_v60  ;;  %vm1471_vm7 = vweird.f32 %v1463_v60 }
0x1175   :  { %v1460_v11 = vpop.xlane.xlu1 %1459 }
0x1176   :  { %v1462_v61 = vmul.f32 %v1460_v11, %v2260_v22 }
0x1178   :  { %v1979_v62 = vpop.eup %1978  ;;  %v1464_v63 = vadd.f32 1e-12, %v1462_v61 }
0x1179   :  { %v1466_v0 = vmul.f32 %v1979_v62, %v1463_v60  ;;  %vm1472_vm6 = vweird.f32 %v1979_v62 }
0x117a   :  { %1980 = vrsqrt.f32 %v1464_v63  ;;  %vm1473_vm12 = vmor %vm1471_vm7, %vm1472_vm6  ;;  %vm1481_vm9 = vweird.f32 %v1464_v63  ;;  %vm1555_vm7 = vcmp.ne.s32.totalorder %v2839_v45, 4294967295 }
0x117b   :  { %v1467_v1 = vmul.f32 %v1979_v62, %v1466_v0 }
0x117d   :  { %v1468_v4 = vmul.f32 0.5, %v1467_v1  ;;  %v2857_v1 = vld [vmem:[%s2929_s15] sm:$0xff] }
0x117f   :  { %v1469_v6 = vsub.f32 1.5, %v1468_v4  ;;  %v1703_v4 = vld [vmem:[%s2931_s30] sm:$0x3] }
0x1180   :  { %v1981_v7 = vpop.eup %1980 }
0x1181   :  { %v1470_v30 = vmul.f32 %v1979_v62, %v1469_v6  ;;  %v1476_v9 = vmul.f32 %v1981_v7, %v1464_v63  ;;  %vm1482_vm8 = vweird.f32 %v1981_v7  ;;  %v1656_v6 = vld [vmem:[%s2932_s23] sm:$0xff] }
0x1182   :  { %vm1483_vm10 = vmor %vm1481_vm9, %vm1482_vm8 }
0x1183   :  { %v1477_v33 = vmul.f32 %v1981_v7, %v1476_v9  ;;  %v1474_v54 = vsel %vm1473_vm12, %v1979_v62, %v1470_v30  ;;  %vm1554_vm12 = vcmp.ne.s32.totalorder %v2857_v1, 4294967295 }
0x1184   :  { %v1485_v20 = vmul.f32 %v1474_v54, %v2791_v35 }
0x1185   :  { %v1478_v22 = vmul.f32 0.5, %v1477_v33 }
0x1186   :  { %v1488_v25 = vmul.f32 %v1487_v16, %v1485_v20 }
0x1187   :  { %v1479_v15 = vsub.f32 1.5, %v1478_v22 }
0x1188   :  { %v1491_v32 = vadd.f32 %v1490_v23, %v1488_v25 }
0x1189   :  { %v1480_v12 = vmul.f32 %v1981_v7, %v1479_v15 }
0x118b   :  { %v1484_v21 = vsel %vm1483_vm10, %v1981_v7, %v1480_v12 }
0x118c   :  { %v1486_v18 = vmul.f32 %v1484_v21, %v2803_v39 }
0x118e   :  { %v1489_v31 = vmul.f32 %v1487_v16, %v1486_v18  ;;  %v1540_v16 = vlaneseq }
0x1190   :  { %v1492_v14 = vadd.f32 %v1490_v23, %v1489_v31  ;;  %v1541_v21 = vand.u32 127, %v1540_v16 }
0x1192   :  { %v1497_v55 = vpack.c.bf16 %v1492_v14, %v1491_v32  ;;  %v2118_v14 = vmov 0.0  }
0x1194   :  { %1856 = vmatmul.msk.bf16.vlgmr.msra.gmra.mxu0 %vm74_vm0, %v1497_v55  ;;  %vm1572_vm0 = vcmask 7168  }
0x1195   :  { %v1667_v7 = vsel %vm1572_vm0, %v1656_v6, 0.0 }
0x1196   :  { %v1668_v30 = vrot.slane %v1667_v7, 4 }
0x1198   :  { %v1669_v9 = vadd.f32 %v1668_v30, %v1667_v7 }
0x119a   :  { %v1670_v33 = vrot.slane %v1669_v9, 2 }
0x119b   :  { %v1631_v24 = vpop.f32.mrf.mxu1 }
0x119c   :  { %v1632_v37 = vadd.f32 %v1631_v24, %v1618_v29  ;;  %v1671_v10 = vadd.f32 %v1670_v33, %v1669_v9 }
0x119e   :  { %v1635_v8 = vsel %vm251_vm14, %v1632_v37, -inf  ;;  %v1672_v54 = vrot.slane %v1671_v10, 1 }
0x119f   :  { %1636 = vmax.xlane.f32.xlu2 %v1635_v8 }
0x11a0   :  { %v1673_v22 = vadd.f32 %v1672_v54, %v1671_v10 }
0x11a2   :  { %v1674_v15 = vmax.f32 %v1673_v22, 1.0 }
0x11a3   :  { %v1633_v35 = vpop.f32.mrf.mxu1 }
0x11a4   :  { %vm1680_vm2 = vweird.f32 %v1674_v15 }
0x1211   :  { %v1513_v17 = vpop.f32.mrf.mxu0 }
0x1212   :  { %v1514_v3 = vadd.f32 %v1513_v17, %v1500_v13  ;;  %v1637_v38 = vpop.xlane.xlu2 %1636 }
0x1213   :  { %v1638_v39 = vsub.f32 %v1632_v37, %v1637_v38 }
0x1214   :  { %1518 = vmax.xlane.f32.xlu0 %v1514_v3 }
0x1215   :  { %v1639_v41 = vmul.f32 1.442695, %v1638_v39 }
0x1217   :  { %1982 = vpow2.f32 %v1639_v41 }
0x1219   :  { %v1515_v42 = vpop.f32.mrf.mxu0 }
0x121a   :  { %v1516_v43 = vadd.f32 %v1515_v42, %v1500_v13  ;;  %v1686_v42 = vand.u32 2147483648, %v1674_v15 }
0x121c   :  { %1520 = vmax.xlane.f32.xlu1 %v1516_v43  ;;  %1692 = vmax.xlane.f32.xlu0 %v1691_v5 }
0x121d   :  { %v1983_v2 = vpop.eup %1982 }
0x121e   :  { %v1641_v44 = vsel %vm251_vm14, %v1983_v2, 0.0 }
0x1224   :  { %1642 = vadd.xlane.f32.xlu0 %v1641_v44  ;;  %v1684_v44 = vand.u32 2147483647, %v1674_v15 }
0x1226   :  { %vm1685_vm4 = vcmp.eq.f32.partialorder %v1684_v44, 8.507059e+37 }
0x1238   :  { %1546 = vperm.xlu0 %1878, %v2839_v45  }
0x1287   :  { %v1519_v46 = vpop.xlane.xlu0 %1518 }
0x1288   :  { %v2849_v36 = vsub.f32 %v1514_v3, %v1519_v46 }
0x128a   :  { %v1524_v58 = vmul.f32 1.442695, %v2849_v36 }
0x128f   :  { %v1521_v47 = vpop.xlane.xlu1 %1520  ;;  %v1693_v48 = vpop.xlane.xlu0 %1692 }
0x1290   :  { %v1523_v50 = vsub.f32 %v1516_v43, %v1521_v47  ;;  %v2846_v51 = vsub.f32 %v2780_v27, %v1693_v48 }
0x1292   :  { %v1526_v52 = vmul.f32 1.442695, %v1523_v50  ;;  %v1695_v56 = vmul.f32 1.442695, %v2846_v51 }
0x1294   :  { %1984 = vpow2.f32 %v1526_v52 }
0x1295   :  { %1986 = vpow2.f32 %v1695_v56 }
0x1296   :  { %1988 = vlog2.f32 %v1648_v28 }
0x1297   :  { %v1643_v57 = vpop.xlane.xlu0 %1642 }
0x1298   :  { %1990 = vlog2.f32 %v1643_v57 }
0x1299   :  { %1992 = vpow2.f32 %v1524_v58 }
0x129a   :  { %v1985_v40 = vpop.eup %1984  ;;  %1994 = vrcp.f32 %v1674_v15 }
0x129b   :  { %v1987_v53 = vpop.eup %1986  ;;  %1530 = vadd.xlane.f32.xlu2 %v1985_v40 }
0x129c   :  { %v1989_v26 = vpop.eup %1988  ;;  %v1697_v27 = vsel %vm1398_vm13, %v1987_v53, 0.0 }
0x129d   :  { %1698 = vadd.xlane.f32.xlu1 %v1697_v27  ;;  %v1650_v60 = vmul.f32 0.6931472, %v1989_v26 }
0x129e   :  { %v1991_v19 = vpop.eup %1990 }
0x129f   :  { %v1645_v59 = vmul.f32 0.6931472, %v1991_v19  ;;  %v1993_v62 = vpop.eup %1992 }
0x12a0   :  { %v1995_v25 = vpop.eup %1994 }
0x12a1   :  { %v1646_v11 = vsub.f32 %v1638_v39, %v1645_v59  ;;  %v1676_v31 = vmul.f32 %v1995_v25, %v1674_v15  ;;  %vm1681_vm11 = vweird.f32 %v1995_v25 }
0x12a2   :  { %vm1682_vm3 = vmor %vm1680_vm2, %vm1681_vm11 }
0x12a3   :  { %v1651_v61 = vsub.f32 %v1650_v60, %v1646_v11  ;;  %v1677_v37 = vsub.f32 1.0, %v1676_v31  ;;  %v1860_v60 = vsel %vm1555_vm7, 1.0, %v2118_v14  ;;  %v1859_v11 = vsel %vm1554_vm12, 1.0, %v2118_v14 }
0x12a5   :  { %1528 = vadd.xlane.f32.xlu1 %v1993_v62  ;;  %v1652_v63 = vmul.f32 %v1651_v61, %v1647_v49  ;;  %v1678_v17 = vmul.f32 %v1995_v25, %v1677_v37  ;;  %v1687_v49 = vor.u32 1.1754944e-38, %v1686_v42  ;;  %v1584_v61 = vsel %vm1572_vm0, %v1859_v11, 0.0 }
0x12a7   :  { %v1653_v0 = vsel %vm251_vm14, %v1652_v63, 0.0  ;;  %v1679_v2 = vadd.f32 %v1995_v25, %v1678_v17 }
0x12a8   :  { %1654 = vadd.xlane.f32.xlu0 %v1653_v0 }
0x12a9   :  { %v1683_v52 = vsel %vm1682_vm3, %v1995_v25, %v1679_v2 }
0x12aa   :  { %v1547_v23 = vpop.permute.xlu0 %1546  ;;  %v1688_v28 = vsel %vm1685_vm4, %v1687_v49, %v1683_v52 }
0x12ab   :  { %vm1549_vm14 = vcmp.eq.s32.totalorder %v1541_v21, %v1547_v23 }
0x12ac   :  { %v1858_v55 = vsel %vm1549_vm14, 1.0, %v2118_v14 }
0x12b3   :  { %1543 = vperm.xlu2 %1877, %v2857_v1  }
0x12be   :  { %1705 = vperm.xlu1 %1879, %v1703_v4  }
0x130e   :  { %v1531_v20 = vpop.xlane.xlu2 %1530 }
0x130f   :  { %1996 = vlog2.f32 %v1531_v20 }
0x1310   :  { %v1699_v12 = vpop.xlane.xlu1 %1698 }
0x1315   :  { %v1997_v18 = vpop.eup %1996 }
0x1316   :  { %v1535_v32 = vmul.f32 0.6931472, %v1997_v18  ;;  %v1544_v34 = vpop.permute.xlu2 %1543 }
0x1317   :  { %vm1548_vm15 = vcmp.eq.s32.totalorder %v1541_v21, %v1544_v34 }
0x1318   :  { %v1529_v29 = vpop.xlane.xlu1 %1528  ;;  %v1537_v24 = vsub.f32 %v1523_v50, %v1535_v32  ;;  %v1857_v5 = vsel %vm1548_vm15, 1.0, %v2118_v14 }
0x1319   :  { %1998 = vlog2.f32 %v1529_v29 }
0x131a   :  { %v1561_v8 = vmul.f32 %v1858_v55, %v1537_v24  ;;  %2000 = vlog2.f32 %v1699_v12  ;;  %v2120_v12 = vmov 2.0  }
0x131b   :  { %v1655_v35 = vpop.xlane.xlu0 %1654 }
0x131c   :  { %v1657_v13 = vmul.f32 %v1656_v6, %v1655_v35  ;;  %1564 = vadd.xlane.f32.xlu1 %v1561_v8 }
0x131e   :  { %v1659_v3 = vsel %vm1572_vm0, %v1657_v13, 0.0 }
0x131f   :  { %v1999_v38 = vpop.eup %1998  ;;  %v1660_v39 = vrot.slane %v1659_v3, 4 }
0x1320   :  { %v1533_v41 = vmul.f32 0.6931472, %v1999_v38  ;;  %v2001_v40 = vpop.eup %2000 }
0x1321   :  { %v1661_v43 = vadd.f32 %v1660_v39, %v1659_v3  ;;  %v1701_v53 = vmul.f32 0.6931472, %v2001_v40 }
0x1322   :  { %v1536_v46 = vsub.f32 %v2849_v36, %v1533_v41 }
0x1323   :  { %v1662_v47 = vrot.slane %v1661_v43, 2  ;;  %v1702_v36 = vsub.f32 %v2846_v51, %v1701_v53  ;;  %v1585_v51 = vsel %vm1572_vm0, %v1860_v60, 0.0 }
0x1324   :  { %v1560_v48 = vmul.f32 %v1857_v5, %v1536_v46  ;;  %v1586_v62 = vadd.f32 %v1585_v51, %v1584_v61 }
0x1325   :  { %v1663_v50 = vadd.f32 %v1662_v47, %v1661_v43 }
0x1326   :  { %1562 = vadd.xlane.f32.xlu2 %v1560_v48  ;;  %v1587_v63 = vrot.slane %v1586_v62, 4 }
0x1327   :  { %v1664_v56 = vrot.slane %v1663_v50, 1 }
0x1328   :  { %v1588_v0 = vadd.f32 %v1587_v63, %v1586_v62 }
0x1329   :  { %v1665_v57 = vadd.f32 %v1664_v56, %v1663_v50 }
0x132a   :  { %v1589_v4 = vrot.slane %v1588_v0, 2 }
0x132b   :  { %v1689_v58 = vmul.f32 %v1688_v28, %v1665_v57 }
0x132c   :  { %v1590_v6 = vadd.f32 %v1589_v4, %v1588_v0 }
0x132d   :  { %1690 = vst.msk [vmem:[#allocation6] sm:$0x1] %vm1609_vm5, %v1689_v58 }
0x132e   :  { %v1591_v7 = vrot.slane %v1590_v6, 1 }
0x1330   :  { %v1706_v26 = vpop.permute.xlu1 %1705  ;;  %v1592_v30 = vadd.f32 %v1591_v7, %v1590_v6 }
0x1331   :  { %vm1707_vm6 = vcmp.eq.s32.totalorder %v1541_v21, %v1706_v26 }
0x1332   :  { %v1862_v27 = vsel %vm1707_vm6, 1.0, %v2118_v14  ;;  %v1593_v9 = vmax.f32 %v1592_v30, 1.0 }
0x1333   :  { %v1710_v19 = vmul.f32 %v1862_v27, %v1702_v36 }
0x1334   :  { %2002 = vrcp.f32 %v1593_v9  ;;  %v1605_v32 = vand.u32 2147483648, %v1593_v9  ;;  %v1603_v24 = vand.u32 2147483647, %v1593_v9 }
0x1335   :  { %v1711_v59 = vsel %vm1398_vm13, %v1710_v19, 0.0  ;;  %2004 = vrcp.f32 %v2120_v12  ;;  %vm1599_vm13 = vweird.f32 %v1593_v9 }
0x1336   :  { %1712 = vadd.xlane.f32.xlu2 %v1711_v59  ;;  %v1606_v8 = vor.u32 1.1754944e-38, %v1605_v32  ;;  %vm1604_vm10 = vcmp.eq.f32.partialorder %v1603_v24, 8.507059e+37 }
0x133a   :  { %v2003_v10 = vpop.eup %2002 }
0x133b   :  { %v1595_v54 = vmul.f32 %v2003_v10, %v1593_v9  ;;  %vm1600_vm8 = vweird.f32 %v2003_v10  ;;  %v2005_v14 = vpop.eup %2004 }
0x133c   :  { %vm1601_vm9 = vmor %vm1599_vm13, %vm1600_vm8  ;;  %v1724_v35 = vmul.f32 2.0, %v2005_v14 }
0x133d   :  { %v1596_v16 = vsub.f32 1.0, %v1595_v54 }
0x133e   :  { %v1725_v41 = vsub.f32 1.0, %v1724_v35 }
0x133f   :  { %v1597_v18 = vmul.f32 %v2003_v10, %v1596_v16 }
0x1340   :  { %v1726_v44 = vmul.f32 %v2005_v14, %v1725_v41 }
0x1341   :  { %v1598_v29 = vadd.f32 %v2003_v10, %v1597_v18 }
0x1342   :  { %v1727_v48 = vadd.f32 %v2005_v14, %v1726_v44 }
0x1343   :  { %v1602_v13 = vsel %vm1601_vm9, %v2003_v10, %v1598_v29 }
0x1344   :  { %v1607_v39 = vsel %vm1604_vm10, %v1606_v8, %v1602_v13 }
0x138f   :  { %v1565_v33 = vpop.xlane.xlu1 %1564 }
0x1390   :  { %v1567_v45 = vsub.f32 0.0, %v1565_v33 }
0x1392   :  { %v1569_v1 = vmul.f32 %v1860_v60, %v1567_v45 }
0x1394   :  { %v1574_v21 = vsel %vm1572_vm0, %v1569_v1, 0.0 }
0x1399   :  { %v1563_v22 = vpop.xlane.xlu2 %1562 }
0x139a   :  { %v1566_v15 = vsub.f32 0.0, %v1563_v22 }
0x139c   :  { %v1568_v20 = vmul.f32 %v1859_v11, %v1566_v15 }
0x139e   :  { %v1573_v23 = vsel %vm1572_vm0, %v1568_v20, 0.0  ;;  %vm1728_vm0 = vweird.f32 %v2005_v14 }
0x139f   :  { %v1575_v25 = vadd.f32 %v1574_v21, %v1573_v23  ;;  %v1729_v52 = vsel %vm1728_vm0, %v2005_v14, %v1727_v48 }
0x13a1   :  { %v1576_v31 = vrot.slane %v1575_v25, 4 }
0x13a3   :  { %v1577_v55 = vadd.f32 %v1576_v31, %v1575_v25 }
0x13a5   :  { %v1578_v37 = vrot.slane %v1577_v55, 2 }
0x13a7   :  { %v1579_v34 = vadd.f32 %v1578_v37, %v1577_v55 }
0x13a9   :  { %v1713_v17 = vpop.xlane.xlu2 %1712  ;;  %v1580_v3 = vrot.slane %v1579_v34, 1 }
0x13aa   :  { %v1714_v38 = vsub.f32 0.0, %v1713_v17 }
0x13ab   :  { %v1581_v42 = vadd.f32 %v1580_v3, %v1579_v34 }
0x13ac   :  { %v1716_v43 = vsel %vm144_vm1, %v1714_v38, 0.0 }
0x13ad   :  { %v1717_v5 = vrot.slane %v1716_v43, 4  ;;  %v1608_v2 = vmul.f32 %v1607_v39, %v1581_v42 }
0x13af   :  { %v1718_v46 = vadd.f32 %v1717_v5, %v1716_v43  ;;  %1610 = vst.msk [vmem:[#allocation4] sm:$0x1] %vm1609_vm5, %v1608_v2 }
0x13b0   :  { %1753 = dma.vmem_to_hbm [thread:$0]  %s1749_s4, 16, %s1751_s9, [#allocation5]  }
0x13b1   :  { %v1719_v47 = vrot.slane %v1718_v46, 2  ;;  %1764 = dma.vmem_to_hbm [thread:$0]  %s1760_s11, 16, %s1762_s7, [#allocation5]  }
0x13b3   :  { %v1720_v49 = vadd.f32 %v1719_v47, %v1718_v46 }
0x13b5   :  { %v1721_v50 = vrot.slane %v1720_v49, 1 }
0x13b7   :  { %v1722_v56 = vadd.f32 %v1721_v50, %v1720_v49 }
0x13b9   :  { %v1730_v28 = vmul.f32 %v1729_v52, %v1722_v56 }
0x13bb   :  { %1731 = vst.msk [vmem:[#allocation7] sm:$0x1] %vm1609_vm5, %v1730_v28 }
0x13bc   :  { %1775 = dma.vmem_to_hbm [thread:$0]  %s1771_s21, 16, %s1773_s27, [#allocation8]  }
0x13bd   :  { %2104 = dma.done.wait [#allocation3], 32  }
0x13be   :  { %2105 = vsyncadd [#allocation3], 4294967264 }
0x13bf   :  { %2106 = dma.done.wait [#allocation5], 32  }
0x13c0   :  { %2107 = vsyncadd [#allocation5], 4294967264 }
0x13c1   :  { %2108 = dma.done.wait [#allocation8], 16  }
0x13c2   :  { %2109 = vsyncadd [#allocation8], 4294967280 }
0x13c3   :  { %1792 = vsyncpa [#allocation3], 1 }
0x13c4   :  { %1793 = vsyncpa [#allocation5], 1 }
0x13c5   :  { %1794 = vsyncpa [#allocation8], 1 }

</bundles_post_ra>
